<compile_context>
chip_gen: v7x
topology: tpu7x:2x2x1
jax: 0.10.0
libtpu: 0.0.40
codegen_flags: <defaults>
</compile_context>

<pallas_src>
import functools

import numpy as np
import jax
import jax.numpy as jnp
from jax import lax
from jax.experimental import pallas as pl
from jax.experimental.pallas import tpu as pltpu

_F32 = jnp.float32


def _const_spec(shape):
    nd = len(shape)
    return pl.BlockSpec(shape, lambda i, _nd=nd: (0,) * _nd)


def _round_up(x, m):
    return ((x + m - 1) // m) * m


def _padded_cat_dim(x_dim, units):
    """Padded concat-feature width for a DCGRU cell (multiple of 8 lanes)."""
    return _round_up(x_dim + units, 8)


# ----------------------------------------------------------------------------
# In-kernel helpers (traced inside the Pallas kernel body).
# ----------------------------------------------------------------------------
def _block_diag(s, B):
    """(N, N) -> (B*N, B*N) block-diagonal: batched diffusion in one matmul."""
    if B == 1:
        return s
    z = jnp.zeros_like(s)
    rows = [jnp.concatenate([s if j == i else z for j in range(B)], axis=1)
            for i in range(B)]
    return jnp.concatenate(rows, axis=0)


def _cheb_concat(v, supports, K):
    """Chebyshev diffusion terms, concatenated along the feature axis.

    v: (R, D).  supports: tuple of 2 (R, R) matrices, or None for the model's
    initial zero adjacency (T1 = 0, T_k = -T_{k-2}).
    Returns (R, (2K+1)*D).
    """
    terms = [v]
    if supports is None:
        zero = jnp.zeros_like(v)
        for _ in range(2):                       # dual_random_walk: 2 supports
            t_km2, t_km1 = v, zero
            terms.append(t_km1)
            for _ in range(2, K + 1):
                t_k = -t_km2
                terms.append(t_k)
                t_km2, t_km1 = t_km1, t_k
    else:
        for s in supports:
            t_km2 = v
            t_km1 = jnp.dot(s, v, preferred_element_type=_F32)
            terms.append(t_km1)
            for _ in range(2, K + 1):
                t_k = 2.0 * jnp.dot(s, t_km1, preferred_element_type=_F32) - t_km2
                terms.append(t_k)
                t_km2, t_km1 = t_km1, t_k
    return jnp.concatenate(terms, axis=-1)


def _dcgru_step(x, h, supports, w, K, pad):
    """Fully batched DCGRU cell: x (B*N, x_dim), h (B*N, U) -> new h (B*N, U).

    One gate == one (B*N, num_m*D_pad) @ (num_m*D_pad, U) matmul.
    """
    # TODO(synk): DCGRUCell source not included in the reference file; this is
    # the canonical DCRNN dual_random_walk cell the module names imply.
    rows = x.shape[0]
    zpad = [jnp.zeros((rows, pad), _F32)] if pad else []
    xh = jnp.concatenate([x, h] + zpad, axis=-1)
    t_xh = _cheb_concat(xh, supports, K)
    r = jax.nn.sigmoid(jnp.dot(t_xh, w["wr"], preferred_element_type=_F32)
                       + w["br"])
    u = jax.nn.sigmoid(jnp.dot(t_xh, w["wu"], preferred_element_type=_F32)
                       + w["bu"])
    xrh = jnp.concatenate([x, r * h] + zpad, axis=-1)
    t_c = _cheb_concat(xrh, supports, K)
    c = jnp.tanh(jnp.dot(t_c, w["wc"], preferred_element_type=_F32) + w["bc"])
    return u * h + (1.0 - u) * c


# ----------------------------------------------------------------------------
# The single fused kernel: adjacency chain + encoder + decoder.
# ----------------------------------------------------------------------------
def _gts_kernel(
        x_ref, pre_ref, cur_ref,
        wq_ref, wk_ref, wv_ref, wo_ref, bo_ref,
        fcw_ref, fcb_ref, bng_ref, bnb_ref, fow_ref, fob_ref,
        fcatw_ref, fcatb_ref,
        e_wr_ref, e_wu_ref, e_wc_ref, e_br_ref, e_bu_ref, e_bc_ref,
        d0_wr_ref, d0_wu_ref, d0_wc_ref, d0_br_ref, d0_bu_ref, d0_bc_ref,
        d1_wr_ref, d1_wu_ref, d1_wc_ref, d1_br_ref, d1_bu_ref, d1_bc_ref,
        pw_ref, pb_ref, rsel_ref, csel_ref,
        out_ref, adj_ref,
        *, B, N, U, K, out_dim, seq_len, horizon,
        enc_pad, dec0_pad, dec1_pad, bf, inv_sqrt_dk):
    nt = (((1,), (1,)), ((), ()))   # contract last dims: "A @ B.T"

    # ---- 1. loop-invariant chain: Evo attention -> fc/bn/fc_out/fc_cat ------
    pre = pre_ref[...]
    cur = cur_ref[...]
    # TODO(synk): EvoLSTMCell source not provided; approximated as a single
    # attention block over (pre_feat, cur_feat) producing node embeddings.
    q = jnp.dot(pre, wq_ref[...], preferred_element_type=_F32)
    k = jnp.dot(cur, wk_ref[...], preferred_element_type=_F32)
    v = jnp.dot(cur, wv_ref[...], preferred_element_type=_F32)
    scores = lax.dot_general(q, k, nt, preferred_element_type=_F32) * inv_sqrt_dk
    scores = scores - jnp.max(scores, axis=-1, keepdims=True)
    e = jnp.exp(scores)
    attn = e * pl.reciprocal(jnp.sum(e, axis=-1, keepdims=True), approx=True)
    ctx = jnp.dot(attn, v, preferred_element_type=_F32)
    node_emb = jnp.tanh(jnp.dot(ctx, wo_ref[...], preferred_element_type=_F32)
                        + bo_ref[...])

    # fc -> relu -> batchnorm -> relu(fc_out) -> fc_cat
    # TODO(synk): BatchNorm1d modeled with per-call batch statistics (training
    # mode); running statistics are not modeled.
    z = jnp.maximum(jnp.dot(node_emb, fcw_ref[...], preferred_element_type=_F32)
                    + fcb_ref[...], 0.0)
    mean = jnp.mean(z, axis=0, keepdims=True)
    var = jnp.mean((z - mean) ** 2, axis=0, keepdims=True)
    z = (z - mean) * lax.rsqrt(var + 1e-5) * bng_ref[...] + bnb_ref[...]
    z = jnp.maximum(jnp.dot(z, fow_ref[...], preferred_element_type=_F32)
                    + fob_ref[...], 0.0)
    z = jnp.dot(z, fcatw_ref[...], preferred_element_type=_F32) + fcatb_ref[...]

    # rank-1 adjacency: adj = z[:, 0] outer z[:, 1]
    a0 = z[:, 0:1]
    a1 = z[:, 1:2]
    adj = lax.dot_general(a0, a1, nt, preferred_element_type=_F32)    # (N, N)
    adjT = lax.dot_general(a1, a0, nt, preferred_element_type=_F32)   # adj.T
    adj_ref[...] = adj

    # dual random-walk supports (pre-transposed for left multiplication)
    rowsum = jnp.sum(adjT, axis=0, keepdims=True)   # (1, N): row sums of adj
    colsum = jnp.sum(adj, axis=0, keepdims=True)    # (1, N): col sums of adj
    safe_r = jnp.where(rowsum != 0.0, rowsum, 1.0)
    safe_c = jnp.where(colsum != 0.0, colsum, 1.0)
    inv_r = jnp.where(rowsum != 0.0, pl.reciprocal(safe_r, approx=True), 0.0)
    inv_c = jnp.where(colsum != 0.0, pl.reciprocal(safe_c, approx=True), 0.0)
    s1 = adjT * inv_r
    s2 = adj * inv_c

    # Block-diagonal (batch-stacked) supports -> batched diffusion in 1 matmul.
    supports = (_block_diag(s1, B), _block_diag(s2, B))

    w_enc = dict(wr=e_wr_ref[...], wu=e_wu_ref[...], wc=e_wc_ref[...],
                 br=e_br_ref[...], bu=e_bu_ref[...], bc=e_bc_ref[...])
    w_d0 = dict(wr=d0_wr_ref[...], wu=d0_wu_ref[...], wc=d0_wc_ref[...],
                br=d0_br_ref[...], bu=d0_bu_ref[...], bc=d0_bc_ref[...])
    w_d1 = dict(wr=d1_wr_ref[...], wu=d1_wu_ref[...], wc=d1_wc_ref[...],
                br=d1_br_ref[...], bu=d1_bu_ref[...], bc=d1_bc_ref[...])

    # ---- 2. encoder: recurrence over seq_len, state kept in registers -------
    # Step 0 uses the model's initial zero adjacency -> zero supports.
    h = jnp.zeros((B * N, U), _F32)
    h = _dcgru_step(x_ref[0], h, None, w_enc, K, enc_pad)
    for t in range(1, seq_len):                       # fully unrolled in-kernel
        h = _dcgru_step(x_ref[t], h, supports, w_enc, K, enc_pad)

    # ---- decoder layer-1 initial hidden: exact row-major reshape of ---------
    # node_embeddings (N, dim_fc) -> (B*N, U), done with constant selector
    # matmuls (no in-kernel reshape/relayout).
    h1 = jnp.zeros((B * N, U), _F32)
    for i in range(bf):
        g = jnp.dot(rsel_ref[i], node_emb, preferred_element_type=_F32)
        h1 = h1 + jnp.dot(g, csel_ref[i], preferred_element_type=_F32)

    # ---- 3. decoder: 2 DCGRU layers + projection, autoregressive ------------
    pw = pw_ref[...]
    pb = pb_ref[...]
    h0 = h
    din = jnp.zeros((B * N, out_dim), _F32)           # GO symbol
    for t in range(horizon):                          # fully unrolled in-kernel
        h0 = _dcgru_step(din, h0, supports, w_d0, K, dec0_pad)
        h1 = _dcgru_step(h0, h1, supports, w_d1, K, dec1_pad)
        proj = jnp.dot(h1, pw, preferred_element_type=_F32) + pb
        out_ref[t] = proj
        din = proj


# ----------------------------------------------------------------------------
# GTSModel_v3 forward (one pallas_call)
# ----------------------------------------------------------------------------
def gts_forward(inputs, sdist, params, cfg):
    N, B, U = cfg["num_nodes"], cfg["batch_size"], cfg["rnn_units"]
    in_dim, out_dim = cfg["input_dim"], cfg["output_dim"]
    K, horizon = cfg["max_diffusion_step"], cfg["horizon"]
    seq_len = inputs.shape[0]
    forward_index = 0        # self.forward_index == 0 for the whole forward

    # Metadata reshapes only (flat-order preserving).
    x_seq = inputs.reshape(seq_len, B * N, in_dim)
    pre_feat = sdist[:, forward_index - 1, :]   # index -1 wraps, as in torch
    cur_feat = sdist[:, forward_index, :]

    ev = params["evo0"]
    node_dim = ev["Wq"].shape[1]
    dim_fc = ev["Wo"].shape[1]
    bf = dim_fc // U

    enc_pad = _padded_cat_dim(in_dim, U) - (in_dim + U)
    dec0_pad = _padded_cat_dim(out_dim, U) - (out_dim + U)
    dec1_pad = _padded_cat_dim(U, U) - 2 * U

    args = [x_seq, pre_feat, cur_feat,
            ev["Wq"], ev["Wk"], ev["Wv"], ev["Wo"], ev["bo"],
            params["fc_w"], params["fc_b"], params["bn_g"], params["bn_b"],
            params["fc_out_w"], params["fc_out_b"],
            params["fc_cat_w"], params["fc_cat_b"]]
    for name in ("enc_dcgru0", "dec_dcgru0", "dec_dcgru1"):
        g = params[name]
        args += [g["wr"], g["wu"], g["wc"], g["br"], g["bu"], g["bc"]]
    args += [params["proj_w"], params["proj_b"], params["rsel"], params["csel"]]

    out_shape = (jax.ShapeDtypeStruct((horizon, B * N, out_dim), _F32),
                 jax.ShapeDtypeStruct((N, N), _F32))

    kern = functools.partial(
        _gts_kernel, B=B, N=N, U=U, K=K, out_dim=out_dim,
        seq_len=seq_len, horizon=horizon,
        enc_pad=enc_pad, dec0_pad=dec0_pad, dec1_pad=dec1_pad, bf=bf,
        inv_sqrt_dk=1.0 / float(node_dim) ** 0.5)

    out_raw, adj = pl.pallas_call(
        kern,
        grid=(1,),
        in_specs=[_const_spec(a.shape) for a in args],
        out_specs=tuple(_const_spec(s.shape) for s in out_shape),
        out_shape=out_shape,
        compiler_params=pltpu.CompilerParams(dimension_semantics=("arbitrary",)),
    )(*args)

    outputs = out_raw.reshape(horizon, B, N * out_dim)
    return outputs, adj


# ----------------------------------------------------------------------------
# Deterministic parameter init (pre-concatenated DCGRU gate weights).
# ----------------------------------------------------------------------------
def _dcgru_params(key, x_dim, U, K):
    num_m = 2 * K + 1
    d_pad = _padded_cat_dim(x_dim, U)
    ks = jax.random.split(key, 3)
    s = 0.1
    # Rows corresponding to the zero-padded input columns multiply zeros and
    # never contribute; weights are stored already concatenated per gate.
    return {
        "wr": s * jax.random.normal(ks[0], (num_m * d_pad, U), _F32),
        "wu": s * jax.random.normal(ks[1], (num_m * d_pad, U), _F32),
        "wc": s * jax.random.normal(ks[2], (num_m * d_pad, U), _F32),
        "br": jnp.full((1, U), 1.0, _F32),          # bias_start = 1.0
        "bu": jnp.full((1, U), 1.0, _F32),          # bias_start = 1.0
        "bc": jnp.zeros((1, U), _F32),
    }


def _evo_params(key, F, node_dim, dim_fc):
    k = jax.random.split(key, 4)
    return {
        "Wq": 0.1 * jax.random.normal(k[0], (F, node_dim), _F32),
        "Wk": 0.1 * jax.random.normal(k[1], (F, node_dim), _F32),
        "Wv": 0.1 * jax.random.normal(k[2], (F, node_dim), _F32),
        "Wo": 0.1 * jax.random.normal(k[3], (node_dim, dim_fc), _F32),
        "bo": jnp.zeros((1, dim_fc), _F32),
    }


def _reshape_selectors(N, B, U, dim_fc):
    """Constant matrices implementing reshape(node_emb, (B*N, U)) as matmuls."""
    bf = dim_fc // U
    assert bf * U == dim_fc and bf == B, \
        "torch reshape of node_embeddings requires dim_fc == batch_size * rnn_units"
    rsel = np.zeros((bf, B * N, N), np.float32)
    csel = np.zeros((bf, dim_fc, U), np.float32)
    for i in range(bf):
        for r in range(B * N):
            if r % bf == i:
                rsel[i, r, r // bf] = 1.0
        csel[i, i * U:(i + 1) * U, :] = np.eye(U, dtype=np.float32)
    return jnp.asarray(rsel), jnp.asarray(csel)


def init_params(key, cfg, para):
    U, K = cfg["rnn_units"], cfg["max_diffusion_step"]
    N, B = cfg["num_nodes"], cfg["batch_size"]
    E, dim_fc = para["embedding_dim"], para["dim_fc"]
    ks = jax.random.split(key, 8)
    p = {}
    p["enc_dcgru0"] = _dcgru_params(ks[0], cfg["input_dim"], U, K)
    p["evo0"] = _evo_params(ks[1], para["n_shapelets"], para["node_dim"], dim_fc)
    p["fc_w"] = 0.1 * jax.random.normal(ks[2], (dim_fc, E), _F32)
    p["fc_b"] = jnp.zeros((1, E), _F32)
    p["bn_g"] = jnp.ones((1, E), _F32)
    p["bn_b"] = jnp.zeros((1, E), _F32)
    p["fc_out_w"] = 0.1 * jax.random.normal(ks[3], (E, E), _F32)
    p["fc_out_b"] = jnp.zeros((1, E), _F32)
    p["fc_cat_w"] = 0.1 * jax.random.normal(ks[4], (E, 2), _F32)
    p["fc_cat_b"] = jnp.zeros((1, 2), _F32)
    p["dec_dcgru0"] = _dcgru_params(ks[5], cfg["output_dim"], U, K)
    p["dec_dcgru1"] = _dcgru_params(ks[6], U, U, K)
    p["proj_w"] = 0.1 * jax.random.normal(ks[7], (U, cfg["output_dim"]), _F32)
    p["proj_b"] = jnp.zeros((1, cfg["output_dim"]), _F32)
    p["rsel"], p["csel"] = _reshape_selectors(N, B, U, dim_fc)
    return p


# ----------------------------------------------------------------------------
if __name__ == "__main__":
    cfg = dict(num_nodes=16, rnn_units=8, num_rnn_layers=2, batch_size=2,
               max_diffusion_step=2, output_dim=1, horizon=1, input_dim=2,
               filter_type="dual_random_walk")
    # dim_fc = batch_size * rnn_units so node_embeddings reshape to
    # (-1, batch_size, hidden_state_size) works exactly as in the torch code.
    para = dict(Evo_layers=1, node_dim=8, n_shapelets=8, embedding_dim=32,
                dim_fc=cfg["batch_size"] * cfg["rnn_units"])
    seq_len, n_segments = 4, 3

    key = jax.random.PRNGKey(0)
    k_in, k_sd, k_p = jax.random.split(key, 3)
    inputs = jax.random.normal(
        k_in, (seq_len, cfg["batch_size"], cfg["num_nodes"] * cfg["input_dim"]),
        _F32)
    sdist = jax.random.normal(
        k_sd, (cfg["num_nodes"], n_segments, para["n_shapelets"]), _F32)
    params = init_params(k_p, cfg, para)

    fwd = jax.jit(functools.partial(gts_forward, cfg=cfg))
    outputs, adj = fwd(inputs, sdist, params)
    jax.block_until_ready((outputs, adj))

    assert outputs.shape == (cfg["horizon"], cfg["batch_size"],
                             cfg["num_nodes"] * cfg["output_dim"])
    assert adj.shape == (cfg["num_nodes"], cfg["num_nodes"])
    print("KERNEL_OK")
</pallas_src>

<mosaic_0001>
module attributes {stable_mosaic.version = 11 : i64} {
  func.func @_gts_kernel(%arg0: i32, %arg1: memref<4x32x2xf32, #tpu.memory_space<vmem>>, %arg2: memref<16x8xf32, #tpu.memory_space<vmem>>, %arg3: memref<16x8xf32, #tpu.memory_space<vmem>>, %arg4: memref<8x8xf32, #tpu.memory_space<vmem>>, %arg5: memref<8x8xf32, #tpu.memory_space<vmem>>, %arg6: memref<8x8xf32, #tpu.memory_space<vmem>>, %arg7: memref<8x16xf32, #tpu.memory_space<vmem>>, %arg8: memref<1x16xf32, #tpu.memory_space<vmem>>, %arg9: memref<16x32xf32, #tpu.memory_space<vmem>>, %arg10: memref<1x32xf32, #tpu.memory_space<vmem>>, %arg11: memref<1x32xf32, #tpu.memory_space<vmem>>, %arg12: memref<1x32xf32, #tpu.memory_space<vmem>>, %arg13: memref<32x32xf32, #tpu.memory_space<vmem>>, %arg14: memref<1x32xf32, #tpu.memory_space<vmem>>, %arg15: memref<32x2xf32, #tpu.memory_space<vmem>>, %arg16: memref<1x2xf32, #tpu.memory_space<vmem>>, %arg17: memref<80x8xf32, #tpu.memory_space<vmem>>, %arg18: memref<80x8xf32, #tpu.memory_space<vmem>>, %arg19: memref<80x8xf32, #tpu.memory_space<vmem>>, %arg20: memref<1x8xf32, #tpu.memory_space<vmem>>, %arg21: memref<1x8xf32, #tpu.memory_space<vmem>>, %arg22: memref<1x8xf32, #tpu.memory_space<vmem>>, %arg23: memref<80x8xf32, #tpu.memory_space<vmem>>, %arg24: memref<80x8xf32, #tpu.memory_space<vmem>>, %arg25: memref<80x8xf32, #tpu.memory_space<vmem>>, %arg26: memref<1x8xf32, #tpu.memory_space<vmem>>, %arg27: memref<1x8xf32, #tpu.memory_space<vmem>>, %arg28: memref<1x8xf32, #tpu.memory_space<vmem>>, %arg29: memref<80x8xf32, #tpu.memory_space<vmem>>, %arg30: memref<80x8xf32, #tpu.memory_space<vmem>>, %arg31: memref<80x8xf32, #tpu.memory_space<vmem>>, %arg32: memref<1x8xf32, #tpu.memory_space<vmem>>, %arg33: memref<1x8xf32, #tpu.memory_space<vmem>>, %arg34: memref<1x8xf32, #tpu.memory_space<vmem>>, %arg35: memref<8x1xf32, #tpu.memory_space<vmem>>, %arg36: memref<1x1xf32, #tpu.memory_space<vmem>>, %arg37: memref<2x32x16xf32, #tpu.memory_space<vmem>>, %arg38: memref<2x16x8xf32, #tpu.memory_space<vmem>>, %arg39: memref<1x32x1xf32, #tpu.memory_space<vmem>>, %arg40: memref<16x16xf32, #tpu.memory_space<vmem>>) attributes {dimension_semantics = [#tpu.dimension_semantics<arbitrary>], iteration_bounds = array<i64: 1>, scalar_prefetch = 0 : i64, scratch_operands = 0 : i64, tpu.core_type = #tpu.core_type<tc>, window_params = [{pipeline_mode = #tpu.pipeline_mode<synchronous>, transform_indices = @transform_0, window_bounds = array<i64: 4, 32, 2>}, {pipeline_mode = #tpu.pipeline_mode<synchronous>, transform_indices = @transform_1, window_bounds = array<i64: 16, 8>}, {pipeline_mode = #tpu.pipeline_mode<synchronous>, transform_indices = @transform_2, window_bounds = array<i64: 16, 8>}, {pipeline_mode = #tpu.pipeline_mode<synchronous>, transform_indices = @transform_3, window_bounds = array<i64: 8, 8>}, {pipeline_mode = #tpu.pipeline_mode<synchronous>, transform_indices = @transform_4, window_bounds = array<i64: 8, 8>}, {pipeline_mode = #tpu.pipeline_mode<synchronous>, transform_indices = @transform_5, window_bounds = array<i64: 8, 8>}, {pipeline_mode = #tpu.pipeline_mode<synchronous>, transform_indices = @transform_6, window_bounds = array<i64: 8, 16>}, {pipeline_mode = #tpu.pipeline_mode<synchronous>, transform_indices = @transform_7, window_bounds = array<i64: 1, 16>}, {pipeline_mode = #tpu.pipeline_mode<synchronous>, transform_indices = @transform_8, window_bounds = array<i64: 16, 32>}, {pipeline_mode = #tpu.pipeline_mode<synchronous>, transform_indices = @transform_9, window_bounds = array<i64: 1, 32>}, {pipeline_mode = #tpu.pipeline_mode<synchronous>, transform_indices = @transform_10, window_bounds = array<i64: 1, 32>}, {pipeline_mode = #tpu.pipeline_mode<synchronous>, transform_indices = @transform_11, window_bounds = array<i64: 1, 32>}, {pipeline_mode = #tpu.pipeline_mode<synchronous>, transform_indices = @transform_12, window_bounds = array<i64: 32, 32>}, {pipeline_mode = #tpu.pipeline_mode<synchronous>, transform_indices = @transform_13, window_bounds = array<i64: 1, 32>}, {pipeline_mode = #tpu.pipeline_mode<synchronous>, transform_indices = @transform_14, window_bounds = array<i64: 32, 2>}, {pipeline_mode = #tpu.pipeline_mode<synchronous>, transform_indices = @transform_15, window_bounds = array<i64: 1, 2>}, {pipeline_mode = #tpu.pipeline_mode<synchronous>, transform_indices = @transform_16, window_bounds = array<i64: 80, 8>}, {pipeline_mode = #tpu.pipeline_mode<synchronous>, transform_indices = @transform_17, window_bounds = array<i64: 80, 8>}, {pipeline_mode = #tpu.pipeline_mode<synchronous>, transform_indices = @transform_18, window_bounds = array<i64: 80, 8>}, {pipeline_mode = #tpu.pipeline_mode<synchronous>, transform_indices = @transform_19, window_bounds = array<i64: 1, 8>}, {pipeline_mode = #tpu.pipeline_mode<synchronous>, transform_indices = @transform_20, window_bounds = array<i64: 1, 8>}, {pipeline_mode = #tpu.pipeline_mode<synchronous>, transform_indices = @transform_21, window_bounds = array<i64: 1, 8>}, {pipeline_mode = #tpu.pipeline_mode<synchronous>, transform_indices = @transform_22, window_bounds = array<i64: 80, 8>}, {pipeline_mode = #tpu.pipeline_mode<synchronous>, transform_indices = @transform_23, window_bounds = array<i64: 80, 8>}, {pipeline_mode = #tpu.pipeline_mode<synchronous>, transform_indices = @transform_24, window_bounds = array<i64: 80, 8>}, {pipeline_mode = #tpu.pipeline_mode<synchronous>, transform_indices = @transform_25, window_bounds = array<i64: 1, 8>}, {pipeline_mode = #tpu.pipeline_mode<synchronous>, transform_indices = @transform_26, window_bounds = array<i64: 1, 8>}, {pipeline_mode = #tpu.pipeline_mode<synchronous>, transform_indices = @transform_27, window_bounds = array<i64: 1, 8>}, {pipeline_mode = #tpu.pipeline_mode<synchronous>, transform_indices = @transform_28, window_bounds = array<i64: 80, 8>}, {pipeline_mode = #tpu.pipeline_mode<synchronous>, transform_indices = @transform_29, window_bounds = array<i64: 80, 8>}, {pipeline_mode = #tpu.pipeline_mode<synchronous>, transform_indices = @transform_30, window_bounds = array<i64: 80, 8>}, {pipeline_mode = #tpu.pipeline_mode<synchronous>, transform_indices = @transform_31, window_bounds = array<i64: 1, 8>}, {pipeline_mode = #tpu.pipeline_mode<synchronous>, transform_indices = @transform_32, window_bounds = array<i64: 1, 8>}, {pipeline_mode = #tpu.pipeline_mode<synchronous>, transform_indices = @transform_33, window_bounds = array<i64: 1, 8>}, {pipeline_mode = #tpu.pipeline_mode<synchronous>, transform_indices = @transform_34, window_bounds = array<i64: 8, 1>}, {pipeline_mode = #tpu.pipeline_mode<synchronous>, transform_indices = @transform_35, window_bounds = array<i64: 1, 1>}, {pipeline_mode = #tpu.pipeline_mode<synchronous>, transform_indices = @transform_36, window_bounds = array<i64: 2, 32, 16>}, {pipeline_mode = #tpu.pipeline_mode<synchronous>, transform_indices = @transform_37, window_bounds = array<i64: 2, 16, 8>}, {pipeline_mode = #tpu.pipeline_mode<synchronous>, transform_indices = @transform_38, window_bounds = array<i64: 1, 32, 1>}, {pipeline_mode = #tpu.pipeline_mode<synchronous>, transform_indices = @transform_39, window_bounds = array<i64: 16, 16>}]} {
    %c0 = arith.constant 0 : index
    %c0_0 = arith.constant 0 : index
    %0 = vector.load %arg2[%c0, %c0_0] : memref<16x8xf32, #tpu.memory_space<vmem>>, vector<16x8xf32>
    %c0_1 = arith.constant 0 : index
    %c0_2 = arith.constant 0 : index
    %1 = vector.load %arg3[%c0_1, %c0_2] : memref<16x8xf32, #tpu.memory_space<vmem>>, vector<16x8xf32>
    %c0_3 = arith.constant 0 : index
    %c0_4 = arith.constant 0 : index
    %2 = vector.load %arg4[%c0_3, %c0_4] : memref<8x8xf32, #tpu.memory_space<vmem>>, vector<8x8xf32>
    %cst = arith.constant dense<0.000000e+00> : vector<16x8xf32>
    %3 = tpu.matmul %0, %2, %cst {dimension_numbers = #tpu.dot_dimension_numbers<[1], [0], [0], [1], [0, 0, 1, 1], [], []>} : vector<16x8xf32>, vector<8x8xf32>, vector<16x8xf32> -> vector<16x8xf32>
    %c0_5 = arith.constant 0 : index
    %c0_6 = arith.constant 0 : index
    %4 = vector.load %arg5[%c0_5, %c0_6] : memref<8x8xf32, #tpu.memory_space<vmem>>, vector<8x8xf32>
    %cst_7 = arith.constant dense<0.000000e+00> : vector<16x8xf32>
    %5 = tpu.matmul %1, %4, %cst_7 {dimension_numbers = #tpu.dot_dimension_numbers<[1], [0], [0], [1], [0, 0, 1, 1], [], []>} : vector<16x8xf32>, vector<8x8xf32>, vector<16x8xf32> -> vector<16x8xf32>
    %c0_8 = arith.constant 0 : index
    %c0_9 = arith.constant 0 : index
    %6 = vector.load %arg6[%c0_8, %c0_9] : memref<8x8xf32, #tpu.memory_space<vmem>>, vector<8x8xf32>
    %cst_10 = arith.constant dense<0.000000e+00> : vector<16x8xf32>
    %7 = tpu.matmul %1, %6, %cst_10 {dimension_numbers = #tpu.dot_dimension_numbers<[1], [0], [0], [1], [0, 0, 1, 1], [], []>} : vector<16x8xf32>, vector<8x8xf32>, vector<16x8xf32> -> vector<16x8xf32>
    %cst_11 = arith.constant dense<0.000000e+00> : vector<16x16xf32>
    %8 = tpu.matmul %3, %5, %cst_11 {dimension_numbers = #tpu.dot_dimension_numbers<[1], [1], [0], [0], [0, 0, 1, 0], [], []>} : vector<16x8xf32>, vector<16x8xf32>, vector<16x16xf32> -> vector<16x16xf32>
    %cst_12 = arith.constant 0.353553385 : f32
    %9 = vector.broadcast %cst_12 : f32 to vector<16x16xf32>
    %10 = arith.mulf %8, %9 : vector<16x16xf32>
    %cst_13 = arith.constant dense<0xFF800000> : vector<16xf32>
    %11 = vector.multi_reduction <maximumf>, %10, %cst_13 [1] : vector<16x16xf32> to vector<16xf32>
    %12 = vector.shape_cast %11 : vector<16xf32> to vector<16x1xf32>
    %13 = vector.broadcast %12 : vector<16x1xf32> to vector<16x16xf32>
    %14 = arith.subf %10, %13 : vector<16x16xf32>
    %15 = math.exp %14 : vector<16x16xf32>
    %cst_14 = arith.constant dense<0.000000e+00> : vector<16xf32>
    %16 = vector.multi_reduction <add>, %15, %cst_14 [1] : vector<16x16xf32> to vector<16xf32>
    %17 = vector.shape_cast %16 : vector<16xf32> to vector<16x1xf32>
    %18 = tpu.reciprocal %17 {approx = true} : vector<16x1xf32> -> vector<16x1xf32>
    %19 = vector.broadcast %18 : vector<16x1xf32> to vector<16x16xf32>
    %20 = arith.mulf %15, %19 : vector<16x16xf32>
    %cst_15 = arith.constant dense<0.000000e+00> : vector<16x8xf32>
    %21 = tpu.matmul %20, %7, %cst_15 {dimension_numbers = #tpu.dot_dimension_numbers<[1], [0], [0], [1], [0, 0, 1, 1], [], []>} : vector<16x16xf32>, vector<16x8xf32>, vector<16x8xf32> -> vector<16x8xf32>
    %c0_16 = arith.constant 0 : index
    %c0_17 = arith.constant 0 : index
    %22 = vector.load %arg7[%c0_16, %c0_17] : memref<8x16xf32, #tpu.memory_space<vmem>>, vector<8x16xf32>
    %cst_18 = arith.constant dense<0.000000e+00> : vector<16x16xf32>
    %23 = tpu.matmul %21, %22, %cst_18 {dimension_numbers = #tpu.dot_dimension_numbers<[1], [0], [0], [1], [0, 0, 1, 1], [], []>} : vector<16x8xf32>, vector<8x16xf32>, vector<16x16xf32> -> vector<16x16xf32>
    %c0_19 = arith.constant 0 : index
    %c0_20 = arith.constant 0 : index
    %24 = vector.load %arg8[%c0_19, %c0_20] : memref<1x16xf32, #tpu.memory_space<vmem>>, vector<1x16xf32>
    %25 = vector.broadcast %24 : vector<1x16xf32> to vector<16x16xf32>
    %26 = arith.addf %23, %25 : vector<16x16xf32>
    %27 = math.tanh %26 : vector<16x16xf32>
    %c0_21 = arith.constant 0 : index
    %c0_22 = arith.constant 0 : index
    %28 = vector.load %arg9[%c0_21, %c0_22] : memref<16x32xf32, #tpu.memory_space<vmem>>, vector<16x32xf32>
    %cst_23 = arith.constant dense<0.000000e+00> : vector<16x32xf32>
    %29 = tpu.matmul %27, %28, %cst_23 {dimension_numbers = #tpu.dot_dimension_numbers<[1], [0], [0], [1], [0, 0, 1, 1], [], []>} : vector<16x16xf32>, vector<16x32xf32>, vector<16x32xf32> -> vector<16x32xf32>
    %c0_24 = arith.constant 0 : index
    %c0_25 = arith.constant 0 : index
    %30 = vector.load %arg10[%c0_24, %c0_25] : memref<1x32xf32, #tpu.memory_space<vmem>>, vector<1x32xf32>
    %31 = vector.broadcast %30 : vector<1x32xf32> to vector<16x32xf32>
    %32 = arith.addf %29, %31 : vector<16x32xf32>
    %cst_26 = arith.constant 0.000000e+00 : f32
    %33 = vector.broadcast %cst_26 : f32 to vector<16x32xf32>
    %34 = arith.maximumf %32, %33 : vector<16x32xf32>
    %cst_27 = arith.constant dense<0.000000e+00> : vector<32xf32>
    %35 = vector.multi_reduction <add>, %34, %cst_27 [0] : vector<16x32xf32> to vector<32xf32>
    %36 = vector.shape_cast %35 : vector<32xf32> to vector<1x32xf32>
    %cst_28 = arith.constant 1.600000e+01 : f32
    %37 = vector.broadcast %cst_28 : f32 to vector<1x32xf32>
    %38 = arith.divf %36, %37 : vector<1x32xf32>
    %39 = vector.broadcast %38 : vector<1x32xf32> to vector<16x32xf32>
    %40 = arith.subf %34, %39 : vector<16x32xf32>
    %41 = arith.mulf %40, %40 : vector<16x32xf32>
    %cst_29 = arith.constant dense<0.000000e+00> : vector<32xf32>
    %42 = vector.multi_reduction <add>, %41, %cst_29 [0] : vector<16x32xf32> to vector<32xf32>
    %43 = vector.shape_cast %42 : vector<32xf32> to vector<1x32xf32>
    %cst_30 = arith.constant 1.600000e+01 : f32
    %44 = vector.broadcast %cst_30 : f32 to vector<1x32xf32>
    %45 = arith.divf %43, %44 : vector<1x32xf32>
    %46 = vector.broadcast %38 : vector<1x32xf32> to vector<16x32xf32>
    %47 = arith.subf %34, %46 : vector<16x32xf32>
    %cst_31 = arith.constant 9.99999974E-6 : f32
    %48 = vector.broadcast %cst_31 : f32 to vector<1x32xf32>
    %49 = arith.addf %45, %48 : vector<1x32xf32>
    %50 = math.rsqrt %49 : vector<1x32xf32>
    %51 = vector.broadcast %50 : vector<1x32xf32> to vector<16x32xf32>
    %52 = arith.mulf %47, %51 : vector<16x32xf32>
    %c0_32 = arith.constant 0 : index
    %c0_33 = arith.constant 0 : index
    %53 = vector.load %arg11[%c0_32, %c0_33] : memref<1x32xf32, #tpu.memory_space<vmem>>, vector<1x32xf32>
    %54 = vector.broadcast %53 : vector<1x32xf32> to vector<16x32xf32>
    %55 = arith.mulf %52, %54 : vector<16x32xf32>
    %c0_34 = arith.constant 0 : index
    %c0_35 = arith.constant 0 : index
    %56 = vector.load %arg12[%c0_34, %c0_35] : memref<1x32xf32, #tpu.memory_space<vmem>>, vector<1x32xf32>
    %57 = vector.broadcast %56 : vector<1x32xf32> to vector<16x32xf32>
    %58 = arith.addf %55, %57 : vector<16x32xf32>
    %c0_36 = arith.constant 0 : index
    %c0_37 = arith.constant 0 : index
    %59 = vector.load %arg13[%c0_36, %c0_37] : memref<32x32xf32, #tpu.memory_space<vmem>>, vector<32x32xf32>
    %cst_38 = arith.constant dense<0.000000e+00> : vector<16x32xf32>
    %60 = tpu.matmul %58, %59, %cst_38 {dimension_numbers = #tpu.dot_dimension_numbers<[1], [0], [0], [1], [0, 0, 1, 1], [], []>} : vector<16x32xf32>, vector<32x32xf32>, vector<16x32xf32> -> vector<16x32xf32>
    %c0_39 = arith.constant 0 : index
    %c0_40 = arith.constant 0 : index
    %61 = vector.load %arg14[%c0_39, %c0_40] : memref<1x32xf32, #tpu.memory_space<vmem>>, vector<1x32xf32>
    %62 = vector.broadcast %61 : vector<1x32xf32> to vector<16x32xf32>
    %63 = arith.addf %60, %62 : vector<16x32xf32>
    %cst_41 = arith.constant 0.000000e+00 : f32
    %64 = vector.broadcast %cst_41 : f32 to vector<16x32xf32>
    %65 = arith.maximumf %63, %64 : vector<16x32xf32>
    %c0_42 = arith.constant 0 : index
    %c0_43 = arith.constant 0 : index
    %66 = vector.load %arg15[%c0_42, %c0_43] : memref<32x2xf32, #tpu.memory_space<vmem>>, vector<32x2xf32>
    %cst_44 = arith.constant dense<0.000000e+00> : vector<16x2xf32>
    %67 = tpu.matmul %65, %66, %cst_44 {dimension_numbers = #tpu.dot_dimension_numbers<[1], [0], [0], [1], [0, 0, 1, 1], [], []>} : vector<16x32xf32>, vector<32x2xf32>, vector<16x2xf32> -> vector<16x2xf32>
    %c0_45 = arith.constant 0 : index
    %c0_46 = arith.constant 0 : index
    %68 = vector.load %arg16[%c0_45, %c0_46] : memref<1x2xf32, #tpu.memory_space<vmem>>, vector<1x2xf32>
    %69 = vector.broadcast %68 : vector<1x2xf32> to vector<16x2xf32>
    %70 = arith.addf %67, %69 : vector<16x2xf32>
    %71 = vector.extract_strided_slice %70 {offsets = [0, 0], sizes = [16, 1], strides = [1, 1]} : vector<16x2xf32> to vector<16x1xf32>
    %72 = vector.extract_strided_slice %70 {offsets = [0, 1], sizes = [16, 1], strides = [1, 1]} : vector<16x2xf32> to vector<16x1xf32>
    %cst_47 = arith.constant dense<0.000000e+00> : vector<16x16xf32>
    %73 = tpu.matmul %71, %72, %cst_47 {dimension_numbers = #tpu.dot_dimension_numbers<[1], [1], [0], [0], [0, 0, 1, 0], [], []>} : vector<16x1xf32>, vector<16x1xf32>, vector<16x16xf32> -> vector<16x16xf32>
    %cst_48 = arith.constant dense<0.000000e+00> : vector<16x16xf32>
    %74 = tpu.matmul %72, %71, %cst_48 {dimension_numbers = #tpu.dot_dimension_numbers<[1], [1], [0], [0], [0, 0, 1, 0], [], []>} : vector<16x1xf32>, vector<16x1xf32>, vector<16x16xf32> -> vector<16x16xf32>
    %c0_49 = arith.constant 0 : index
    %c0_50 = arith.constant 0 : index
    %75 = vector.load %arg40[%c0_49, %c0_50] : memref<16x16xf32, #tpu.memory_space<vmem>>, vector<16x16xf32>
    tpu.vector_store %arg40[%c0_49, %c0_50], %73 {strides = array<i32>} : memref<16x16xf32, #tpu.memory_space<vmem>>, vector<16x16xf32>,
    %cst_51 = arith.constant dense<0.000000e+00> : vector<16xf32>
    %76 = vector.multi_reduction <add>, %74, %cst_51 [0] : vector<16x16xf32> to vector<16xf32>
    %77 = vector.shape_cast %76 : vector<16xf32> to vector<1x16xf32>
    %cst_52 = arith.constant dense<0.000000e+00> : vector<16xf32>
    %78 = vector.multi_reduction <add>, %73, %cst_52 [0] : vector<16x16xf32> to vector<16xf32>
    %79 = vector.shape_cast %78 : vector<16xf32> to vector<1x16xf32>
    %cst_53 = arith.constant 0.000000e+00 : f32
    %80 = vector.broadcast %cst_53 : f32 to vector<1x16xf32>
    %81 = arith.cmpf one, %77, %80 : vector<1x16xf32>
    %cst_54 = arith.constant 1.000000e+00 : f32
    %82 = vector.broadcast %cst_54 : f32 to vector<1x16xf32>
    %83 = arith.select %81, %77, %82 : vector<1x16xi1>, vector<1x16xf32>
    %cst_55 = arith.constant 0.000000e+00 : f32
    %84 = vector.broadcast %cst_55 : f32 to vector<1x16xf32>
    %85 = arith.cmpf one, %79, %84 : vector<1x16xf32>
    %cst_56 = arith.constant 1.000000e+00 : f32
    %86 = vector.broadcast %cst_56 : f32 to vector<1x16xf32>
    %87 = arith.select %85, %79, %86 : vector<1x16xi1>, vector<1x16xf32>
    %cst_57 = arith.constant 0.000000e+00 : f32
    %88 = vector.broadcast %cst_57 : f32 to vector<1x16xf32>
    %89 = arith.cmpf one, %77, %88 : vector<1x16xf32>
    %90 = tpu.reciprocal %83 {approx = true} : vector<1x16xf32> -> vector<1x16xf32>
    %cst_58 = arith.constant 0.000000e+00 : f32
    %91 = vector.broadcast %cst_58 : f32 to vector<1x16xf32>
    %92 = arith.select %89, %90, %91 : vector<1x16xi1>, vector<1x16xf32>
    %cst_59 = arith.constant 0.000000e+00 : f32
    %93 = vector.broadcast %cst_59 : f32 to vector<1x16xf32>
    %94 = arith.cmpf one, %79, %93 : vector<1x16xf32>
    %95 = tpu.reciprocal %87 {approx = true} : vector<1x16xf32> -> vector<1x16xf32>
    %cst_60 = arith.constant 0.000000e+00 : f32
    %96 = vector.broadcast %cst_60 : f32 to vector<1x16xf32>
    %97 = arith.select %94, %95, %96 : vector<1x16xi1>, vector<1x16xf32>
    %98 = vector.broadcast %92 : vector<1x16xf32> to vector<16x16xf32>
    %99 = arith.mulf %74, %98 : vector<16x16xf32>
    %100 = vector.broadcast %97 : vector<1x16xf32> to vector<16x16xf32>
    %101 = arith.mulf %73, %100 : vector<16x16xf32>
    %cst_61 = arith.constant 0.000000e+00 : f32
    %102 = vector.broadcast %cst_61 : f32 to vector<16x16xf32>
    %103 = tpu.concatenate %99, %102 in 1 : vector<16x16xf32>, vector<16x16xf32> -> vector<16x32xf32>
    %104 = tpu.concatenate %102, %99 in 1 : vector<16x16xf32>, vector<16x16xf32> -> vector<16x32xf32>
    %105 = tpu.concatenate %103, %104 in 0 : vector<16x32xf32>, vector<16x32xf32> -> vector<32x32xf32>
    %cst_62 = arith.constant 0.000000e+00 : f32
    %106 = vector.broadcast %cst_62 : f32 to vector<16x16xf32>
    %107 = tpu.concatenate %101, %106 in 1 : vector<16x16xf32>, vector<16x16xf32> -> vector<16x32xf32>
    %108 = tpu.concatenate %106, %101 in 1 : vector<16x16xf32>, vector<16x16xf32> -> vector<16x32xf32>
    %109 = tpu.concatenate %107, %108 in 0 : vector<16x32xf32>, vector<16x32xf32> -> vector<32x32xf32>
    %c0_63 = arith.constant 0 : index
    %c0_64 = arith.constant 0 : index
    %110 = vector.load %arg17[%c0_63, %c0_64] : memref<80x8xf32, #tpu.memory_space<vmem>>, vector<80x8xf32>
    %c0_65 = arith.constant 0 : index
    %c0_66 = arith.constant 0 : index
    %111 = vector.load %arg18[%c0_65, %c0_66] : memref<80x8xf32, #tpu.memory_space<vmem>>, vector<80x8xf32>
    %c0_67 = arith.constant 0 : index
    %c0_68 = arith.constant 0 : index
    %112 = vector.load %arg19[%c0_67, %c0_68] : memref<80x8xf32, #tpu.memory_space<vmem>>, vector<80x8xf32>
    %c0_69 = arith.constant 0 : index
    %c0_70 = arith.constant 0 : index
    %113 = vector.load %arg20[%c0_69, %c0_70] : memref<1x8xf32, #tpu.memory_space<vmem>>, vector<1x8xf32>
    %c0_71 = arith.constant 0 : index
    %c0_72 = arith.constant 0 : index
    %114 = vector.load %arg21[%c0_71, %c0_72] : memref<1x8xf32, #tpu.memory_space<vmem>>, vector<1x8xf32>
    %c0_73 = arith.constant 0 : index
    %c0_74 = arith.constant 0 : index
    %115 = vector.load %arg22[%c0_73, %c0_74] : memref<1x8xf32, #tpu.memory_space<vmem>>, vector<1x8xf32>
    %c0_75 = arith.constant 0 : index
    %c0_76 = arith.constant 0 : index
    %116 = vector.load %arg23[%c0_75, %c0_76] : memref<80x8xf32, #tpu.memory_space<vmem>>, vector<80x8xf32>
    %c0_77 = arith.constant 0 : index
    %c0_78 = arith.constant 0 : index
    %117 = vector.load %arg24[%c0_77, %c0_78] : memref<80x8xf32, #tpu.memory_space<vmem>>, vector<80x8xf32>
    %c0_79 = arith.constant 0 : index
    %c0_80 = arith.constant 0 : index
    %118 = vector.load %arg25[%c0_79, %c0_80] : memref<80x8xf32, #tpu.memory_space<vmem>>, vector<80x8xf32>
    %c0_81 = arith.constant 0 : index
    %c0_82 = arith.constant 0 : index
    %119 = vector.load %arg26[%c0_81, %c0_82] : memref<1x8xf32, #tpu.memory_space<vmem>>, vector<1x8xf32>
    %c0_83 = arith.constant 0 : index
    %c0_84 = arith.constant 0 : index
    %120 = vector.load %arg27[%c0_83, %c0_84] : memref<1x8xf32, #tpu.memory_space<vmem>>, vector<1x8xf32>
    %c0_85 = arith.constant 0 : index
    %c0_86 = arith.constant 0 : index
    %121 = vector.load %arg28[%c0_85, %c0_86] : memref<1x8xf32, #tpu.memory_space<vmem>>, vector<1x8xf32>
    %c0_87 = arith.constant 0 : index
    %c0_88 = arith.constant 0 : index
    %122 = vector.load %arg29[%c0_87, %c0_88] : memref<80x8xf32, #tpu.memory_space<vmem>>, vector<80x8xf32>
    %c0_89 = arith.constant 0 : index
    %c0_90 = arith.constant 0 : index
    %123 = vector.load %arg30[%c0_89, %c0_90] : memref<80x8xf32, #tpu.memory_space<vmem>>, vector<80x8xf32>
    %c0_91 = arith.constant 0 : index
    %c0_92 = arith.constant 0 : index
    %124 = vector.load %arg31[%c0_91, %c0_92] : memref<80x8xf32, #tpu.memory_space<vmem>>, vector<80x8xf32>
    %c0_93 = arith.constant 0 : index
    %c0_94 = arith.constant 0 : index
    %125 = vector.load %arg32[%c0_93, %c0_94] : memref<1x8xf32, #tpu.memory_space<vmem>>, vector<1x8xf32>
    %c0_95 = arith.constant 0 : index
    %c0_96 = arith.constant 0 : index
    %126 = vector.load %arg33[%c0_95, %c0_96] : memref<1x8xf32, #tpu.memory_space<vmem>>, vector<1x8xf32>
    %c0_97 = arith.constant 0 : index
    %c0_98 = arith.constant 0 : index
    %127 = vector.load %arg34[%c0_97, %c0_98] : memref<1x8xf32, #tpu.memory_space<vmem>>, vector<1x8xf32>
    %cst_99 = arith.constant 0.000000e+00 : f32
    %128 = vector.broadcast %cst_99 : f32 to vector<32x8xf32>
    %c0_100 = arith.constant 0 : index
    %c0_101 = arith.constant 0 : index
    %c0_102 = arith.constant 0 : index
    %129 = vector.load %arg1[%c0_100, %c0_101, %c0_102] : memref<4x32x2xf32, #tpu.memory_space<vmem>>, vector<1x32x2xf32>
    %130 = vector.shape_cast %129 : vector<1x32x2xf32> to vector<32x2xf32>
    %cst_103 = arith.constant 0.000000e+00 : f32
    %131 = vector.broadcast %cst_103 : f32 to vector<32x6xf32>
    %132 = tpu.concatenate %130, %128, %131 in 1 : vector<32x2xf32>, vector<32x8xf32>, vector<32x6xf32> -> vector<32x16xf32>
    %cst_104 = arith.constant 0.000000e+00 : f32
    %133 = vector.broadcast %cst_104 : f32 to vector<32x16xf32>
    %cst_105 = arith.constant 0.000000e+00 : f32
    %134 = vector.broadcast %cst_105 : f32 to vector<32x16xf32>
    %135 = arith.subf %134, %132 : vector<32x16xf32>
    %cst_106 = arith.constant 0.000000e+00 : f32
    %136 = vector.broadcast %cst_106 : f32 to vector<32x16xf32>
    %137 = arith.subf %136, %132 : vector<32x16xf32>
    %138 = tpu.concatenate %132, %133, %135, %133, %137 in 1 : vector<32x16xf32>, vector<32x16xf32>, vector<32x16xf32>, vector<32x16xf32>, vector<32x16xf32> -> vector<32x80xf32>
    %cst_107 = arith.constant dense<0.000000e+00> : vector<32x8xf32>
    %139 = tpu.matmul %138, %110, %cst_107 {dimension_numbers = #tpu.dot_dimension_numbers<[1], [0], [0], [1], [0, 0, 1, 1], [], []>} : vector<32x80xf32>, vector<80x8xf32>, vector<32x8xf32> -> vector<32x8xf32>
    %140 = vector.broadcast %113 : vector<1x8xf32> to vector<32x8xf32>
    %141 = arith.addf %139, %140 : vector<32x8xf32>
    %142 = arith.negf %141 : vector<32x8xf32>
    %143 = math.exp %142 : vector<32x8xf32>
    %cst_108 = arith.constant 1.000000e+00 : f32
    %144 = vector.broadcast %cst_108 : f32 to vector<32x8xf32>
    %145 = arith.addf %144, %143 : vector<32x8xf32>
    %146 = arith.divf %144, %145 : vector<32x8xf32>
    %cst_109 = arith.constant dense<0.000000e+00> : vector<32x8xf32>
    %147 = tpu.matmul %138, %111, %cst_109 {dimension_numbers = #tpu.dot_dimension_numbers<[1], [0], [0], [1], [0, 0, 1, 1], [], []>} : vector<32x80xf32>, vector<80x8xf32>, vector<32x8xf32> -> vector<32x8xf32>
    %148 = vector.broadcast %114 : vector<1x8xf32> to vector<32x8xf32>
    %149 = arith.addf %147, %148 : vector<32x8xf32>
    %150 = arith.negf %149 : vector<32x8xf32>
    %151 = math.exp %150 : vector<32x8xf32>
    %cst_110 = arith.constant 1.000000e+00 : f32
    %152 = vector.broadcast %cst_110 : f32 to vector<32x8xf32>
    %153 = arith.addf %152, %151 : vector<32x8xf32>
    %154 = arith.divf %152, %153 : vector<32x8xf32>
    %155 = arith.mulf %146, %128 : vector<32x8xf32>
    %156 = tpu.concatenate %130, %155, %131 in 1 : vector<32x2xf32>, vector<32x8xf32>, vector<32x6xf32> -> vector<32x16xf32>
    %cst_111 = arith.constant 0.000000e+00 : f32
    %157 = vector.broadcast %cst_111 : f32 to vector<32x16xf32>
    %cst_112 = arith.constant 0.000000e+00 : f32
    %158 = vector.broadcast %cst_112 : f32 to vector<32x16xf32>
    %159 = arith.subf %158, %156 : vector<32x16xf32>
    %cst_113 = arith.constant 0.000000e+00 : f32
    %160 = vector.broadcast %cst_113 : f32 to vector<32x16xf32>
    %161 = arith.subf %160, %156 : vector<32x16xf32>
    %162 = tpu.concatenate %156, %157, %159, %157, %161 in 1 : vector<32x16xf32>, vector<32x16xf32>, vector<32x16xf32>, vector<32x16xf32>, vector<32x16xf32> -> vector<32x80xf32>
    %cst_114 = arith.constant dense<0.000000e+00> : vector<32x8xf32>
    %163 = tpu.matmul %162, %112, %cst_114 {dimension_numbers = #tpu.dot_dimension_numbers<[1], [0], [0], [1], [0, 0, 1, 1], [], []>} : vector<32x80xf32>, vector<80x8xf32>, vector<32x8xf32> -> vector<32x8xf32>
    %164 = vector.broadcast %115 : vector<1x8xf32> to vector<32x8xf32>
    %165 = arith.addf %163, %164 : vector<32x8xf32>
    %166 = math.tanh %165 : vector<32x8xf32>
    %167 = arith.mulf %154, %128 : vector<32x8xf32>
    %cst_115 = arith.constant 1.000000e+00 : f32
    %168 = vector.broadcast %cst_115 : f32 to vector<32x8xf32>
    %169 = arith.subf %168, %154 : vector<32x8xf32>
    %170 = arith.mulf %169, %166 : vector<32x8xf32>
    %171 = arith.addf %167, %170 : vector<32x8xf32>
    %c1 = arith.constant 1 : index
    %c0_116 = arith.constant 0 : index
    %c0_117 = arith.constant 0 : index
    %172 = vector.load %arg1[%c1, %c0_116, %c0_117] : memref<4x32x2xf32, #tpu.memory_space<vmem>>, vector<1x32x2xf32>
    %173 = vector.shape_cast %172 : vector<1x32x2xf32> to vector<32x2xf32>
    %cst_118 = arith.constant 0.000000e+00 : f32
    %174 = vector.broadcast %cst_118 : f32 to vector<32x6xf32>
    %175 = tpu.concatenate %173, %171, %174 in 1 : vector<32x2xf32>, vector<32x8xf32>, vector<32x6xf32> -> vector<32x16xf32>
    %cst_119 = arith.constant dense<0.000000e+00> : vector<32x16xf32>
    %176 = tpu.matmul %105, %175, %cst_119 {dimension_numbers = #tpu.dot_dimension_numbers<[1], [0], [0], [1], [0, 0, 1, 1], [], []>} : vector<32x32xf32>, vector<32x16xf32>, vector<32x16xf32> -> vector<32x16xf32>
    %cst_120 = arith.constant dense<0.000000e+00> : vector<32x16xf32>
    %177 = tpu.matmul %105, %176, %cst_120 {dimension_numbers = #tpu.dot_dimension_numbers<[1], [0], [0], [1], [0, 0, 1, 1], [], []>} : vector<32x32xf32>, vector<32x16xf32>, vector<32x16xf32> -> vector<32x16xf32>
    %cst_121 = arith.constant 2.000000e+00 : f32
    %178 = vector.broadcast %cst_121 : f32 to vector<32x16xf32>
    %179 = arith.mulf %178, %177 : vector<32x16xf32>
    %180 = arith.subf %179, %175 : vector<32x16xf32>
    %cst_122 = arith.constant dense<0.000000e+00> : vector<32x16xf32>
    %181 = tpu.matmul %109, %175, %cst_122 {dimension_numbers = #tpu.dot_dimension_numbers<[1], [0], [0], [1], [0, 0, 1, 1], [], []>} : vector<32x32xf32>, vector<32x16xf32>, vector<32x16xf32> -> vector<32x16xf32>
    %cst_123 = arith.constant dense<0.000000e+00> : vector<32x16xf32>
    %182 = tpu.matmul %109, %181, %cst_123 {dimension_numbers = #tpu.dot_dimension_numbers<[1], [0], [0], [1], [0, 0, 1, 1], [], []>} : vector<32x32xf32>, vector<32x16xf32>, vector<32x16xf32> -> vector<32x16xf32>
    %cst_124 = arith.constant 2.000000e+00 : f32
    %183 = vector.broadcast %cst_124 : f32 to vector<32x16xf32>
    %184 = arith.mulf %183, %182 : vector<32x16xf32>
    %185 = arith.subf %184, %175 : vector<32x16xf32>
    %186 = tpu.concatenate %175, %176, %180, %181, %185 in 1 : vector<32x16xf32>, vector<32x16xf32>, vector<32x16xf32>, vector<32x16xf32>, vector<32x16xf32> -> vector<32x80xf32>
    %cst_125 = arith.constant dense<0.000000e+00> : vector<32x8xf32>
    %187 = tpu.matmul %186, %110, %cst_125 {dimension_numbers = #tpu.dot_dimension_numbers<[1], [0], [0], [1], [0, 0, 1, 1], [], []>} : vector<32x80xf32>, vector<80x8xf32>, vector<32x8xf32> -> vector<32x8xf32>
    %188 = vector.broadcast %113 : vector<1x8xf32> to vector<32x8xf32>
    %189 = arith.addf %187, %188 : vector<32x8xf32>
    %190 = arith.negf %189 : vector<32x8xf32>
    %191 = math.exp %190 : vector<32x8xf32>
    %cst_126 = arith.constant 1.000000e+00 : f32
    %192 = vector.broadcast %cst_126 : f32 to vector<32x8xf32>
    %193 = arith.addf %192, %191 : vector<32x8xf32>
    %194 = arith.divf %192, %193 : vector<32x8xf32>
    %cst_127 = arith.constant dense<0.000000e+00> : vector<32x8xf32>
    %195 = tpu.matmul %186, %111, %cst_127 {dimension_numbers = #tpu.dot_dimension_numbers<[1], [0], [0], [1], [0, 0, 1, 1], [], []>} : vector<32x80xf32>, vector<80x8xf32>, vector<32x8xf32> -> vector<32x8xf32>
    %196 = vector.broadcast %114 : vector<1x8xf32> to vector<32x8xf32>
    %197 = arith.addf %195, %196 : vector<32x8xf32>
    %198 = arith.negf %197 : vector<32x8xf32>
    %199 = math.exp %198 : vector<32x8xf32>
    %cst_128 = arith.constant 1.000000e+00 : f32
    %200 = vector.broadcast %cst_128 : f32 to vector<32x8xf32>
    %201 = arith.addf %200, %199 : vector<32x8xf32>
    %202 = arith.divf %200, %201 : vector<32x8xf32>
    %203 = arith.mulf %194, %171 : vector<32x8xf32>
    %204 = tpu.concatenate %173, %203, %174 in 1 : vector<32x2xf32>, vector<32x8xf32>, vector<32x6xf32> -> vector<32x16xf32>
    %cst_129 = arith.constant dense<0.000000e+00> : vector<32x16xf32>
    %205 = tpu.matmul %105, %204, %cst_129 {dimension_numbers = #tpu.dot_dimension_numbers<[1], [0], [0], [1], [0, 0, 1, 1], [], []>} : vector<32x32xf32>, vector<32x16xf32>, vector<32x16xf32> -> vector<32x16xf32>
    %cst_130 = arith.constant dense<0.000000e+00> : vector<32x16xf32>
    %206 = tpu.matmul %105, %205, %cst_130 {dimension_numbers = #tpu.dot_dimension_numbers<[1], [0], [0], [1], [0, 0, 1, 1], [], []>} : vector<32x32xf32>, vector<32x16xf32>, vector<32x16xf32> -> vector<32x16xf32>
    %cst_131 = arith.constant 2.000000e+00 : f32
    %207 = vector.broadcast %cst_131 : f32 to vector<32x16xf32>
    %208 = arith.mulf %207, %206 : vector<32x16xf32>
    %209 = arith.subf %208, %204 : vector<32x16xf32>
    %cst_132 = arith.constant dense<0.000000e+00> : vector<32x16xf32>
    %210 = tpu.matmul %109, %204, %cst_132 {dimension_numbers = #tpu.dot_dimension_numbers<[1], [0], [0], [1], [0, 0, 1, 1], [], []>} : vector<32x32xf32>, vector<32x16xf32>, vector<32x16xf32> -> vector<32x16xf32>
    %cst_133 = arith.constant dense<0.000000e+00> : vector<32x16xf32>
    %211 = tpu.matmul %109, %210, %cst_133 {dimension_numbers = #tpu.dot_dimension_numbers<[1], [0], [0], [1], [0, 0, 1, 1], [], []>} : vector<32x32xf32>, vector<32x16xf32>, vector<32x16xf32> -> vector<32x16xf32>
    %cst_134 = arith.constant 2.000000e+00 : f32
    %212 = vector.broadcast %cst_134 : f32 to vector<32x16xf32>
    %213 = arith.mulf %212, %211 : vector<32x16xf32>
    %214 = arith.subf %213, %204 : vector<32x16xf32>
    %215 = tpu.concatenate %204, %205, %209, %210, %214 in 1 : vector<32x16xf32>, vector<32x16xf32>, vector<32x16xf32>, vector<32x16xf32>, vector<32x16xf32> -> vector<32x80xf32>
    %cst_135 = arith.constant dense<0.000000e+00> : vector<32x8xf32>
    %216 = tpu.matmul %215, %112, %cst_135 {dimension_numbers = #tpu.dot_dimension_numbers<[1], [0], [0], [1], [0, 0, 1, 1], [], []>} : vector<32x80xf32>, vector<80x8xf32>, vector<32x8xf32> -> vector<32x8xf32>
    %217 = vector.broadcast %115 : vector<1x8xf32> to vector<32x8xf32>
    %218 = arith.addf %216, %217 : vector<32x8xf32>
    %219 = math.tanh %218 : vector<32x8xf32>
    %220 = arith.mulf %202, %171 : vector<32x8xf32>
    %cst_136 = arith.constant 1.000000e+00 : f32
    %221 = vector.broadcast %cst_136 : f32 to vector<32x8xf32>
    %222 = arith.subf %221, %202 : vector<32x8xf32>
    %223 = arith.mulf %222, %219 : vector<32x8xf32>
    %224 = arith.addf %220, %223 : vector<32x8xf32>
    %c2 = arith.constant 2 : index
    %c0_137 = arith.constant 0 : index
    %c0_138 = arith.constant 0 : index
    %225 = vector.load %arg1[%c2, %c0_137, %c0_138] : memref<4x32x2xf32, #tpu.memory_space<vmem>>, vector<1x32x2xf32>
    %226 = vector.shape_cast %225 : vector<1x32x2xf32> to vector<32x2xf32>
    %cst_139 = arith.constant 0.000000e+00 : f32
    %227 = vector.broadcast %cst_139 : f32 to vector<32x6xf32>
    %228 = tpu.concatenate %226, %224, %227 in 1 : vector<32x2xf32>, vector<32x8xf32>, vector<32x6xf32> -> vector<32x16xf32>
    %cst_140 = arith.constant dense<0.000000e+00> : vector<32x16xf32>
    %229 = tpu.matmul %105, %228, %cst_140 {dimension_numbers = #tpu.dot_dimension_numbers<[1], [0], [0], [1], [0, 0, 1, 1], [], []>} : vector<32x32xf32>, vector<32x16xf32>, vector<32x16xf32> -> vector<32x16xf32>
    %cst_141 = arith.constant dense<0.000000e+00> : vector<32x16xf32>
    %230 = tpu.matmul %105, %229, %cst_141 {dimension_numbers = #tpu.dot_dimension_numbers<[1], [0], [0], [1], [0, 0, 1, 1], [], []>} : vector<32x32xf32>, vector<32x16xf32>, vector<32x16xf32> -> vector<32x16xf32>
    %cst_142 = arith.constant 2.000000e+00 : f32
    %231 = vector.broadcast %cst_142 : f32 to vector<32x16xf32>
    %232 = arith.mulf %231, %230 : vector<32x16xf32>
    %233 = arith.subf %232, %228 : vector<32x16xf32>
    %cst_143 = arith.constant dense<0.000000e+00> : vector<32x16xf32>
    %234 = tpu.matmul %109, %228, %cst_143 {dimension_numbers = #tpu.dot_dimension_numbers<[1], [0], [0], [1], [0, 0, 1, 1], [], []>} : vector<32x32xf32>, vector<32x16xf32>, vector<32x16xf32> -> vector<32x16xf32>
    %cst_144 = arith.constant dense<0.000000e+00> : vector<32x16xf32>
    %235 = tpu.matmul %109, %234, %cst_144 {dimension_numbers = #tpu.dot_dimension_numbers<[1], [0], [0], [1], [0, 0, 1, 1], [], []>} : vector<32x32xf32>, vector<32x16xf32>, vector<32x16xf32> -> vector<32x16xf32>
    %cst_145 = arith.constant 2.000000e+00 : f32
    %236 = vector.broadcast %cst_145 : f32 to vector<32x16xf32>
    %237 = arith.mulf %236, %235 : vector<32x16xf32>
    %238 = arith.subf %237, %228 : vector<32x16xf32>
    %239 = tpu.concatenate %228, %229, %233, %234, %238 in 1 : vector<32x16xf32>, vector<32x16xf32>, vector<32x16xf32>, vector<32x16xf32>, vector<32x16xf32> -> vector<32x80xf32>
    %cst_146 = arith.constant dense<0.000000e+00> : vector<32x8xf32>
    %240 = tpu.matmul %239, %110, %cst_146 {dimension_numbers = #tpu.dot_dimension_numbers<[1], [0], [0], [1], [0, 0, 1, 1], [], []>} : vector<32x80xf32>, vector<80x8xf32>, vector<32x8xf32> -> vector<32x8xf32>
    %241 = vector.broadcast %113 : vector<1x8xf32> to vector<32x8xf32>
    %242 = arith.addf %240, %241 : vector<32x8xf32>
    %243 = arith.negf %242 : vector<32x8xf32>
    %244 = math.exp %243 : vector<32x8xf32>
    %cst_147 = arith.constant 1.000000e+00 : f32
    %245 = vector.broadcast %cst_147 : f32 to vector<32x8xf32>
    %246 = arith.addf %245, %244 : vector<32x8xf32>
    %247 = arith.divf %245, %246 : vector<32x8xf32>
    %cst_148 = arith.constant dense<0.000000e+00> : vector<32x8xf32>
    %248 = tpu.matmul %239, %111, %cst_148 {dimension_numbers = #tpu.dot_dimension_numbers<[1], [0], [0], [1], [0, 0, 1, 1], [], []>} : vector<32x80xf32>, vector<80x8xf32>, vector<32x8xf32> -> vector<32x8xf32>
    %249 = vector.broadcast %114 : vector<1x8xf32> to vector<32x8xf32>
    %250 = arith.addf %248, %249 : vector<32x8xf32>
    %251 = arith.negf %250 : vector<32x8xf32>
    %252 = math.exp %251 : vector<32x8xf32>
    %cst_149 = arith.constant 1.000000e+00 : f32
    %253 = vector.broadcast %cst_149 : f32 to vector<32x8xf32>
    %254 = arith.addf %253, %252 : vector<32x8xf32>
    %255 = arith.divf %253, %254 : vector<32x8xf32>
    %256 = arith.mulf %247, %224 : vector<32x8xf32>
    %257 = tpu.concatenate %226, %256, %227 in 1 : vector<32x2xf32>, vector<32x8xf32>, vector<32x6xf32> -> vector<32x16xf32>
    %cst_150 = arith.constant dense<0.000000e+00> : vector<32x16xf32>
    %258 = tpu.matmul %105, %257, %cst_150 {dimension_numbers = #tpu.dot_dimension_numbers<[1], [0], [0], [1], [0, 0, 1, 1], [], []>} : vector<32x32xf32>, vector<32x16xf32>, vector<32x16xf32> -> vector<32x16xf32>
    %cst_151 = arith.constant dense<0.000000e+00> : vector<32x16xf32>
    %259 = tpu.matmul %105, %258, %cst_151 {dimension_numbers = #tpu.dot_dimension_numbers<[1], [0], [0], [1], [0, 0, 1, 1], [], []>} : vector<32x32xf32>, vector<32x16xf32>, vector<32x16xf32> -> vector<32x16xf32>
    %cst_152 = arith.constant 2.000000e+00 : f32
    %260 = vector.broadcast %cst_152 : f32 to vector<32x16xf32>
    %261 = arith.mulf %260, %259 : vector<32x16xf32>
    %262 = arith.subf %261, %257 : vector<32x16xf32>
    %cst_153 = arith.constant dense<0.000000e+00> : vector<32x16xf32>
    %263 = tpu.matmul %109, %257, %cst_153 {dimension_numbers = #tpu.dot_dimension_numbers<[1], [0], [0], [1], [0, 0, 1, 1], [], []>} : vector<32x32xf32>, vector<32x16xf32>, vector<32x16xf32> -> vector<32x16xf32>
    %cst_154 = arith.constant dense<0.000000e+00> : vector<32x16xf32>
    %264 = tpu.matmul %109, %263, %cst_154 {dimension_numbers = #tpu.dot_dimension_numbers<[1], [0], [0], [1], [0, 0, 1, 1], [], []>} : vector<32x32xf32>, vector<32x16xf32>, vector<32x16xf32> -> vector<32x16xf32>
    %cst_155 = arith.constant 2.000000e+00 : f32
    %265 = vector.broadcast %cst_155 : f32 to vector<32x16xf32>
    %266 = arith.mulf %265, %264 : vector<32x16xf32>
    %267 = arith.subf %266, %257 : vector<32x16xf32>
    %268 = tpu.concatenate %257, %258, %262, %263, %267 in 1 : vector<32x16xf32>, vector<32x16xf32>, vector<32x16xf32>, vector<32x16xf32>, vector<32x16xf32> -> vector<32x80xf32>
    %cst_156 = arith.constant dense<0.000000e+00> : vector<32x8xf32>
    %269 = tpu.matmul %268, %112, %cst_156 {dimension_numbers = #tpu.dot_dimension_numbers<[1], [0], [0], [1], [0, 0, 1, 1], [], []>} : vector<32x80xf32>, vector<80x8xf32>, vector<32x8xf32> -> vector<32x8xf32>
    %270 = vector.broadcast %115 : vector<1x8xf32> to vector<32x8xf32>
    %271 = arith.addf %269, %270 : vector<32x8xf32>
    %272 = math.tanh %271 : vector<32x8xf32>
    %273 = arith.mulf %255, %224 : vector<32x8xf32>
    %cst_157 = arith.constant 1.000000e+00 : f32
    %274 = vector.broadcast %cst_157 : f32 to vector<32x8xf32>
    %275 = arith.subf %274, %255 : vector<32x8xf32>
    %276 = arith.mulf %275, %272 : vector<32x8xf32>
    %277 = arith.addf %273, %276 : vector<32x8xf32>
    %c3 = arith.constant 3 : index
    %c0_158 = arith.constant 0 : index
    %c0_159 = arith.constant 0 : index
    %278 = vector.load %arg1[%c3, %c0_158, %c0_159] : memref<4x32x2xf32, #tpu.memory_space<vmem>>, vector<1x32x2xf32>
    %279 = vector.shape_cast %278 : vector<1x32x2xf32> to vector<32x2xf32>
    %cst_160 = arith.constant 0.000000e+00 : f32
    %280 = vector.broadcast %cst_160 : f32 to vector<32x6xf32>
    %281 = tpu.concatenate %279, %277, %280 in 1 : vector<32x2xf32>, vector<32x8xf32>, vector<32x6xf32> -> vector<32x16xf32>
    %cst_161 = arith.constant dense<0.000000e+00> : vector<32x16xf32>
    %282 = tpu.matmul %105, %281, %cst_161 {dimension_numbers = #tpu.dot_dimension_numbers<[1], [0], [0], [1], [0, 0, 1, 1], [], []>} : vector<32x32xf32>, vector<32x16xf32>, vector<32x16xf32> -> vector<32x16xf32>
    %cst_162 = arith.constant dense<0.000000e+00> : vector<32x16xf32>
    %283 = tpu.matmul %105, %282, %cst_162 {dimension_numbers = #tpu.dot_dimension_numbers<[1], [0], [0], [1], [0, 0, 1, 1], [], []>} : vector<32x32xf32>, vector<32x16xf32>, vector<32x16xf32> -> vector<32x16xf32>
    %cst_163 = arith.constant 2.000000e+00 : f32
    %284 = vector.broadcast %cst_163 : f32 to vector<32x16xf32>
    %285 = arith.mulf %284, %283 : vector<32x16xf32>
    %286 = arith.subf %285, %281 : vector<32x16xf32>
    %cst_164 = arith.constant dense<0.000000e+00> : vector<32x16xf32>
    %287 = tpu.matmul %109, %281, %cst_164 {dimension_numbers = #tpu.dot_dimension_numbers<[1], [0], [0], [1], [0, 0, 1, 1], [], []>} : vector<32x32xf32>, vector<32x16xf32>, vector<32x16xf32> -> vector<32x16xf32>
    %cst_165 = arith.constant dense<0.000000e+00> : vector<32x16xf32>
    %288 = tpu.matmul %109, %287, %cst_165 {dimension_numbers = #tpu.dot_dimension_numbers<[1], [0], [0], [1], [0, 0, 1, 1], [], []>} : vector<32x32xf32>, vector<32x16xf32>, vector<32x16xf32> -> vector<32x16xf32>
    %cst_166 = arith.constant 2.000000e+00 : f32
    %289 = vector.broadcast %cst_166 : f32 to vector<32x16xf32>
    %290 = arith.mulf %289, %288 : vector<32x16xf32>
    %291 = arith.subf %290, %281 : vector<32x16xf32>
    %292 = tpu.concatenate %281, %282, %286, %287, %291 in 1 : vector<32x16xf32>, vector<32x16xf32>, vector<32x16xf32>, vector<32x16xf32>, vector<32x16xf32> -> vector<32x80xf32>
    %cst_167 = arith.constant dense<0.000000e+00> : vector<32x8xf32>
    %293 = tpu.matmul %292, %110, %cst_167 {dimension_numbers = #tpu.dot_dimension_numbers<[1], [0], [0], [1], [0, 0, 1, 1], [], []>} : vector<32x80xf32>, vector<80x8xf32>, vector<32x8xf32> -> vector<32x8xf32>
    %294 = vector.broadcast %113 : vector<1x8xf32> to vector<32x8xf32>
    %295 = arith.addf %293, %294 : vector<32x8xf32>
    %296 = arith.negf %295 : vector<32x8xf32>
    %297 = math.exp %296 : vector<32x8xf32>
    %cst_168 = arith.constant 1.000000e+00 : f32
    %298 = vector.broadcast %cst_168 : f32 to vector<32x8xf32>
    %299 = arith.addf %298, %297 : vector<32x8xf32>
    %300 = arith.divf %298, %299 : vector<32x8xf32>
    %cst_169 = arith.constant dense<0.000000e+00> : vector<32x8xf32>
    %301 = tpu.matmul %292, %111, %cst_169 {dimension_numbers = #tpu.dot_dimension_numbers<[1], [0], [0], [1], [0, 0, 1, 1], [], []>} : vector<32x80xf32>, vector<80x8xf32>, vector<32x8xf32> -> vector<32x8xf32>
    %302 = vector.broadcast %114 : vector<1x8xf32> to vector<32x8xf32>
    %303 = arith.addf %301, %302 : vector<32x8xf32>
    %304 = arith.negf %303 : vector<32x8xf32>
    %305 = math.exp %304 : vector<32x8xf32>
    %cst_170 = arith.constant 1.000000e+00 : f32
    %306 = vector.broadcast %cst_170 : f32 to vector<32x8xf32>
    %307 = arith.addf %306, %305 : vector<32x8xf32>
    %308 = arith.divf %306, %307 : vector<32x8xf32>
    %309 = arith.mulf %300, %277 : vector<32x8xf32>
    %310 = tpu.concatenate %279, %309, %280 in 1 : vector<32x2xf32>, vector<32x8xf32>, vector<32x6xf32> -> vector<32x16xf32>
    %cst_171 = arith.constant dense<0.000000e+00> : vector<32x16xf32>
    %311 = tpu.matmul %105, %310, %cst_171 {dimension_numbers = #tpu.dot_dimension_numbers<[1], [0], [0], [1], [0, 0, 1, 1], [], []>} : vector<32x32xf32>, vector<32x16xf32>, vector<32x16xf32> -> vector<32x16xf32>
    %cst_172 = arith.constant dense<0.000000e+00> : vector<32x16xf32>
    %312 = tpu.matmul %105, %311, %cst_172 {dimension_numbers = #tpu.dot_dimension_numbers<[1], [0], [0], [1], [0, 0, 1, 1], [], []>} : vector<32x32xf32>, vector<32x16xf32>, vector<32x16xf32> -> vector<32x16xf32>
    %cst_173 = arith.constant 2.000000e+00 : f32
    %313 = vector.broadcast %cst_173 : f32 to vector<32x16xf32>
    %314 = arith.mulf %313, %312 : vector<32x16xf32>
    %315 = arith.subf %314, %310 : vector<32x16xf32>
    %cst_174 = arith.constant dense<0.000000e+00> : vector<32x16xf32>
    %316 = tpu.matmul %109, %310, %cst_174 {dimension_numbers = #tpu.dot_dimension_numbers<[1], [0], [0], [1], [0, 0, 1, 1], [], []>} : vector<32x32xf32>, vector<32x16xf32>, vector<32x16xf32> -> vector<32x16xf32>
    %cst_175 = arith.constant dense<0.000000e+00> : vector<32x16xf32>
    %317 = tpu.matmul %109, %316, %cst_175 {dimension_numbers = #tpu.dot_dimension_numbers<[1], [0], [0], [1], [0, 0, 1, 1], [], []>} : vector<32x32xf32>, vector<32x16xf32>, vector<32x16xf32> -> vector<32x16xf32>
    %cst_176 = arith.constant 2.000000e+00 : f32
    %318 = vector.broadcast %cst_176 : f32 to vector<32x16xf32>
    %319 = arith.mulf %318, %317 : vector<32x16xf32>
    %320 = arith.subf %319, %310 : vector<32x16xf32>
    %321 = tpu.concatenate %310, %311, %315, %316, %320 in 1 : vector<32x16xf32>, vector<32x16xf32>, vector<32x16xf32>, vector<32x16xf32>, vector<32x16xf32> -> vector<32x80xf32>
    %cst_177 = arith.constant dense<0.000000e+00> : vector<32x8xf32>
    %322 = tpu.matmul %321, %112, %cst_177 {dimension_numbers = #tpu.dot_dimension_numbers<[1], [0], [0], [1], [0, 0, 1, 1], [], []>} : vector<32x80xf32>, vector<80x8xf32>, vector<32x8xf32> -> vector<32x8xf32>
    %323 = vector.broadcast %115 : vector<1x8xf32> to vector<32x8xf32>
    %324 = arith.addf %322, %323 : vector<32x8xf32>
    %325 = math.tanh %324 : vector<32x8xf32>
    %326 = arith.mulf %308, %277 : vector<32x8xf32>
    %cst_178 = arith.constant 1.000000e+00 : f32
    %327 = vector.broadcast %cst_178 : f32 to vector<32x8xf32>
    %328 = arith.subf %327, %308 : vector<32x8xf32>
    %329 = arith.mulf %328, %325 : vector<32x8xf32>
    %330 = arith.addf %326, %329 : vector<32x8xf32>
    %cst_179 = arith.constant 0.000000e+00 : f32
    %331 = vector.broadcast %cst_179 : f32 to vector<32x8xf32>
    %c0_180 = arith.constant 0 : index
    %c0_181 = arith.constant 0 : index
    %c0_182 = arith.constant 0 : index
    %332 = vector.load %arg37[%c0_180, %c0_181, %c0_182] : memref<2x32x16xf32, #tpu.memory_space<vmem>>, vector<1x32x16xf32>
    %333 = vector.shape_cast %332 : vector<1x32x16xf32> to vector<32x16xf32>
    %cst_183 = arith.constant dense<0.000000e+00> : vector<32x16xf32>
    %334 = tpu.matmul %333, %27, %cst_183 {dimension_numbers = #tpu.dot_dimension_numbers<[1], [0], [0], [1], [0, 0, 1, 1], [], []>} : vector<32x16xf32>, vector<16x16xf32>, vector<32x16xf32> -> vector<32x16xf32>
    %c0_184 = arith.constant 0 : index
    %c0_185 = arith.constant 0 : index
    %c0_186 = arith.constant 0 : index
    %335 = vector.load %arg38[%c0_184, %c0_185, %c0_186] : memref<2x16x8xf32, #tpu.memory_space<vmem>>, vector<1x16x8xf32>
    %336 = vector.shape_cast %335 : vector<1x16x8xf32> to vector<16x8xf32>
    %cst_187 = arith.constant dense<0.000000e+00> : vector<32x8xf32>
    %337 = tpu.matmul %334, %336, %cst_187 {dimension_numbers = #tpu.dot_dimension_numbers<[1], [0], [0], [1], [0, 0, 1, 1], [], []>} : vector<32x16xf32>, vector<16x8xf32>, vector<32x8xf32> -> vector<32x8xf32>
    %338 = arith.addf %331, %337 : vector<32x8xf32>
    %c1_188 = arith.constant 1 : index
    %c0_189 = arith.constant 0 : index
    %c0_190 = arith.constant 0 : index
    %339 = vector.load %arg37[%c1_188, %c0_189, %c0_190] : memref<2x32x16xf32, #tpu.memory_space<vmem>>, vector<1x32x16xf32>
    %340 = vector.shape_cast %339 : vector<1x32x16xf32> to vector<32x16xf32>
    %cst_191 = arith.constant dense<0.000000e+00> : vector<32x16xf32>
    %341 = tpu.matmul %340, %27, %cst_191 {dimension_numbers = #tpu.dot_dimension_numbers<[1], [0], [0], [1], [0, 0, 1, 1], [], []>} : vector<32x16xf32>, vector<16x16xf32>, vector<32x16xf32> -> vector<32x16xf32>
    %c1_192 = arith.constant 1 : index
    %c0_193 = arith.constant 0 : index
    %c0_194 = arith.constant 0 : index
    %342 = vector.load %arg38[%c1_192, %c0_193, %c0_194] : memref<2x16x8xf32, #tpu.memory_space<vmem>>, vector<1x16x8xf32>
    %343 = vector.shape_cast %342 : vector<1x16x8xf32> to vector<16x8xf32>
    %cst_195 = arith.constant dense<0.000000e+00> : vector<32x8xf32>
    %344 = tpu.matmul %341, %343, %cst_195 {dimension_numbers = #tpu.dot_dimension_numbers<[1], [0], [0], [1], [0, 0, 1, 1], [], []>} : vector<32x16xf32>, vector<16x8xf32>, vector<32x8xf32> -> vector<32x8xf32>
    %345 = arith.addf %338, %344 : vector<32x8xf32>
    %c0_196 = arith.constant 0 : index
    %c0_197 = arith.constant 0 : index
    %346 = vector.load %arg35[%c0_196, %c0_197] : memref<8x1xf32, #tpu.memory_space<vmem>>, vector<8x1xf32>
    %c0_198 = arith.constant 0 : index
    %c0_199 = arith.constant 0 : index
    %347 = vector.load %arg36[%c0_198, %c0_199] : memref<1x1xf32, #tpu.memory_space<vmem>>, vector<1x1xf32>
    %cst_200 = arith.constant 0.000000e+00 : f32
    %348 = vector.broadcast %cst_200 : f32 to vector<32x1xf32>
    %cst_201 = arith.constant 0.000000e+00 : f32
    %349 = vector.broadcast %cst_201 : f32 to vector<32x7xf32>
    %350 = tpu.concatenate %348, %330, %349 in 1 : vector<32x1xf32>, vector<32x8xf32>, vector<32x7xf32> -> vector<32x16xf32>
    %cst_202 = arith.constant dense<0.000000e+00> : vector<32x16xf32>
    %351 = tpu.matmul %105, %350, %cst_202 {dimension_numbers = #tpu.dot_dimension_numbers<[1], [0], [0], [1], [0, 0, 1, 1], [], []>} : vector<32x32xf32>, vector<32x16xf32>, vector<32x16xf32> -> vector<32x16xf32>
    %cst_203 = arith.constant dense<0.000000e+00> : vector<32x16xf32>
    %352 = tpu.matmul %105, %351, %cst_203 {dimension_numbers = #tpu.dot_dimension_numbers<[1], [0], [0], [1], [0, 0, 1, 1], [], []>} : vector<32x32xf32>, vector<32x16xf32>, vector<32x16xf32> -> vector<32x16xf32>
    %cst_204 = arith.constant 2.000000e+00 : f32
    %353 = vector.broadcast %cst_204 : f32 to vector<32x16xf32>
    %354 = arith.mulf %353, %352 : vector<32x16xf32>
    %355 = arith.subf %354, %350 : vector<32x16xf32>
    %cst_205 = arith.constant dense<0.000000e+00> : vector<32x16xf32>
    %356 = tpu.matmul %109, %350, %cst_205 {dimension_numbers = #tpu.dot_dimension_numbers<[1], [0], [0], [1], [0, 0, 1, 1], [], []>} : vector<32x32xf32>, vector<32x16xf32>, vector<32x16xf32> -> vector<32x16xf32>
    %cst_206 = arith.constant dense<0.000000e+00> : vector<32x16xf32>
    %357 = tpu.matmul %109, %356, %cst_206 {dimension_numbers = #tpu.dot_dimension_numbers<[1], [0], [0], [1], [0, 0, 1, 1], [], []>} : vector<32x32xf32>, vector<32x16xf32>, vector<32x16xf32> -> vector<32x16xf32>
    %cst_207 = arith.constant 2.000000e+00 : f32
    %358 = vector.broadcast %cst_207 : f32 to vector<32x16xf32>
    %359 = arith.mulf %358, %357 : vector<32x16xf32>
    %360 = arith.subf %359, %350 : vector<32x16xf32>
    %361 = tpu.concatenate %350, %351, %355, %356, %360 in 1 : vector<32x16xf32>, vector<32x16xf32>, vector<32x16xf32>, vector<32x16xf32>, vector<32x16xf32> -> vector<32x80xf32>
    %cst_208 = arith.constant dense<0.000000e+00> : vector<32x8xf32>
    %362 = tpu.matmul %361, %116, %cst_208 {dimension_numbers = #tpu.dot_dimension_numbers<[1], [0], [0], [1], [0, 0, 1, 1], [], []>} : vector<32x80xf32>, vector<80x8xf32>, vector<32x8xf32> -> vector<32x8xf32>
    %363 = vector.broadcast %119 : vector<1x8xf32> to vector<32x8xf32>
    %364 = arith.addf %362, %363 : vector<32x8xf32>
    %365 = arith.negf %364 : vector<32x8xf32>
    %366 = math.exp %365 : vector<32x8xf32>
    %cst_209 = arith.constant 1.000000e+00 : f32
    %367 = vector.broadcast %cst_209 : f32 to vector<32x8xf32>
    %368 = arith.addf %367, %366 : vector<32x8xf32>
    %369 = arith.divf %367, %368 : vector<32x8xf32>
    %cst_210 = arith.constant dense<0.000000e+00> : vector<32x8xf32>
    %370 = tpu.matmul %361, %117, %cst_210 {dimension_numbers = #tpu.dot_dimension_numbers<[1], [0], [0], [1], [0, 0, 1, 1], [], []>} : vector<32x80xf32>, vector<80x8xf32>, vector<32x8xf32> -> vector<32x8xf32>
    %371 = vector.broadcast %120 : vector<1x8xf32> to vector<32x8xf32>
    %372 = arith.addf %370, %371 : vector<32x8xf32>
    %373 = arith.negf %372 : vector<32x8xf32>
    %374 = math.exp %373 : vector<32x8xf32>
    %cst_211 = arith.constant 1.000000e+00 : f32
    %375 = vector.broadcast %cst_211 : f32 to vector<32x8xf32>
    %376 = arith.addf %375, %374 : vector<32x8xf32>
    %377 = arith.divf %375, %376 : vector<32x8xf32>
    %378 = arith.mulf %369, %330 : vector<32x8xf32>
    %379 = tpu.concatenate %348, %378, %349 in 1 : vector<32x1xf32>, vector<32x8xf32>, vector<32x7xf32> -> vector<32x16xf32>
    %cst_212 = arith.constant dense<0.000000e+00> : vector<32x16xf32>
    %380 = tpu.matmul %105, %379, %cst_212 {dimension_numbers = #tpu.dot_dimension_numbers<[1], [0], [0], [1], [0, 0, 1, 1], [], []>} : vector<32x32xf32>, vector<32x16xf32>, vector<32x16xf32> -> vector<32x16xf32>
    %cst_213 = arith.constant dense<0.000000e+00> : vector<32x16xf32>
    %381 = tpu.matmul %105, %380, %cst_213 {dimension_numbers = #tpu.dot_dimension_numbers<[1], [0], [0], [1], [0, 0, 1, 1], [], []>} : vector<32x32xf32>, vector<32x16xf32>, vector<32x16xf32> -> vector<32x16xf32>
    %cst_214 = arith.constant 2.000000e+00 : f32
    %382 = vector.broadcast %cst_214 : f32 to vector<32x16xf32>
    %383 = arith.mulf %382, %381 : vector<32x16xf32>
    %384 = arith.subf %383, %379 : vector<32x16xf32>
    %cst_215 = arith.constant dense<0.000000e+00> : vector<32x16xf32>
    %385 = tpu.matmul %109, %379, %cst_215 {dimension_numbers = #tpu.dot_dimension_numbers<[1], [0], [0], [1], [0, 0, 1, 1], [], []>} : vector<32x32xf32>, vector<32x16xf32>, vector<32x16xf32> -> vector<32x16xf32>
    %cst_216 = arith.constant dense<0.000000e+00> : vector<32x16xf32>
    %386 = tpu.matmul %109, %385, %cst_216 {dimension_numbers = #tpu.dot_dimension_numbers<[1], [0], [0], [1], [0, 0, 1, 1], [], []>} : vector<32x32xf32>, vector<32x16xf32>, vector<32x16xf32> -> vector<32x16xf32>
    %cst_217 = arith.constant 2.000000e+00 : f32
    %387 = vector.broadcast %cst_217 : f32 to vector<32x16xf32>
    %388 = arith.mulf %387, %386 : vector<32x16xf32>
    %389 = arith.subf %388, %379 : vector<32x16xf32>
    %390 = tpu.concatenate %379, %380, %384, %385, %389 in 1 : vector<32x16xf32>, vector<32x16xf32>, vector<32x16xf32>, vector<32x16xf32>, vector<32x16xf32> -> vector<32x80xf32>
    %cst_218 = arith.constant dense<0.000000e+00> : vector<32x8xf32>
    %391 = tpu.matmul %390, %118, %cst_218 {dimension_numbers = #tpu.dot_dimension_numbers<[1], [0], [0], [1], [0, 0, 1, 1], [], []>} : vector<32x80xf32>, vector<80x8xf32>, vector<32x8xf32> -> vector<32x8xf32>
    %392 = vector.broadcast %121 : vector<1x8xf32> to vector<32x8xf32>
    %393 = arith.addf %391, %392 : vector<32x8xf32>
    %394 = math.tanh %393 : vector<32x8xf32>
    %395 = arith.mulf %377, %330 : vector<32x8xf32>
    %cst_219 = arith.constant 1.000000e+00 : f32
    %396 = vector.broadcast %cst_219 : f32 to vector<32x8xf32>
    %397 = arith.subf %396, %377 : vector<32x8xf32>
    %398 = arith.mulf %397, %394 : vector<32x8xf32>
    %399 = arith.addf %395, %398 : vector<32x8xf32>
    %400 = tpu.concatenate %399, %345 in 1 : vector<32x8xf32>, vector<32x8xf32> -> vector<32x16xf32>
    %cst_220 = arith.constant dense<0.000000e+00> : vector<32x16xf32>
    %401 = tpu.matmul %105, %400, %cst_220 {dimension_numbers = #tpu.dot_dimension_numbers<[1], [0], [0], [1], [0, 0, 1, 1], [], []>} : vector<32x32xf32>, vector<32x16xf32>, vector<32x16xf32> -> vector<32x16xf32>
    %cst_221 = arith.constant dense<0.000000e+00> : vector<32x16xf32>
    %402 = tpu.matmul %105, %401, %cst_221 {dimension_numbers = #tpu.dot_dimension_numbers<[1], [0], [0], [1], [0, 0, 1, 1], [], []>} : vector<32x32xf32>, vector<32x16xf32>, vector<32x16xf32> -> vector<32x16xf32>
    %cst_222 = arith.constant 2.000000e+00 : f32
    %403 = vector.broadcast %cst_222 : f32 to vector<32x16xf32>
    %404 = arith.mulf %403, %402 : vector<32x16xf32>
    %405 = arith.subf %404, %400 : vector<32x16xf32>
    %cst_223 = arith.constant dense<0.000000e+00> : vector<32x16xf32>
    %406 = tpu.matmul %109, %400, %cst_223 {dimension_numbers = #tpu.dot_dimension_numbers<[1], [0], [0], [1], [0, 0, 1, 1], [], []>} : vector<32x32xf32>, vector<32x16xf32>, vector<32x16xf32> -> vector<32x16xf32>
    %cst_224 = arith.constant dense<0.000000e+00> : vector<32x16xf32>
    %407 = tpu.matmul %109, %406, %cst_224 {dimension_numbers = #tpu.dot_dimension_numbers<[1], [0], [0], [1], [0, 0, 1, 1], [], []>} : vector<32x32xf32>, vector<32x16xf32>, vector<32x16xf32> -> vector<32x16xf32>
    %cst_225 = arith.constant 2.000000e+00 : f32
    %408 = vector.broadcast %cst_225 : f32 to vector<32x16xf32>
    %409 = arith.mulf %408, %407 : vector<32x16xf32>
    %410 = arith.subf %409, %400 : vector<32x16xf32>
    %411 = tpu.concatenate %400, %401, %405, %406, %410 in 1 : vector<32x16xf32>, vector<32x16xf32>, vector<32x16xf32>, vector<32x16xf32>, vector<32x16xf32> -> vector<32x80xf32>
    %cst_226 = arith.constant dense<0.000000e+00> : vector<32x8xf32>
    %412 = tpu.matmul %411, %122, %cst_226 {dimension_numbers = #tpu.dot_dimension_numbers<[1], [0], [0], [1], [0, 0, 1, 1], [], []>} : vector<32x80xf32>, vector<80x8xf32>, vector<32x8xf32> -> vector<32x8xf32>
    %413 = vector.broadcast %125 : vector<1x8xf32> to vector<32x8xf32>
    %414 = arith.addf %412, %413 : vector<32x8xf32>
    %415 = arith.negf %414 : vector<32x8xf32>
    %416 = math.exp %415 : vector<32x8xf32>
    %cst_227 = arith.constant 1.000000e+00 : f32
    %417 = vector.broadcast %cst_227 : f32 to vector<32x8xf32>
    %418 = arith.addf %417, %416 : vector<32x8xf32>
    %419 = arith.divf %417, %418 : vector<32x8xf32>
    %cst_228 = arith.constant dense<0.000000e+00> : vector<32x8xf32>
    %420 = tpu.matmul %411, %123, %cst_228 {dimension_numbers = #tpu.dot_dimension_numbers<[1], [0], [0], [1], [0, 0, 1, 1], [], []>} : vector<32x80xf32>, vector<80x8xf32>, vector<32x8xf32> -> vector<32x8xf32>
    %421 = vector.broadcast %126 : vector<1x8xf32> to vector<32x8xf32>
    %422 = arith.addf %420, %421 : vector<32x8xf32>
    %423 = arith.negf %422 : vector<32x8xf32>
    %424 = math.exp %423 : vector<32x8xf32>
    %cst_229 = arith.constant 1.000000e+00 : f32
    %425 = vector.broadcast %cst_229 : f32 to vector<32x8xf32>
    %426 = arith.addf %425, %424 : vector<32x8xf32>
    %427 = arith.divf %425, %426 : vector<32x8xf32>
    %428 = arith.mulf %419, %345 : vector<32x8xf32>
    %429 = tpu.concatenate %399, %428 in 1 : vector<32x8xf32>, vector<32x8xf32> -> vector<32x16xf32>
    %cst_230 = arith.constant dense<0.000000e+00> : vector<32x16xf32>
    %430 = tpu.matmul %105, %429, %cst_230 {dimension_numbers = #tpu.dot_dimension_numbers<[1], [0], [0], [1], [0, 0, 1, 1], [], []>} : vector<32x32xf32>, vector<32x16xf32>, vector<32x16xf32> -> vector<32x16xf32>
    %cst_231 = arith.constant dense<0.000000e+00> : vector<32x16xf32>
    %431 = tpu.matmul %105, %430, %cst_231 {dimension_numbers = #tpu.dot_dimension_numbers<[1], [0], [0], [1], [0, 0, 1, 1], [], []>} : vector<32x32xf32>, vector<32x16xf32>, vector<32x16xf32> -> vector<32x16xf32>
    %cst_232 = arith.constant 2.000000e+00 : f32
    %432 = vector.broadcast %cst_232 : f32 to vector<32x16xf32>
    %433 = arith.mulf %432, %431 : vector<32x16xf32>
    %434 = arith.subf %433, %429 : vector<32x16xf32>
    %cst_233 = arith.constant dense<0.000000e+00> : vector<32x16xf32>
    %435 = tpu.matmul %109, %429, %cst_233 {dimension_numbers = #tpu.dot_dimension_numbers<[1], [0], [0], [1], [0, 0, 1, 1], [], []>} : vector<32x32xf32>, vector<32x16xf32>, vector<32x16xf32> -> vector<32x16xf32>
    %cst_234 = arith.constant dense<0.000000e+00> : vector<32x16xf32>
    %436 = tpu.matmul %109, %435, %cst_234 {dimension_numbers = #tpu.dot_dimension_numbers<[1], [0], [0], [1], [0, 0, 1, 1], [], []>} : vector<32x32xf32>, vector<32x16xf32>, vector<32x16xf32> -> vector<32x16xf32>
    %cst_235 = arith.constant 2.000000e+00 : f32
    %437 = vector.broadcast %cst_235 : f32 to vector<32x16xf32>
    %438 = arith.mulf %437, %436 : vector<32x16xf32>
    %439 = arith.subf %438, %429 : vector<32x16xf32>
    %440 = tpu.concatenate %429, %430, %434, %435, %439 in 1 : vector<32x16xf32>, vector<32x16xf32>, vector<32x16xf32>, vector<32x16xf32>, vector<32x16xf32> -> vector<32x80xf32>
    %cst_236 = arith.constant dense<0.000000e+00> : vector<32x8xf32>
    %441 = tpu.matmul %440, %124, %cst_236 {dimension_numbers = #tpu.dot_dimension_numbers<[1], [0], [0], [1], [0, 0, 1, 1], [], []>} : vector<32x80xf32>, vector<80x8xf32>, vector<32x8xf32> -> vector<32x8xf32>
    %442 = vector.broadcast %127 : vector<1x8xf32> to vector<32x8xf32>
    %443 = arith.addf %441, %442 : vector<32x8xf32>
    %444 = math.tanh %443 : vector<32x8xf32>
    %445 = arith.mulf %427, %345 : vector<32x8xf32>
    %cst_237 = arith.constant 1.000000e+00 : f32
    %446 = vector.broadcast %cst_237 : f32 to vector<32x8xf32>
    %447 = arith.subf %446, %427 : vector<32x8xf32>
    %448 = arith.mulf %447, %444 : vector<32x8xf32>
    %449 = arith.addf %445, %448 : vector<32x8xf32>
    %cst_238 = arith.constant dense<0.000000e+00> : vector<32x1xf32>
    %450 = tpu.matmul %449, %346, %cst_238 {dimension_numbers = #tpu.dot_dimension_numbers<[1], [0], [0], [1], [0, 0, 1, 1], [], []>} : vector<32x8xf32>, vector<8x1xf32>, vector<32x1xf32> -> vector<32x1xf32>
    %451 = vector.broadcast %347 : vector<1x1xf32> to vector<32x1xf32>
    %452 = arith.addf %450, %451 : vector<32x1xf32>
    %c0_239 = arith.constant 0 : index
    %c0_240 = arith.constant 0 : index
    %c0_241 = arith.constant 0 : index
    %453 = vector.load %arg39[%c0_239, %c0_240, %c0_241] : memref<1x32x1xf32, #tpu.memory_space<vmem>>, vector<1x32x1xf32>
    %454 = vector.shape_cast %453 : vector<1x32x1xf32> to vector<32x1xf32>
    %455 = vector.shape_cast %452 : vector<32x1xf32> to vector<1x32x1xf32>
    tpu.vector_store %arg39[%c0_239, %c0_240, %c0_241], %455 {strides = array<i32>} : memref<1x32x1xf32, #tpu.memory_space<vmem>>, vector<1x32x1xf32>,
    return
  }
  func.func @transform_0(%arg0: i32) -> (i32, i32, i32) {
    %c0_i32 = arith.constant 0 : i32
    %c0_i32_0 = arith.constant 0 : i32
    %c0_i32_1 = arith.constant 0 : i32
    %c0_i32_2 = arith.constant 0 : i32
    return %c0_i32, %c0_i32_0, %c0_i32_1 : i32, i32, i32
  }
  func.func @transform_1(%arg0: i32) -> (i32, i32) {
    %c0_i32 = arith.constant 0 : i32
    %c0_i32_0 = arith.constant 0 : i32
    %c0_i32_1 = arith.constant 0 : i32
    return %c0_i32, %c0_i32_0 : i32, i32
  }
  func.func @transform_2(%arg0: i32) -> (i32, i32) {
    %c0_i32 = arith.constant 0 : i32
    %c0_i32_0 = arith.constant 0 : i32
    %c0_i32_1 = arith.constant 0 : i32
    return %c0_i32, %c0_i32_0 : i32, i32
  }
  func.func @transform_3(%arg0: i32) -> (i32, i32) {
    %c0_i32 = arith.constant 0 : i32
    %c0_i32_0 = arith.constant 0 : i32
    %c0_i32_1 = arith.constant 0 : i32
    return %c0_i32, %c0_i32_0 : i32, i32
  }
  func.func @transform_4(%arg0: i32) -> (i32, i32) {
    %c0_i32 = arith.constant 0 : i32
    %c0_i32_0 = arith.constant 0 : i32
    %c0_i32_1 = arith.constant 0 : i32
    return %c0_i32, %c0_i32_0 : i32, i32
  }
  func.func @transform_5(%arg0: i32) -> (i32, i32) {
    %c0_i32 = arith.constant 0 : i32
    %c0_i32_0 = arith.constant 0 : i32
    %c0_i32_1 = arith.constant 0 : i32
    return %c0_i32, %c0_i32_0 : i32, i32
  }
  func.func @transform_6(%arg0: i32) -> (i32, i32) {
    %c0_i32 = arith.constant 0 : i32
    %c0_i32_0 = arith.constant 0 : i32
    %c0_i32_1 = arith.constant 0 : i32
    return %c0_i32, %c0_i32_0 : i32, i32
  }
  func.func @transform_7(%arg0: i32) -> (i32, i32) {
    %c0_i32 = arith.constant 0 : i32
    %c0_i32_0 = arith.constant 0 : i32
    %c0_i32_1 = arith.constant 0 : i32
    return %c0_i32, %c0_i32_0 : i32, i32
  }
  func.func @transform_8(%arg0: i32) -> (i32, i32) {
    %c0_i32 = arith.constant 0 : i32
    %c0_i32_0 = arith.constant 0 : i32
    %c0_i32_1 = arith.constant 0 : i32
    return %c0_i32, %c0_i32_0 : i32, i32
  }
  func.func @transform_9(%arg0: i32) -> (i32, i32) {
    %c0_i32 = arith.constant 0 : i32
    %c0_i32_0 = arith.constant 0 : i32
    %c0_i32_1 = arith.constant 0 : i32
    return %c0_i32, %c0_i32_0 : i32, i32
  }
  func.func @transform_10(%arg0: i32) -> (i32, i32) {
    %c0_i32 = arith.constant 0 : i32
    %c0_i32_0 = arith.constant 0 : i32
    %c0_i32_1 = arith.constant 0 : i32
    return %c0_i32, %c0_i32_0 : i32, i32
  }
  func.func @transform_11(%arg0: i32) -> (i32, i32) {
    %c0_i32 = arith.constant 0 : i32
    %c0_i32_0 = arith.constant 0 : i32
    %c0_i32_1 = arith.constant 0 : i32
    return %c0_i32, %c0_i32_0 : i32, i32
  }
  func.func @transform_12(%arg0: i32) -> (i32, i32) {
    %c0_i32 = arith.constant 0 : i32
    %c0_i32_0 = arith.constant 0 : i32
    %c0_i32_1 = arith.constant 0 : i32
    return %c0_i32, %c0_i32_0 : i32, i32
  }
  func.func @transform_13(%arg0: i32) -> (i32, i32) {
    %c0_i32 = arith.constant 0 : i32
    %c0_i32_0 = arith.constant 0 : i32
    %c0_i32_1 = arith.constant 0 : i32
    return %c0_i32, %c0_i32_0 : i32, i32
  }
  func.func @transform_14(%arg0: i32) -> (i32, i32) {
    %c0_i32 = arith.constant 0 : i32
    %c0_i32_0 = arith.constant 0 : i32
    %c0_i32_1 = arith.constant 0 : i32
    return %c0_i32, %c0_i32_0 : i32, i32
  }
  func.func @transform_15(%arg0: i32) -> (i32, i32) {
    %c0_i32 = arith.constant 0 : i32
    %c0_i32_0 = arith.constant 0 : i32
    %c0_i32_1 = arith.constant 0 : i32
    return %c0_i32, %c0_i32_0 : i32, i32
  }
  func.func @transform_16(%arg0: i32) -> (i32, i32) {
    %c0_i32 = arith.constant 0 : i32
    %c0_i32_0 = arith.constant 0 : i32
    %c0_i32_1 = arith.constant 0 : i32
    return %c0_i32, %c0_i32_0 : i32, i32
  }
  func.func @transform_17(%arg0: i32) -> (i32, i32) {
    %c0_i32 = arith.constant 0 : i32
    %c0_i32_0 = arith.constant 0 : i32
    %c0_i32_1 = arith.constant 0 : i32
    return %c0_i32, %c0_i32_0 : i32, i32
  }
  func.func @transform_18(%arg0: i32) -> (i32, i32) {
    %c0_i32 = arith.constant 0 : i32
    %c0_i32_0 = arith.constant 0 : i32
    %c0_i32_1 = arith.constant 0 : i32
    return %c0_i32, %c0_i32_0 : i32, i32
  }
  func.func @transform_19(%arg0: i32) -> (i32, i32) {
    %c0_i32 = arith.constant 0 : i32
    %c0_i32_0 = arith.constant 0 : i32
    %c0_i32_1 = arith.constant 0 : i32
    return %c0_i32, %c0_i32_0 : i32, i32
  }
  func.func @transform_20(%arg0: i32) -> (i32, i32) {
    %c0_i32 = arith.constant 0 : i32
    %c0_i32_0 = arith.constant 0 : i32
    %c0_i32_1 = arith.constant 0 : i32
    return %c0_i32, %c0_i32_0 : i32, i32
  }
  func.func @transform_21(%arg0: i32) -> (i32, i32) {
    %c0_i32 = arith.constant 0 : i32
    %c0_i32_0 = arith.constant 0 : i32
    %c0_i32_1 = arith.constant 0 : i32
    return %c0_i32, %c0_i32_0 : i32, i32
  }
  func.func @transform_22(%arg0: i32) -> (i32, i32) {
    %c0_i32 = arith.constant 0 : i32
    %c0_i32_0 = arith.constant 0 : i32
    %c0_i32_1 = arith.constant 0 : i32
    return %c0_i32, %c0_i32_0 : i32, i32
  }
  func.func @transform_23(%arg0: i32) -> (i32, i32) {
    %c0_i32 = arith.constant 0 : i32
    %c0_i32_0 = arith.constant 0 : i32
    %c0_i32_1 = arith.constant 0 : i32
    return %c0_i32, %c0_i32_0 : i32, i32
  }
  func.func @transform_24(%arg0: i32) -> (i32, i32) {
    %c0_i32 = arith.constant 0 : i32
    %c0_i32_0 = arith.constant 0 : i32
    %c0_i32_1 = arith.constant 0 : i32
    return %c0_i32, %c0_i32_0 : i32, i32
  }
  func.func @transform_25(%arg0: i32) -> (i32, i32) {
    %c0_i32 = arith.constant 0 : i32
    %c0_i32_0 = arith.constant 0 : i32
    %c0_i32_1 = arith.constant 0 : i32
    return %c0_i32, %c0_i32_0 : i32, i32
  }
  func.func @transform_26(%arg0: i32) -> (i32, i32) {
    %c0_i32 = arith.constant 0 : i32
    %c0_i32_0 = arith.constant 0 : i32
    %c0_i32_1 = arith.constant 0 : i32
    return %c0_i32, %c0_i32_0 : i32, i32
  }
  func.func @transform_27(%arg0: i32) -> (i32, i32) {
    %c0_i32 = arith.constant 0 : i32
    %c0_i32_0 = arith.constant 0 : i32
    %c0_i32_1 = arith.constant 0 : i32
    return %c0_i32, %c0_i32_0 : i32, i32
  }
  func.func @transform_28(%arg0: i32) -> (i32, i32) {
    %c0_i32 = arith.constant 0 : i32
    %c0_i32_0 = arith.constant 0 : i32
    %c0_i32_1 = arith.constant 0 : i32
    return %c0_i32, %c0_i32_0 : i32, i32
  }
  func.func @transform_29(%arg0: i32) -> (i32, i32) {
    %c0_i32 = arith.constant 0 : i32
    %c0_i32_0 = arith.constant 0 : i32
    %c0_i32_1 = arith.constant 0 : i32
    return %c0_i32, %c0_i32_0 : i32, i32
  }
  func.func @transform_30(%arg0: i32) -> (i32, i32) {
    %c0_i32 = arith.constant 0 : i32
    %c0_i32_0 = arith.constant 0 : i32
    %c0_i32_1 = arith.constant 0 : i32
    return %c0_i32, %c0_i32_0 : i32, i32
  }
  func.func @transform_31(%arg0: i32) -> (i32, i32) {
    %c0_i32 = arith.constant 0 : i32
    %c0_i32_0 = arith.constant 0 : i32
    %c0_i32_1 = arith.constant 0 : i32
    return %c0_i32, %c0_i32_0 : i32, i32
  }
  func.func @transform_32(%arg0: i32) -> (i32, i32) {
    %c0_i32 = arith.constant 0 : i32
    %c0_i32_0 = arith.constant 0 : i32
    %c0_i32_1 = arith.constant 0 : i32
    return %c0_i32, %c0_i32_0 : i32, i32
  }
  func.func @transform_33(%arg0: i32) -> (i32, i32) {
    %c0_i32 = arith.constant 0 : i32
    %c0_i32_0 = arith.constant 0 : i32
    %c0_i32_1 = arith.constant 0 : i32
    return %c0_i32, %c0_i32_0 : i32, i32
  }
  func.func @transform_34(%arg0: i32) -> (i32, i32) {
    %c0_i32 = arith.constant 0 : i32
    %c0_i32_0 = arith.constant 0 : i32
    %c0_i32_1 = arith.constant 0 : i32
    return %c0_i32, %c0_i32_0 : i32, i32
  }
  func.func @transform_35(%arg0: i32) -> (i32, i32) {
    %c0_i32 = arith.constant 0 : i32
    %c0_i32_0 = arith.constant 0 : i32
    %c0_i32_1 = arith.constant 0 : i32
    return %c0_i32, %c0_i32_0 : i32, i32
  }
  func.func @transform_36(%arg0: i32) -> (i32, i32, i32) {
    %c0_i32 = arith.constant 0 : i32
    %c0_i32_0 = arith.constant 0 : i32
    %c0_i32_1 = arith.constant 0 : i32
    %c0_i32_2 = arith.constant 0 : i32
    return %c0_i32, %c0_i32_0, %c0_i32_1 : i32, i32, i32
  }
  func.func @transform_37(%arg0: i32) -> (i32, i32, i32) {
    %c0_i32 = arith.constant 0 : i32
    %c0_i32_0 = arith.constant 0 : i32
    %c0_i32_1 = arith.constant 0 : i32
    %c0_i32_2 = arith.constant 0 : i32
    return %c0_i32, %c0_i32_0, %c0_i32_1 : i32, i32, i32
  }
  func.func @transform_38(%arg0: i32) -> (i32, i32, i32) {
    %c0_i32 = arith.constant 0 : i32
    %c0_i32_0 = arith.constant 0 : i32
    %c0_i32_1 = arith.constant 0 : i32
    %c0_i32_2 = arith.constant 0 : i32
    return %c0_i32, %c0_i32_0, %c0_i32_1 : i32, i32, i32
  }
  func.func @transform_39(%arg0: i32) -> (i32, i32) {
    %c0_i32 = arith.constant 0 : i32
    %c0_i32_0 = arith.constant 0 : i32
    %c0_i32_1 = arith.constant 0 : i32
    return %c0_i32, %c0_i32_0 : i32, i32
  }
}

</mosaic_0001>

<bundles_post_ra>
// kernel: gts_forward.1
= control target key start
LH: loop header
LB: loop body
LE: loop exit
PB: predicated region body
PF: predicated region fallthrough
CT: control target
= control target key end

     0   :  { %s12202_s6 = smov 1   ;;  %s12203_s10 = smov 2   ;;  %s14505_s0 = inlined_call_operand.smem [shape: u32[40], index: -1, kind: input, shape index: {}] }
   0x1   :  { %s12259_s5 = sld [smem:[%s14505_s0]]   ;;  %s12204_s14 = smov 3  }
   0x2   :  { %s12264_s9 = sld [smem:[%s14505_s0 + %s12202_s6]]   ;;  %s12205_s18 = smov 4  }
   0x3   :  { %s12269_s13 = sld [smem:[%s14505_s0 + %s12203_s10]]   ;;  %s12206_s22 = smov 5  }
   0x4   :  { %s12274_s17 = sld [smem:[%s14505_s0 + %s12204_s14]]   ;;  %s12207_s26 = smov 6  }
   0x5   :  { %s12279_s21 = sld [smem:[%s14505_s0 + %s12205_s18]]   ;;  %s12208_s30 = smov 7  }
   0x6   :  { %s12284_s25 = sld [smem:[%s14505_s0 + %s12206_s22]]   ;;  %s12209_s4 = smov 8  }
   0x7   :  { %14519 = sst [smem:[#allocation6_spill]] %s12259_s5  ;;  %s12210_s10 = smov 9  }
   0x8   :  { %s12289_s29 = sld [smem:[%s14505_s0 + %s12207_s26]]   ;;  %s12211_s15 = smov 10  }
   0x9   :  { %s12294_s3 = sld [smem:[%s14505_s0 + %s12208_s30]]   ;;  %s12212_s20 = smov 11  }
   0xa   :  { %s12299_s8 = sld [smem:[%s14505_s0 + %s12209_s4]]   ;;  %s12213_s26 = smov 12  }
   0xb   :  { %s12304_s14 = sld [smem:[%s14505_s0 + %s12210_s10]]   ;;  %s12214_s1 = smov 13  }
   0xc   :  { %s12309_s19 = sld [smem:[%s14505_s0 + %s12211_s15]]   ;;  %s12215_s7 = smov 14  }
   0xd   :  { %s12314_s24 = sld [smem:[%s14505_s0 + %s12212_s20]]   ;;  %s12216_s15 = smov 15  }
   0xe   :  { %s12319_s30 = sld [smem:[%s14505_s0 + %s12213_s26]]   ;;  %s12217_s22 = smov 16  }
   0xf   :  { %s12324_s6 = sld [smem:[%s14505_s0 + %s12214_s1]]   ;;  %s12218_s28 = smov 17  }
  0x10   :  { %s12329_s12 = sld [smem:[%s14505_s0 + %s12215_s7]]   ;;  %s12219_s7 = smov 18  }
  0x11   :  { %s12334_s20 = sld [smem:[%s14505_s0 + %s12216_s15]]   ;;  %s12220_s15 = smov 19  }
  0x12   :  { %s12339_s27 = sld [smem:[%s14505_s0 + %s12217_s22]]   ;;  %s12221_s22 = smov 20  }
  0x13   :  { %s12344_s4 = sld [smem:[%s14505_s0 + %s12218_s28]]   ;;  %s12222_s28 = smov 21  }
  0x14   :  { %s12349_s5 = sld [smem:[%s14505_s0 + %s12219_s7]]   ;;  %s12223_s7 = smov 22  }
  0x15   :  { %14520 = sst [smem:[#allocation7_spill]] %s12324_s6  ;;  %s12237_s23 = smov 36  }
  0x16   :  { %s12238_s1 = smov 37   ;;  %s12239_s10 = smov 38  }
  0x17   :  { %14521 = sst [smem:[#allocation8_spill]] %s12334_s20  ;;  %s12240_s16 = smov 39  }
  0x18   :  { %14522 = sst [smem:[#allocation9_spill]] %s12339_s27 }
  0x19   :  { %14523 = sst [smem:[#allocation10_spill]] %s12344_s4 }
  0x1a   :  { %14524 = sst [smem:[#allocation11_spill]] %s12349_s5 }
  0x1b   :  { %s12354_s20 = sld [smem:[%s14505_s0 + %s12220_s15]]   ;;  %s12224_s15 = smov 23  }
  0x1c   :  { %s12359_s27 = sld [smem:[%s14505_s0 + %s12221_s22]]   ;;  %s12225_s22 = smov 24  }
  0x1d   :  { %s12364_s4 = sld [smem:[%s14505_s0 + %s12222_s28]]   ;;  %s12226_s28 = smov 25  }
  0x1e   :  { %s12369_s5 = sld [smem:[%s14505_s0 + %s12223_s7]]   ;;  %s12227_s7 = smov 26  }
  0x1f   :  { %s12452_s6 = sld [smem:[%s14505_s0 + %s12240_s16]]  }
  0x21   :  { %14525 = sst [smem:[#allocation12_spill]] %s12354_s20 }
  0x22   :  { %14526 = sst [smem:[#allocation13_spill]] %s12359_s27 }
  0x23   :  { %14527 = sst [smem:[#allocation14_spill]] %s12364_s4 }
  0x24   :  { %14528 = sst [smem:[#allocation15_spill]] %s12369_s5 }
  0x25   :  { %s12374_s20 = sld [smem:[%s14505_s0 + %s12224_s15]]   ;;  %s12228_s15 = smov 27  }
  0x26   :  { %s12379_s27 = sld [smem:[%s14505_s0 + %s12225_s22]]   ;;  %s12229_s22 = smov 28  }
  0x27   :  { %s12384_s4 = sld [smem:[%s14505_s0 + %s12226_s28]]   ;;  %s12230_s28 = smov 29  }
  0x28   :  { %s12389_s5 = sld [smem:[%s14505_s0 + %s12227_s7]]   ;;  %s12231_s7 = smov 30  }
  0x2b   :  { %14529 = sst [smem:[#allocation16_spill]] %s12374_s20 }
  0x2c   :  { %14530 = sst [smem:[#allocation17_spill]] %s12379_s27 }
  0x2d   :  { %14531 = sst [smem:[#allocation18_spill]] %s12384_s4 }
  0x2e   :  { %14532 = sst [smem:[#allocation19_spill]] %s12389_s5 }
  0x2f   :  { %s12394_s20 = sld [smem:[%s14505_s0 + %s12228_s15]]   ;;  %s12232_s15 = smov 31  }
  0x30   :  { %s12399_s27 = sld [smem:[%s14505_s0 + %s12229_s22]]   ;;  %s12233_s22 = smov 32  }
  0x31   :  { %s12404_s4 = sld [smem:[%s14505_s0 + %s12230_s28]]   ;;  %s12234_s28 = smov 33  }
  0x32   :  { %s12409_s5 = sld [smem:[%s14505_s0 + %s12231_s7]]   ;;  %s12235_s7 = smov 34  }
  0x35   :  { %14533 = sst [smem:[#allocation20_spill]] %s12394_s20 }
  0x36   :  { %14534 = sst [smem:[#allocation21_spill]] %s12399_s27 }
  0x37   :  { %14535 = sst [smem:[#allocation22_spill]] %s12404_s4 }
  0x38   :  { %14536 = sst [smem:[#allocation23_spill]] %s12409_s5 }
  0x39   :  { %s12414_s20 = sld [smem:[%s14505_s0 + %s12232_s15]]   ;;  %s12236_s15 = smov 35  }
  0x3a   :  { %s12419_s27 = sld [smem:[%s14505_s0 + %s12233_s22]]  }
  0x3b   :  { %s12424_s4 = sld [smem:[%s14505_s0 + %s12234_s28]]  }
  0x3c   :  { %s12429_s5 = sld [smem:[%s14505_s0 + %s12235_s7]]  }
  0x3f   :  { %14537 = sst [smem:[#allocation24_spill]] %s12414_s20 }
  0x40   :  { %14538 = sst [smem:[#allocation25_spill]] %s12419_s27 }
  0x41   :  { %14539 = sst [smem:[#allocation26_spill]] %s12424_s4 }
  0x42   :  { %14540 = sst [smem:[#allocation27_spill]] %s12429_s5 }
  0x43   :  { %s8833_s20 = sld [smem:[%s14505_s0 + %s12236_s15]]  }
  0x44   :  { %s12437_s27 = sld [smem:[%s14505_s0 + %s12237_s23]]  }
  0x45   :  { %s12442_s4 = sld [smem:[%s14505_s0 + %s12238_s1]]  }
  0x46   :  { %s12447_s5 = sld [smem:[%s14505_s0 + %s12239_s10]]  }
  0x49   :  { %v85_v0 = vstv %s8833_s20 }
  0x4a   :  { %86 = vst [vmem:[#allocation2] sm:$0x1] %v85_v0 }
  0x4b   :  { %v251_v1 = vld [vmem:[%s12279_s21] sm:$0xff]  ;;  %vm169_vm0 = vcmask 64512   ;;  %v167_v3 = vld [vmem:[%s12269_s13 + $0x8] sm:$0xff] }
  0x4c   :  { %v166_v2 = vld [vmem:[%s12269_s13] sm:$0xff]  ;;  %9914 = vmatprep.subr.mxu1 %v251_v1  ;;  %v165_v6 = vld [vmem:[%s12264_s9 + $0x8] sm:$0xff] }
  0x4d   :  { %9916 = vmatprep.mubr.msk.f32.mxu1 %vm169_vm0, %v166_v2  ;;  %v168_v4 = vld [vmem:[%s12274_s17] sm:$0xff]  ;;  %9915 = vmatpush3.msra.mxu1 %v251_v1 }
  0x4e   :  { %v164_v5 = vld [vmem:[%s12264_s9] sm:$0xff]  ;;  %9909 = vmatprep.subr.mxu0 %v168_v4 }
  0x4f   :  { %87 = vsyncpa [#allocation4], 0  ;;  %9917 = vmatmul.mubr.msk.f32.vlgmr.msra.gmra.mrb[0].mxu1 %vm169_vm0, %v167_v3  ;;  %9910 = vmatpush3.msra.mxu0 %v168_v4  ;;  %v333_v12 = vld [vmem:[%s12284_s25] sm:$0xff]  ;;  %vm498_vm2 = vcmask 130048   ;;  %v694_v42 = vld [vmem:[%s12299_s8 + $0x8] sm:$0xff]  ;;  %vm785_vm3 = vcmask 261120  }
  0x50   :  { %9911 = vmatprep.mubr.msk.f32.mxu0 %vm169_vm0, %v164_v5  ;;  %vm11063_vm1 = vmpackc.low %vm169_vm0, %vm169_vm0  ;;  %9919 = vmatprep.subr.mxu0 %v333_v12  ;;  %v602_v32 = vld [vmem:[%s12289_s29] sm:$0xff]  ;;  %v834_v53 = vld [vmem:[%s12319_s30 + $0x8] sm:$0xff]  ;;  %s14541_s0 = sld [smem:[#allocation7_spill]]  ;;  %s14542_s9 = sld [smem:[#allocation6_spill]]  ;;  %vm1343_vm4 = vcmask 15360   ;;  %vm1348_vm5 = vcmask 80896  }
  0x51   :  { %9912 = vmatmul.mubr.msk.f32.vlgmr.msra.gmra.mrb[0].mxu0 %vm169_vm0, %v165_v6  ;;  %v693_v41 = vld [vmem:[%s12299_s8] sm:$0xff]  ;;  %v835_v55 = vld [vmem:[%s12319_s30 + $0x10] sm:$0xff]  ;;  %v836_v56 = vld [vmem:[%s12319_s30 + $0x18] sm:$0xff]  ;;  %s14543_s13 = sld [smem:[#allocation8_spill]]  ;;  %s14544_s17 = sld [smem:[#allocation10_spill]]  ;;  %vm1025_vm6 = vcmask 7168  }
  0x52   :  { %9921 = vmatprep.mubr.msk.f32.mxu0 %vm169_vm0, %v166_v2  ;;  %9920 = vmatpush3.msra.mxu0 %v333_v12  ;;  %v11072_v43 = vpack.c.bf16 %v694_v42, %v693_v41  ;;  %v8850_v44 = vld [vmem:[%s12294_s3] ss:$0 sm:$0xff]  ;;  %v11080_v57 = vpack.c.bf16 %v836_v56, %v835_v55  ;;  %v928_v59 = vld [vmem:[%s12329_s12 + $0x8] sm:$0xff]  ;;  %s12241_s21 = smov 127   ;;  %vm12531_vm7 = vmpackc.low %vm1025_vm6, %vm1025_vm6  ;;  %s12242_s25 = smov 32   ;;  %vm1393_vm8 = vcmask 392192  }
  0x53   :  { %v833_v52 = vld [vmem:[%s12319_s30] sm:$0xff]  ;;  %s14547_s29 = sld [smem:[#allocation9_spill]]  ;;  %s12243_s3 = smov 64   ;;  %vm1398_vm9 = vcmask 523264   ;;  %vm1409_vm10 = vcmask 654336   ;;  %vm12836_vm13 = vmpackc.low %vm1348_vm5, %vm1348_vm5  ;;  %vm6121_vm14 = vcmask 72704  }
  0x54   :  { %v11076_v54 = vpack.c.bf16 %v834_v53, %v833_v52  ;;  %v927_v58 = vld [vmem:[%s12329_s12] sm:$0xff]  ;;  %s14548_s8 = sld [smem:[#allocation12_spill]]  ;;  %s14551_s30 = sld [smem:[#allocation14_spill]]  ;;  %vm13920_vm15 = vmpackc.low %vm6121_vm14, %vm6121_vm14 }
  0x55   :  { %9922 = vmatmul.mubr.msk.f32.vlgmr.msra.gmra.mrb[2].mxu0 %vm169_vm0, %v167_v3  ;;  %v11084_v60 = vpack.c.bf16 %v928_v59, %v927_v58  ;;  %v8853_v61 = vld [vmem:[%s12304_s14] ss:$0 sm:$0xff]  ;;  %s14549_s14 = sld [smem:[#allocation11_spill]]  ;;  %s12246_s20 = smov 48  }
  0x56   :  { %v8858_v41 = vld [vmem:[%s14541_s0] ss:$0 sm:$0xff]  ;;  %v12514_v52 = vld [vmem:[%s14542_s9 + $0x8] sm:$0xff]  ;;  %v12517_v53 = vld [vmem:[%s14542_s9 + $0x10] sm:$0xff]  ;;  %s14557_s23 = sld [smem:[#allocation16_spill]]  ;;  %s14558_s22 = sld [smem:[#allocation18_spill]] }
  0x57   :  { %v1345_v58 = vsel %vm1343_vm4, %v12514_v52, 0.0  ;;  %v1250_v59 = vld [vmem:[%s14544_s17] sm:$0xff]  ;;  %s14559_s26 = sld [smem:[#allocation17_spill]]  ;;  %s12248_s1 = smov 8  }
  0x58   :  { %s14560_s28 = sld [smem:[#allocation19_spill]]  ;;  %s14561_s2 = sld [smem:[#allocation20_spill]] }
  0x59   :  { %s14562_s10 = sld [smem:[#allocation21_spill]]  ;;  %s14563_s7 = sld [smem:[#allocation22_spill]] }
  0x5a   :  { %s14564_s11 = sld [smem:[#allocation24_spill]]  ;;  %s14565_s16 = sld [smem:[#allocation25_spill]] }
  0x5b   :  { %s14566_s15 = sld [smem:[#allocation23_spill]]  ;;  %s14567_s18 = sld [smem:[#allocation27_spill]] }
  0x5c   :  { %s14568_s0 = sld [smem:[#allocation26_spill]] }
 0x122   :  { %v9918_v7 = vpop.f32.mrb[0].mxu1 }
 0x123   :  { %v324_v8 = vpop.f32.mrb[1].mxu1 }
 0x124   :  { %v11062_v9 = vpack.c.bf16 %v9918_v7, %v324_v8  ;;  %v9913_v10 = vpop.f32.mrb[0].mxu0 }
 0x125   :  { %v242_v11 = vpop.f32.mrb[1].mxu0 }
 0x126   :  { %11064 = vmatprep.subr.msk.bf16.mxu1 %vm11063_vm1, %v11062_v9  ;;  %9928 = vmatprep.mubr.msk.f32.mxu1 %vm169_vm0, %v242_v11 }
 0x127   :  { %11067 = vmatpush3.bf16.xpose.msk.msra.mxu1 %vm11063_vm1, %v11062_v9 }
 0x128   :  { %v9923_v29 = vpop.f32.mrb[2].mxu0  ;;  %11085 = vmatprep.subr.bf16.mxu1 %v11084_v60 }
 0x129   :  { %v400_v30 = vpop.f32.mrb[3].mxu0 }
 0x12a   :  { %v11068_v31 = vpack.c.bf16 %v9923_v29, %v400_v30  ;;  %v8856_v30 = vld [vmem:[%s12309_s19] ss:$0 sm:$0xff]  ;;  %s12244_s19 = smov 2  }
 0x12c   :  { %11069 = vmatprep.subr.bf16.mxu0 %v11068_v31 }
 0x12d   :  { %11071 = vmatpush3.bf16.msra.mxu0 %v11068_v31 }
 0x12e   :  { %9929 = vmatmul.mubr.msk.f32.vlgmr.msra.gmra.mrb[2].mxu1 %vm169_vm0, %v9913_v10  ;;  %9938 = vmatprep.subr.mxu0 %v602_v32 }
 0x12f   :  { %11087 = vmatpush3.bf16.msra.mxu1 %v11084_v60  ;;  %v1251_v60 = vld [vmem:[%s14544_s17 + $0x8] sm:$0xff] }
 0x201   :  { %v9930_v13 = vpop.f32.mrb[2].mxu1 }
 0x202   :  { %v487_v14 = vpop.f32.mrb[3].mxu1  ;;  %v497_v16 = vmul.f32 0.35355338, %v9930_v13 }
 0x203   :  { %v496_v15 = vmul.f32 0.35355338, %v487_v14 }
 0x204   :  { %v502_v18 = vsel %vm498_vm2, %v497_v16, -inf }
 0x205   :  { %v499_v17 = vsel %vm498_vm2, %v496_v15, -inf }
 0x206   :  { %500 = vmax.xlane.f32.xlu0 %v499_v17 }
 0x20a   :  { %503 = vmax.xlane.f32.xlu0 %v502_v18 }
 0x293   :  { %v501_v19 = vpop.xlane.xlu0 %500 }
 0x294   :  { %v505_v20 = vsub.f32 %v496_v15, %v501_v19 }
 0x296   :  { %v507_v21 = vmul.f32 1.442695, %v505_v20 }
 0x297   :  { %v504_v22 = vpop.xlane.xlu0 %503 }
 0x298   :  { %11917 = vpow2.f32 %v507_v21  ;;  %v506_v23 = vsub.f32 %v497_v16, %v504_v22 }
 0x29a   :  { %v509_v24 = vmul.f32 1.442695, %v506_v23 }
 0x29c   :  { %11919 = vpow2.f32 %v509_v24 }
 0x2a2   :  { %v11918_v25 = vpop.eup %11917 }
 0x2a3   :  { %v511_v26 = vsel %vm498_vm2, %v11918_v25, 0.0 }
 0x2a4   :  { %512 = vadd.xlane.f32.xlu1 %v511_v26 }
 0x2a6   :  { %v11920_v27 = vpop.eup %11919 }
 0x2a7   :  { %v514_v28 = vsel %vm498_vm2, %v11920_v27, 0.0 }
 0x2a8   :  { %515 = vadd.xlane.f32.xlu1 %v514_v28 }
 0x331   :  { %v513_v33 = vpop.xlane.xlu1 %512 }
 0x332   :  { %11921 = vrcp.f32 %v513_v33  ;;  %v8857_v33 = vld [vmem:[%s12314_s24] ss:$0 sm:$0xff]  ;;  %s14550_s24 = sld [smem:[#allocation13_spill]] }
 0x335   :  { %v516_v34 = vpop.xlane.xlu1 %515 }
 0x336   :  { %11923 = vrcp.f32 %v516_v34 }
 0x33c   :  { %v11922_v35 = vpop.eup %11921 }
 0x33d   :  { %v519_v36 = vmul.f32 %v11922_v35, %v11918_v25 }
 0x33f   :  { %9935 = vmatprep.mubr.msk.f32.mxu0 %vm498_vm2, %v519_v36 }
 0x340   :  { %v11924_v37 = vpop.eup %11923 }
 0x341   :  { %v520_v38 = vmul.f32 %v11924_v37, %v11920_v27 }
 0x343   :  { %9936 = vmatmul.mubr.msk.f32.vlgmr.msra.gmra.mrb[4].mxu0 %vm498_vm2, %v520_v38  ;;  %v929_v38 = vld [vmem:[%s12329_s12 + $0x10] sm:$0xff] }
 0x344   :  { %9939 = vmatpush3.msra.mxu0 %v602_v32 }
 0x345   :  { %11073 = vmatprep.subr.bf16.mxu0 %v11072_v43 }
 0x416   :  { %v9937_v39 = vpop.f32.mrb[4].mxu0 }
 0x417   :  { %v593_v40 = vpop.f32.mrb[5].mxu0 }
 0x418   :  { %9940 = vmatprep.mubr.msk.f32.mxu0 %vm169_vm0, %v593_v40 }
 0x419   :  { %9941 = vmatmul.mubr.msk.f32.vlgmr.msra.gmra.mrb[6].mxu0 %vm169_vm0, %v9937_v39  ;;  %v930_v39 = vld [vmem:[%s12329_s12 + $0x18] sm:$0xff]  ;;  %s12245_s12 = smov 16  }
 0x41a   :  { %11075 = vmatpush3.bf16.msra.mxu0 %v11072_v43  ;;  %v11088_v40 = vpack.c.bf16 %v930_v39, %v929_v38  ;;  %v1244_v38 = vld [vmem:[%s14547_s29 + $0x20] sm:$0xff]  ;;  %v1245_v39 = vld [vmem:[%s14547_s29 + $0x28] sm:$0xff] }
 0x41b   :  { %11077 = vmatprep.subr.bf16.mxu0 %v11076_v54 }
 0x41c   :  { %11089 = vmatprep.subr.bf16.mxu1 %v11088_v40 }
 0x41d   :  { %11091 = vmatpush3.bf16.msra.mxu1 %v11088_v40 }
 0x4ec   :  { %v9942_v45 = vpop.f32.mrb[6].mxu0 }
 0x4ed   :  { %v688_v46 = vadd.f32 %v9942_v45, %v8850_v44  ;;  %v682_v47 = vpop.f32.mrb[7].mxu0 }
 0x4ee   :  { %v683_v48 = vadd.f32 %v8850_v44, %v682_v47 }
 0x4ef   :  { %11925 = vtanh.f32 %v688_v46 }
 0x4f0   :  { %11927 = vtanh.f32 %v683_v48  ;;  %v12508_v48 = vld [vmem:[%s14542_s9] sm:$0xff] }
 0x4f9   :  { %v11926_v49 = vpop.eup %11925 }
 0x4fa   :  { %v11928_v50 = vpop.eup %11927 }
 0x4fb   :  { %9947 = vmatprep.mubr.msk.f32.mxu0 %vm498_vm2, %v11928_v50  ;;  %v12484_v51 = vpack.c.bf16 %v11926_v49, %v11928_v50  ;;  %v8861_v50 = vld [vmem:[%s14543_s13] ss:$0 sm:$0xff] }
 0x4fc   :  { %9948 = vmatmul.mubr.msk.f32.vlgmr.msra.gmra.mrb[8].mxu0 %vm498_vm2, %v11926_v49  ;;  %v1344_v49 = vsel %vm1343_vm4, %v12508_v48, 0.0 }
 0x4fd   :  { %11079 = vmatpush3.bf16.msra.mxu0 %v11076_v54  ;;  %v1349_v55 = vsel %vm1348_vm5, %v1344_v49, 0.0  ;;  %v1247_v49 = vld [vmem:[%s14547_s29 + $0x38] sm:$0xff] }
 0x4fe   :  { %11081 = vmatprep.subr.bf16.mxu0 %v11080_v57 }
 0x501   :  { %11083 = vmatpush3.bf16.msra.mxu0 %v11080_v57 }
 0x5cf   :  { %v9949_v62 = vpop.f32.mrb[8].mxu0 }
 0x5d0   :  { %v780_v63 = vadd.f32 %v9949_v62, %v8853_v61  ;;  %v774_v0 = vpop.f32.mrb[9].mxu0  ;;  %v1346_v62 = vsel %vm1343_vm4, %v12517_v53, 0.0 }
 0x5d1   :  { %v775_v1 = vadd.f32 %v8853_v61, %v774_v0  ;;  %v1353_v0 = vsub.f32 0.0, %v1349_v55 }
 0x5d2   :  { %v784_v2 = vmax.f32 %v780_v63, 0.0 }
 0x5d3   :  { %v783_v3 = vmax.f32 %v775_v1, 0.0 }
 0x5d4   :  { %v787_v4 = vsel %vm785_vm3, %v784_v2, 0.0 }
 0x5d5   :  { %v786_v5 = vsel %vm785_vm3, %v783_v3, 0.0 }
 0x5d6   :  { %v788_v6 = vadd.f32 %v787_v4, %v786_v5  ;;  %v12543_v4 = vsel %vm1348_vm5, %v1346_v62, 0.0  ;;  %v12548_v5 = vld [vmem:[%s14542_s9 + $0x18] sm:$0xff]  ;;  %v1249_v62 = vld [vmem:[%s14547_s29 + $0x48] sm:$0xff] }
 0x5d8   :  { %v789_v7 = vrot.slane %v788_v6, 4 }
 0x5da   :  { %v790_v8 = vadd.f32 %v789_v7, %v788_v6  ;;  %v1355_v7 = vsub.f32 0.0, %v12543_v4 }
 0x5dc   :  { %v791_v9 = vrot.slane %v790_v8, 2 }
 0x5de   :  { %v792_v10 = vadd.f32 %v791_v9, %v790_v8  ;;  %v1347_v8 = vsel %vm1343_vm4, %v12548_v5, 0.0 }
 0x5df   :  { %v12562_v9 = vsel %vm1348_vm5, %v1347_v8, 0.0 }
 0x5e0   :  { %v793_v11 = vrot.slane %v792_v10, 1 }
 0x5e2   :  { %v794_v12 = vadd.f32 %v793_v11, %v792_v10  ;;  %v1356_v10 = vsub.f32 0.0, %v12562_v9  ;;  %v1252_v11 = vld [vmem:[%s14544_s17 + $0x10] sm:$0xff] }
 0x5e4   :  { %v796_v13 = vmul.f32 0.0625, %v794_v12  ;;  %v1253_v12 = vld [vmem:[%s14544_s17 + $0x18] sm:$0xff] }
 0x5e6   :  { %v797_v14 = vsub.f32 %v783_v3, %v796_v13  ;;  %v798_v15 = vsub.f32 %v784_v2, %v796_v13  ;;  %v12538_v2 = vsel %vm1348_vm5, %v1345_v58, 0.0  ;;  %v12540_v3 = vpack.c.bf16 %v1251_v60, %v1250_v59  ;;  %v1240_v13 = vld [vmem:[%s14547_s29] sm:$0xff] }
 0x5e7   :  { %v1354_v6 = vsub.f32 0.0, %v12538_v2  ;;  %v1386_v40 = vsel %vm498_vm2, %v12538_v2, 0.0 }
 0x5e8   :  { %v799_v16 = vmul.f32 %v797_v14, %v797_v14  ;;  %v800_v17 = vmul.f32 %v798_v15, %v798_v15 }
 0x5ea   :  { %v801_v18 = vsel %vm785_vm3, %v799_v16, 0.0  ;;  %v802_v19 = vsel %vm785_vm3, %v800_v17, 0.0  ;;  %v12573_v17 = vpack.c.bf16 %v1253_v12, %v1252_v11 }
 0x5eb   :  { %v803_v20 = vadd.f32 %v802_v19, %v801_v18 }
 0x5ed   :  { %v804_v21 = vrot.slane %v803_v20, 4 }
 0x5ef   :  { %v805_v22 = vadd.f32 %v804_v21, %v803_v20  ;;  %v1254_v20 = vld [vmem:[%s14544_s17 + $0x20] sm:$0xff]  ;;  %v1255_v21 = vld [vmem:[%s14544_s17 + $0x28] sm:$0xff] }
 0x5f1   :  { %v806_v23 = vrot.slane %v805_v22, 2 }
 0x5f3   :  { %v807_v24 = vadd.f32 %v806_v23, %v805_v22  ;;  %v1385_v22 = vsel %vm498_vm2, %v1349_v55, 0.0 }
 0x5f5   :  { %v808_v25 = vrot.slane %v807_v24, 1 }
 0x5f7   :  { %v809_v26 = vadd.f32 %v808_v25, %v807_v24  ;;  %v12588_v24 = vpack.c.bf16 %v1255_v21, %v1254_v20 }
 0x5f9   :  { %v810_v27 = vmul.f32 0.0625, %v809_v26 }
 0x5fb   :  { %v811_v28 = vadd.f32 1e-05, %v810_v27 }
 0x5fd   :  { %11929 = vrsqrt.f32 %v811_v28  ;;  %v1256_v28 = vld [vmem:[%s14544_s17 + $0x30] sm:$0xff] }
 0x607   :  { %v11930_v29 = vpop.eup %11929 }
 0x608   :  { %v813_v31 = vmul.f32 %v11930_v29, %v797_v14  ;;  %v814_v32 = vmul.f32 %v11930_v29, %v798_v15  ;;  %v1241_v14 = vld [vmem:[%s14547_s29 + $0x8] sm:$0xff]  ;;  %v1257_v29 = vld [vmem:[%s14544_s17 + $0x38] sm:$0xff] }
 0x609   :  { %v12576_v19 = vpack.c.bf16 %v1241_v14, %v1240_v13 }
 0x60a   :  { %v822_v34 = vmul.f32 %v8856_v30, %v813_v31  ;;  %v823_v35 = vmul.f32 %v8856_v30, %v814_v32  ;;  %v1242_v30 = vld [vmem:[%s14547_s29 + $0x10] sm:$0xff]  ;;  %v1243_v31 = vld [vmem:[%s14547_s29 + $0x18] sm:$0xff] }
 0x60c   :  { %v831_v36 = vadd.f32 %v8857_v33, %v822_v34  ;;  %v832_v37 = vadd.f32 %v8857_v33, %v823_v35  ;;  %v12601_v34 = vpack.c.bf16 %v1257_v29, %v1256_v28  ;;  %v12603_v35 = vpack.c.bf16 %v1243_v31, %v1242_v30 }
 0x60e   :  { %9958 = vmatprep.mubr.msk.f32.mxu0 %vm785_vm3, %v831_v36  ;;  %v1258_v36 = vld [vmem:[%s14544_s17 + $0x40] sm:$0xff] }
 0x60f   :  { %9959 = vmatmul.mubr.msk.f32.vlgmr.msra.gmra.mrb[10].mxu0 %vm785_vm3, %v832_v37  ;;  %v1259_v37 = vld [vmem:[%s14544_s17 + $0x48] sm:$0xff] }
 0x6e2   :  { %v9960_v42 = vpop.f32.mrb[10].mxu0 }
 0x6e3   :  { %v922_v43 = vadd.f32 %v9960_v42, %v8858_v41  ;;  %v916_v44 = vpop.f32.mrb[11].mxu0  ;;  %v1387_v42 = vsel %vm498_vm2, %v12543_v4, 0.0 }
 0x6e4   :  { %v917_v45 = vadd.f32 %v8858_v41, %v916_v44  ;;  %v12618_v44 = vpack.c.bf16 %v1259_v37, %v1258_v36 }
 0x6e5   :  { %v926_v47 = vmax.f32 %v922_v43, 0.0 }
 0x6e6   :  { %v925_v46 = vmax.f32 %v917_v45, 0.0  ;;  %v12621_v45 = vpack.c.bf16 %v1245_v39, %v1244_v38 }
 0x6e8   :  { %9969 = vmatprep.mubr.msk.f32.mxu1 %vm785_vm3, %v925_v46 }
 0x6e9   :  { %9970 = vmatmul.mubr.msk.f32.vlgmr.msra.gmra.mrb[4].mxu1 %vm785_vm3, %v926_v47  ;;  %v1246_v47 = vld [vmem:[%s14547_s29 + $0x30] sm:$0xff] }
 0x7bc   :  { %v9971_v54 = vpop.f32.mrb[4].mxu1 }
 0x7bd   :  { %v12520_v56 = vadd.f32 %v9971_v54, %v8861_v50  ;;  %v1010_v57 = vpop.f32.mrb[5].mxu1  ;;  %v1388_v54 = vsel %vm498_vm2, %v12562_v9, 0.0 }
 0x7be   :  { %v1011_v61 = vadd.f32 %v8861_v50, %v1010_v57  ;;  %v12635_v57 = vpack.c.bf16 %v1247_v49, %v1246_v47 }
 0x7bf   :  { %1023 = vrot.lane.b32.xlu1 %v12520_v56, %s12241_s21 }
 0x7c0   :  { %v11098_v1 = vpack.c.bf16 %v12520_v56, %v1011_v61  ;;  %1021 = vrot.lane.b32.xlu0 %v1011_v61, %s12241_s21  ;;  %9976 = vmatprep.mubr.msk.f32.mxu0 %vm1025_vm6, %v1011_v61  ;;  %v1248_v61 = vld [vmem:[%s14547_s29 + $0x40] sm:$0xff] }
 0x7c1   :  { %v12647_v4 = vpack.c.bf16 %v1249_v62, %v1248_v61 }
 0x7c2   :  { %11100 = vmatprep.subr.msk.bf16.mxu1 %vm12531_vm7, %v11098_v1 }
 0x7c3   :  { %11103 = vmatpush3.bf16.xpose.msk.msra.mxu1 %vm12531_vm7, %v11098_v1  ;;  %1361 = vrot.lane.b32.xlu1 %v1353_v0, %s12242_s25 }
 0x7c4   :  { %1373 = vrot.lane.b32.xlu0 %v1353_v0, %s12243_s3  ;;  %11125 = vmatprep.subr.bf16.mxu1 %v12540_v3 }
 0x7c7   :  { %1363 = vrot.lane.b32.xlu1 %v1354_v6, %s12242_s25 }
 0x7c8   :  { %1365 = vrot.lane.b32.xlu0 %v1355_v7, %s12242_s25 }
 0x7cb   :  { %1375 = vrot.lane.b32.xlu1 %v1354_v6, %s12243_s3 }
 0x7cc   :  { %1377 = vrot.lane.b32.xlu0 %v1355_v7, %s12243_s3 }
 0x7cf   :  { %1367 = vrot.lane.b32.xlu1 %v1356_v10, %s12242_s25 }
 0x7d3   :  { %1379 = vrot.lane.b32.xlu1 %v1356_v10, %s12243_s3 }
 0x831   :  { %v1024_v15 = vpop.permute.xlu1 %1023 }
 0x832   :  { %v1022_v16 = vpop.permute.xlu0 %1021 }
 0x833   :  { %v11092_v18 = vpack.c.bf16 %v1024_v15, %v1022_v16  ;;  %9983 = vmatprep.mubr.msk.f32.mxu1 %vm1025_vm6, %v1022_v16 }
 0x834   :  { %9984 = vmatmul.mubr.msk.f32.vlgmr.msra.gmra.mrb[6].mxu1 %vm1025_vm6, %v1024_v15 }
 0x835   :  { %11094 = vmatprep.subr.msk.bf16.mxu0 %vm12531_vm7, %v11092_v18  ;;  %11127 = vmatpush3.bf16.msra.mxu1 %v12540_v3  ;;  %v1362_v23 = vpop.permute.xlu1 %1361 }
 0x836   :  { %11097 = vmatpush3.bf16.xpose.msk.msra.mxu0 %vm12531_vm7, %v11092_v18  ;;  %11129 = vmatprep.subr.bf16.mxu1 %v12573_v17  ;;  %v1389_v25 = vsel %vm785_vm3, %v1385_v22, %v1362_v23  ;;  %v1374_v26 = vpop.permute.xlu0 %1373 }
 0x837   :  { %11105 = vmatprep.subr.bf16.mxu0 %v12576_v19  ;;  %v1394_v27 = vsel %vm1393_vm8, %v1389_v25, 0.0 }
 0x838   :  { %v1399_v32 = vsel %vm1398_vm9, %v1394_v27, %v1374_v26 }
 0x839   :  { %11131 = vmatpush3.bf16.msra.mxu1 %v12573_v17  ;;  %v1364_v33 = vpop.permute.xlu1 %1363  ;;  %10032 = vmatprep.mubr.msk.f32.mxu1 %vm1409_vm10, %v1399_v32 }
 0x83a   :  { %11133 = vmatprep.subr.bf16.mxu1 %v12588_v24  ;;  %v1366_v43 = vpop.permute.xlu0 %1365  ;;  %v1390_v46 = vsel %vm785_vm3, %v1386_v40, %v1364_v33  ;;  %v12676_v40 = vld [vmem:[%s14548_s8] ss:$0 sm:$0xff] }
 0x83b   :  { %v1391_v50 = vsel %vm785_vm3, %v1387_v42, %v1366_v43 }
 0x83c   :  { %v1396_v58 = vsel %vm1393_vm8, %v1391_v50, 0.0 }
 0x83d   :  { %9977 = vmatmul.mubr.msk.f32.vlgmr.msra.gmra.mrb[12].mxu0 %vm1025_vm6, %v12520_v56  ;;  %11135 = vmatpush3.bf16.msra.mxu1 %v12588_v24  ;;  %v1376_v41 = vpop.permute.xlu1 %1375  ;;  %v1395_v56 = vsel %vm1393_vm8, %v1390_v46, 0.0 }
 0x83e   :  { %11107 = vmatpush3.bf16.msra.mxu0 %v12576_v19  ;;  %11137 = vmatprep.subr.bf16.mxu1 %v12601_v34  ;;  %v1378_v60 = vpop.permute.xlu0 %1377  ;;  %v1400_v63 = vsel %vm1398_vm9, %v1395_v56, %v1376_v41 }
 0x83f   :  { %11109 = vmatprep.subr.bf16.mxu0 %v12603_v35  ;;  %10006 = vmatprep.mubr.msk.f32.mxu0 %vm1409_vm10, %v1399_v32  ;;  %v1401_v1 = vsel %vm1398_vm9, %v1396_v58, %v1378_v60 }
 0x841   :  { %11139 = vmatpush3.bf16.msra.mxu1 %v12601_v34  ;;  %v1368_v55 = vpop.permute.xlu1 %1367 }
 0x842   :  { %11111 = vmatpush3.bf16.msra.mxu0 %v12603_v35  ;;  %11141 = vmatprep.subr.bf16.mxu1 %v12618_v44  ;;  %v1392_v59 = vsel %vm785_vm3, %v1388_v54, %v1368_v55 }
 0x843   :  { %11113 = vmatprep.subr.bf16.mxu0 %v12621_v45  ;;  %v1397_v0 = vsel %vm1393_vm8, %v1392_v59, 0.0 }
 0x845   :  { %11143 = vmatpush3.bf16.msra.mxu1 %v12618_v44  ;;  %v1380_v2 = vpop.permute.xlu1 %1379 }
 0x846   :  { %11115 = vmatpush3.bf16.msra.mxu0 %v12621_v45  ;;  %v1402_v6 = vsel %vm1398_vm9, %v1397_v0, %v1380_v2 }
 0x847   :  { %11117 = vmatprep.subr.bf16.mxu0 %v12635_v57 }
 0x848   :  { %10033 = vmatmul.mubr.msk.f32.vlgmr.msra.gmra.mrb[8].mxu1 %vm1409_vm10, %v1400_v63 }
 0x849   :  { %10035 = vmatprep.mubr.msk.f32.mxu1 %vm1409_vm10, %v1401_v1 }
 0x84a   :  { %11119 = vmatpush3.bf16.msra.mxu0 %v12635_v57 }
 0x84b   :  { %11121 = vmatprep.subr.bf16.mxu0 %v12647_v4 }
 0x84c   :  { %10036 = vmatmul.mubr.msk.f32.gmra.mrb[10].mxu1 %vm1409_vm10, %v1402_v6 }
 0x84e   :  { %11123 = vmatpush3.bf16.msra.mxu0 %v12647_v4 }
 0x851   :  { %10007 = vmatmul.mubr.msk.f32.vlgmr.msra.gmra.mrb[14].mxu0 %vm1409_vm10, %v1400_v63 }
 0x852   :  { %10009 = vmatprep.mubr.msk.f32.mxu0 %vm1409_vm10, %v1401_v1 }
 0x855   :  { %10010 = vmatmul.mubr.msk.f32.gmra.mrb[16].mxu0 %vm1409_vm10, %v1402_v6 }
 0x907   :  { %v9985_v7 = vpop.f32.mrb[6].mxu1 }
 0x908   :  { %v1187_v8 = vsel %vm498_vm2, %v9985_v7, 0.0  ;;  %v1175_v9 = vpop.f32.mrb[7].mxu1 }
 0x909   :  { %v1186_v10 = vsel %vm498_vm2, %v1175_v9, 0.0 }
 0x90a   :  { %v1188_v11 = vadd.f32 %v1187_v8, %v1186_v10 }
 0x90c   :  { %v1189_v12 = vrot.slane %v1188_v11, 4 }
 0x90e   :  { %v1190_v13 = vadd.f32 %v1189_v12, %v1188_v11 }
 0x910   :  { %v1191_v14 = vrot.slane %v1190_v13, 2  ;;  %v9978_v15 = vpop.f32.mrb[12].mxu0 }
 0x911   :  { %1185 = vst.msk [vmem:[#allocation3 + $0x8] sm:$0xff] %vm498_vm2, %v9978_v15  ;;  %v1196_v16 = vsel %vm498_vm2, %v9978_v15, 0.0  ;;  %v1100_v18 = vpop.f32.mrb[13].mxu0 }
 0x912   :  { %v1192_v20 = vadd.f32 %v1191_v14, %v1190_v13  ;;  %1184 = vst.msk [vmem:[#allocation3] sm:$0xff] %vm498_vm2, %v1100_v18  ;;  %v1195_v21 = vsel %vm498_vm2, %v1100_v18, 0.0 }
 0x913   :  { %v1197_v22 = vadd.f32 %v1196_v16, %v1195_v21 }
 0x914   :  { %v1193_v23 = vrot.slane %v1192_v20, 1 }
 0x915   :  { %v1198_v25 = vrot.slane %v1197_v22, 4 }
 0x916   :  { %v1194_v26 = vadd.f32 %v1193_v23, %v1192_v20 }
 0x917   :  { %v1199_v27 = vadd.f32 %v1198_v25, %v1197_v22 }
 0x918   :  { %vm1204_vm11 = vcmp.ne.f32.partialorder %v1194_v26, 0.0 }
 0x919   :  { %v1205_v28 = vsel %vm1204_vm11, %v1194_v26, 1.0  ;;  %v1200_v29 = vrot.slane %v1199_v27, 2  ;;  %v1260_v26 = vld [vmem:[%s14549_s14] sm:$0xff] }
 0x91a   :  { %11931 = vrcp.f32 %v1205_v28  ;;  %v1262_v28 = vld [vmem:[%s14549_s14 + $0x10] sm:$0xff] }
 0x91b   :  { %v1201_v30 = vadd.f32 %v1200_v29, %v1199_v27  ;;  %v12666_v31 = vpop.f32.mrb[8].mxu1  ;;  %v1261_v27 = vld [vmem:[%s14549_s14 + $0x8] sm:$0xff] }
 0x91c   :  { %v12668_v32 = vpop.f32.mrb[9].mxu1 }
 0x91d   :  { %v1202_v33 = vrot.slane %v1201_v30, 1 }
 0x91f   :  { %v1203_v36 = vadd.f32 %v1202_v33, %v1201_v30  ;;  %v12670_v37 = vpop.f32.mrb[10].mxu1  ;;  %v12703_v30 = vpack.c.bf16 %v1261_v27, %v1260_v26  ;;  %v1263_v33 = vld [vmem:[%s14549_s14 + $0x18] sm:$0xff] }
 0x920   :  { %v12672_v38 = vpop.f32.mrb[11].mxu1 }
 0x921   :  { %vm1206_vm12 = vcmp.ne.f32.partialorder %v1203_v36, 0.0  ;;  %11145 = vmatprep.subr.bf16.mxu0 %v12703_v30 }
 0x922   :  { %v1207_v39 = vsel %vm1206_vm12, %v1203_v36, 1.0  ;;  %v12707_v36 = vpack.c.bf16 %v1263_v33, %v1262_v28  ;;  %11147 = vmatpush3.bf16.msra.mxu0 %v12703_v30 }
 0x923   :  { %11933 = vrcp.f32 %v1207_v39  ;;  %v1264_v39 = vld [vmem:[%s14549_s14 + $0x20] sm:$0xff] }
 0x924   :  { %v11932_v41 = vpop.eup %11931  ;;  %v10008_v42 = vpop.f32.mrb[14].mxu0  ;;  %11149 = vmatprep.subr.bf16.mxu0 %v12707_v36 }
 0x925   :  { %v1209_v43 = vsel %vm1204_vm11, %v11932_v41, 0.0  ;;  %v1494_v46 = vadd.f32 %v10008_v42, %v12676_v40  ;;  %v1488_v47 = vpop.f32.mrb[15].mxu0  ;;  %v1265_v41 = vld [vmem:[%s14549_s14 + $0x28] sm:$0xff] }
 0x926   :  { %v12680_v49 = vmul.f32 %v1209_v43, %v1175_v9  ;;  %v12682_v50 = vmul.f32 %v9985_v7, %v1209_v43  ;;  %v1489_v54 = vadd.f32 %v12676_v40, %v1488_v47  ;;  %v12715_v42 = vpack.c.bf16 %v1265_v41, %v1264_v39  ;;  %v1266_v43 = vld [vmem:[%s14549_s14 + $0x30] sm:$0xff]  ;;  %11151 = vmatpush3.bf16.msra.mxu0 %v12707_v36 }
 0x927   :  { %v8878_v55 = vmul.f32 -1.442695, %v1494_v46  ;;  %v1267_v46 = vld [vmem:[%s14549_s14 + $0x38] sm:$0xff] }
 0x928   :  { %v12687_v56 = vsel %vm498_vm2, %v12680_v49, 0.0  ;;  %v8877_v58 = vmul.f32 -1.442695, %v1489_v54  ;;  %v10011_v59 = vpop.f32.mrb[16].mxu0  ;;  %11153 = vmatprep.subr.bf16.mxu0 %v12715_v42  ;;  %v12721_v47 = vpack.c.bf16 %v1267_v46, %v1266_v43  ;;  %v1268_v54 = vld [vmem:[%s14549_s14 + $0x40] sm:$0xff] }
 0x929   :  { %11935 = vpow2.f32 %v8878_v55  ;;  %v1504_v60 = vadd.f32 %v10011_v59, %v12676_v40  ;;  %10072 = vmatprep.mubr.msk.f32.mxu1 %vm785_vm3, %v12687_v56  ;;  %v1498_v61 = vpop.f32.mrb[17].mxu0  ;;  %v1269_v55 = vld [vmem:[%s14549_s14 + $0x48] sm:$0xff] }
 0x92a   :  { %11937 = vpow2.f32 %v8877_v58  ;;  %v1499_v62 = vadd.f32 %v12676_v40, %v1498_v61  ;;  %11155 = vmatpush3.bf16.msra.mxu0 %v12715_v42  ;;  %v12728_v58 = vpack.c.bf16 %v1269_v55, %v1268_v54 }
 0x92b   :  { %v8880_v63 = vmul.f32 -1.442695, %v1504_v60  ;;  %11157 = vmatprep.subr.bf16.mxu0 %v12721_v47 }
 0x92c   :  { %v8879_v0 = vmul.f32 -1.442695, %v1499_v62 }
 0x92d   :  { %v11934_v1 = vpop.eup %11933  ;;  %11939 = vpow2.f32 %v8880_v63 }
 0x92e   :  { %v1211_v2 = vsel %vm1206_vm12, %v11934_v1, 0.0  ;;  %11941 = vpow2.f32 %v8879_v0  ;;  %11159 = vmatpush3.bf16.msra.mxu0 %v12721_v47 }
 0x92f   :  { %v12694_v6 = vmul.f32 %v1211_v2, %v1100_v18  ;;  %v12696_v7 = vmul.f32 %v9978_v15, %v1211_v2  ;;  %11161 = vmatprep.subr.bf16.mxu0 %v12728_v58 }
 0x932   :  { %11163 = vmatpush3.bf16.msra.mxu0 %v12728_v58 }
 0x933   :  { %v11936_v8 = vpop.eup %11935 }
 0x934   :  { %v11938_v9 = vpop.eup %11937  ;;  %v1520_v10 = vadd.f32 1.0, %v11936_v8 }
 0x935   :  { %v1519_v11 = vadd.f32 1.0, %v11938_v9 }
 0x936   :  { %11943 = vrcp.f32 %v1520_v10 }
 0x937   :  { %11945 = vrcp.f32 %v1519_v11  ;;  %v11940_v12 = vpop.eup %11939 }
 0x938   :  { %v11942_v13 = vpop.eup %11941  ;;  %v1522_v14 = vadd.f32 1.0, %v11940_v12 }
 0x939   :  { %v1521_v16 = vadd.f32 1.0, %v11942_v13 }
 0x93a   :  { %11947 = vrcp.f32 %v1522_v14 }
 0x93b   :  { %11949 = vrcp.f32 %v1521_v16 }
 0x940   :  { %v11944_v18 = vpop.eup %11943 }
 0x941   :  { %v11946_v15 = vpop.eup %11945  ;;  %v1647_v20 = vmul.f32 0.0, %v11944_v18 }
 0x942   :  { %v1646_v21 = vmul.f32 0.0, %v11946_v15 }
 0x943   :  { %1656 = vrot.lane.b32.xlu1 %v1647_v20, %s12244_s19 }
 0x944   :  { %1654 = vrot.lane.b32.xlu0 %v1646_v21, %s12244_s19  ;;  %v11948_v22 = vpop.eup %11947 }
 0x945   :  { %v11950_v23 = vpop.eup %11949  ;;  %v1649_v25 = vmul.f32 0.0, %v11948_v22 }
 0x946   :  { %v1648_v29 = vmul.f32 0.0, %v11950_v23 }
 0x947   :  { %1660 = vrot.lane.b32.xlu1 %v1649_v25, %s12244_s19 }
 0x948   :  { %1658 = vrot.lane.b32.xlu0 %v1648_v29, %s12244_s19 }
 0x9b5   :  { %v1657_v59 = vpop.permute.xlu1 %1656 }
 0x9b6   :  { %v1667_v60 = vsel %vm1343_vm4, %v12514_v52, %v1657_v59  ;;  %v1655_v61 = vpop.permute.xlu0 %1654 }
 0x9b7   :  { %v1671_v62 = vsel %vm1348_vm5, %v1667_v60, 0.0  ;;  %v1666_v63 = vsel %vm1343_vm4, %v12508_v48, %v1655_v61  ;;  %v12773_v61 = vsel %vm498_vm2, %v12694_v6, 0.0 }
 0x9b8   :  { %v1675_v0 = vsub.f32 0.0, %v1671_v62  ;;  %v1670_v1 = vsel %vm1348_vm5, %v1666_v63, 0.0  ;;  %v1707_v16 = vsel %vm498_vm2, %v1671_v62, 0.0  ;;  %v12779_v62 = vld [vmem:[%s14550_s24] ss:$0 sm:$0xff] }
 0x9b9   :  { %v1674_v2 = vsub.f32 0.0, %v1670_v1  ;;  %v1661_v8 = vpop.permute.xlu1 %1660  ;;  %v1706_v14 = vsel %vm498_vm2, %v1670_v1, 0.0  ;;  %v1609_v63 = vadd.f32 %v12666_v31, %v12779_v62 }
 0x9ba   :  { %1684 = vrot.lane.b32.xlu1 %v1675_v0, %s12242_s25  ;;  %v1669_v9 = vsel %vm1343_vm4, %v12548_v5, %v1661_v8  ;;  %v1659_v10 = vpop.permute.xlu0 %1658  ;;  %v1619_v8 = vadd.f32 %v12670_v37, %v12779_v62 }
 0x9bb   :  { %1682 = vrot.lane.b32.xlu0 %v1674_v2, %s12242_s25  ;;  %v1673_v52 = vsel %vm1348_vm5, %v1669_v9, 0.0  ;;  %v1668_v11 = vsel %vm1343_vm4, %v12517_v53, %v1659_v10  ;;  %v8887_v1 = vmul.f32 -1.442695, %v1609_v63  ;;  %v1614_v9 = vadd.f32 %v12779_v62, %v12672_v38 }
 0x9bc   :  { %v1672_v48 = vsel %vm1348_vm5, %v1668_v11, 0.0  ;;  %v1677_v12 = vsub.f32 0.0, %v1673_v52  ;;  %v1709_v33 = vsel %vm498_vm2, %v1673_v52, 0.0  ;;  %v8889_v10 = vmul.f32 -1.442695, %v1619_v8 }
 0x9bd   :  { %v1676_v13 = vsub.f32 0.0, %v1672_v48  ;;  %v1708_v28 = vsel %vm498_vm2, %v1672_v48, 0.0  ;;  %11951 = vpow2.f32 %v8887_v1  ;;  %v8888_v52 = vmul.f32 -1.442695, %v1614_v9 }
 0x9be   :  { %1696 = vrot.lane.b32.xlu1 %v1675_v0, %s12243_s3  ;;  %v1604_v0 = vadd.f32 %v12779_v62, %v12668_v32 }
 0x9bf   :  { %1694 = vrot.lane.b32.xlu0 %v1674_v2, %s12243_s3 }
 0x9c0   :  { %v8886_v2 = vmul.f32 -1.442695, %v1604_v0 }
 0x9c2   :  { %1688 = vrot.lane.b32.xlu1 %v1677_v12, %s12242_s25  ;;  %11953 = vpow2.f32 %v8886_v2 }
 0x9c3   :  { %1686 = vrot.lane.b32.xlu0 %v1676_v13, %s12242_s25  ;;  %11955 = vpow2.f32 %v8889_v10 }
 0x9c4   :  { %11957 = vpow2.f32 %v8888_v52 }
 0x9c6   :  { %1700 = vrot.lane.b32.xlu1 %v1677_v12, %s12243_s3 }
 0x9c7   :  { %1698 = vrot.lane.b32.xlu0 %v1676_v13, %s12243_s3  ;;  %v11952_v11 = vpop.eup %11951  ;;  %v12790_v13 = vld [vmem:[%s14551_s30] ss:$0 sm:$0xff] }
 0x9c8   :  { %v1635_v48 = vadd.f32 1.0, %v11952_v11 }
 0x9ca   :  { %11959 = vrcp.f32 %v1635_v48  ;;  %v12824_v48 = vld [vmem:[%s14542_s9 + $0x20] sm:$0xff] }
 0x9cc   :  { %v11954_v31 = vpop.eup %11953 }
 0x9cd   :  { %v1634_v12 = vadd.f32 1.0, %v11954_v31  ;;  %v11956_v32 = vpop.eup %11955  ;;  %v12821_v31 = vld [vmem:[%s14542_s9 + $0x28] sm:$0xff] }
 0x9cf   :  { %11961 = vrcp.f32 %v1634_v12 }
 0xa2c   :  { %v1685_v5 = vpop.permute.xlu1 %1684 }
 0xa2d   :  { %v1683_v53 = vpop.permute.xlu0 %1682  ;;  %v1711_v15 = vsel %vm785_vm3, %v1707_v16, %v1685_v5  ;;  %v1637_v16 = vadd.f32 1.0, %v11956_v32 }
 0xa2e   :  { %v1710_v18 = vsel %vm785_vm3, %v1706_v14, %v1683_v53  ;;  %v1715_v23 = vsel %vm1393_vm8, %v1711_v15, 0.0  ;;  %v11958_v14 = vpop.eup %11957 }
 0xa2f   :  { %v1714_v21 = vsel %vm1393_vm8, %v1710_v18, 0.0  ;;  %v1636_v18 = vadd.f32 1.0, %v11958_v14 }
 0xa30   :  { %v1697_v20 = vpop.permute.xlu1 %1696 }
 0xa31   :  { %v1695_v22 = vpop.permute.xlu0 %1694  ;;  %v1719_v26 = vsel %vm1398_vm9, %v1715_v23, %v1697_v20  ;;  %v11960_v20 = vpop.eup %11959 }
 0xa32   :  { %v1718_v25 = vsel %vm1398_vm9, %v1714_v21, %v1695_v22  ;;  %v11962_v23 = vpop.eup %11961 }
 0xa33   :  { %10058 = vmatprep.mubr.msk.f32.mxu0 %vm1409_vm10, %v1718_v25 }
 0xa34   :  { %v1689_v27 = vpop.permute.xlu1 %1688  ;;  %10059 = vmatmul.mubr.msk.f32.vlgmr.msra.gmra.mrb[18].mxu0 %vm1409_vm10, %v1719_v26  ;;  %v1834_v26 = vsub.f32 1.0, %v11960_v20 }
 0xa35   :  { %v1687_v29 = vpop.permute.xlu0 %1686  ;;  %v1713_v41 = vsel %vm785_vm3, %v1709_v33, %v1689_v27  ;;  %v1830_v33 = vmul.f32 0.0, %v11960_v20 }
 0xa36   :  { %v1712_v39 = vsel %vm785_vm3, %v1708_v28, %v1687_v29  ;;  %v1717_v55 = vsel %vm1393_vm8, %v1713_v41, 0.0  ;;  %v1833_v28 = vsub.f32 1.0, %v11962_v23  ;;  %v1829_v41 = vmul.f32 0.0, %v11962_v23 }
 0xa37   :  { %v1716_v46 = vsel %vm1393_vm8, %v1712_v39, 0.0 }
 0xa38   :  { %v1701_v43 = vpop.permute.xlu1 %1700 }
 0xa39   :  { %v1699_v54 = vpop.permute.xlu0 %1698  ;;  %v1721_v60 = vsel %vm1398_vm9, %v1717_v55, %v1701_v43 }
 0xa3a   :  { %v1720_v59 = vsel %vm1398_vm9, %v1716_v46, %v1699_v54 }
 0xa3b   :  { %10061 = vmatprep.mubr.msk.f32.mxu0 %vm1409_vm10, %v1720_v59 }
 0xa3c   :  { %10062 = vmatmul.mubr.msk.f32.gmra.mrb[20].mxu0 %vm1409_vm10, %v1721_v60 }
 0xa3d   :  { %10114 = vmatprep.mubr.msk.f32.mxu0 %vm785_vm3, %v12773_v61 }
 0xb07   :  { %v10060_v5 = vpop.f32.mrb[18].mxu0 }
 0xb08   :  { %v1812_v37 = vadd.f32 %v10060_v5, %v12790_v13  ;;  %v1806_v53 = vpop.f32.mrb[19].mxu0 }
 0xb09   :  { %v1807_v38 = vadd.f32 %v12790_v13, %v1806_v53  ;;  %v12850_v53 = vld [vmem:[%s14542_s9 + $0x30] sm:$0xff] }
 0xb0a   :  { %11963 = vtanh.f32 %v1812_v37  ;;  %v12847_v37 = vld [vmem:[%s14542_s9 + $0x38] sm:$0xff] }
 0xb0b   :  { %11965 = vtanh.f32 %v1807_v38 }
 0xb0c   :  { %11967 = vrcp.f32 %v1637_v16 }
 0xb0d   :  { %11969 = vrcp.f32 %v1636_v18 }
 0xb0f   :  { %v10063_v15 = vpop.f32.mrb[20].mxu0 }
 0xb10   :  { %v1822_v21 = vadd.f32 %v10063_v15, %v12790_v13  ;;  %v1816_v22 = vpop.f32.mrb[21].mxu0 }
 0xb11   :  { %v1817_v25 = vadd.f32 %v12790_v13, %v1816_v22  ;;  %v12868_v22 = vsel %vm498_vm2, %v12682_v50, 0.0 }
 0xb12   :  { %11971 = vtanh.f32 %v1822_v21 }
 0xb13   :  { %11973 = vtanh.f32 %v1817_v25 }
 0xb14   :  { %v11964_v27 = vpop.eup %11963 }
 0xb15   :  { %v11966_v29 = vpop.eup %11965  ;;  %v1838_v39 = vmul.f32 %v11964_v27, %v1834_v26 }
 0xb16   :  { %v1837_v43 = vmul.f32 %v11966_v29, %v1833_v28  ;;  %v11968_v54 = vpop.eup %11967 }
 0xb17   :  { %v12796_v46 = vadd.f32 %v1838_v39, %v1830_v33  ;;  %v11970_v59 = vpop.eup %11969  ;;  %v1836_v60 = vsub.f32 1.0, %v11968_v54  ;;  %v1832_v2 = vmul.f32 0.0, %v11968_v54 }
 0xb18   :  { %v12798_v55 = vadd.f32 %v1837_v43, %v1829_v41  ;;  %v1835_v0 = vsub.f32 1.0, %v11970_v59  ;;  %v1831_v9 = vmul.f32 0.0, %v11970_v59  ;;  %v12907_v43 = vsel %vm498_vm2, %v12696_v7, 0.0 }
 0xb19   :  { %1856 = vrot.lane.b32.xlu1 %v12796_v46, %s12244_s19 }
 0xb1a   :  { %1854 = vrot.lane.b32.xlu0 %v12798_v55, %s12244_s19 }
 0xb1c   :  { %v11972_v63 = vpop.eup %11971 }
 0xb1d   :  { %v11974_v1 = vpop.eup %11973  ;;  %v1840_v8 = vmul.f32 %v11972_v63, %v1836_v60 }
 0xb1e   :  { %v1839_v10 = vmul.f32 %v11974_v1, %v1835_v0 }
 0xb1f   :  { %v12804_v52 = vadd.f32 %v1840_v8, %v1832_v2 }
 0xb20   :  { %v12806_v11 = vadd.f32 %v1839_v10, %v1831_v9 }
 0xb21   :  { %1860 = vrot.lane.b32.xlu1 %v12804_v52, %s12244_s19 }
 0xb22   :  { %1858 = vrot.lane.b32.xlu0 %v12806_v11, %s12244_s19 }
 0xb25   :  { %1222 = vrot.lane.b32.xlu1 %v12682_v50, %s12245_s12 }
 0xb26   :  { %1220 = vrot.lane.b32.xlu0 %v12680_v49, %s12245_s12 }
 0xb29   :  { %1234 = vrot.lane.b32.xlu1 %v12696_v7, %s12245_s12 }
 0xb2a   :  { %1232 = vrot.lane.b32.xlu0 %v12694_v6, %s12245_s12 }
 0xb8b   :  { %v1857_v12 = vpop.permute.xlu1 %1856 }
 0xb8c   :  { %v12828_v32 = vsel %vm1343_vm4, %v12821_v31, %v1857_v12  ;;  %v1855_v5 = vpop.permute.xlu0 %1854 }
 0xb8d   :  { %v12832_v14 = vsel %vm1343_vm4, %v12824_v48, %v1855_v5  ;;  %v12932_v1 = vsel %vm1348_vm5, %v12828_v32, 0.0 }
 0xb8e   :  { %v11164_v6 = vpack.c.bf16 %v12828_v32, %v12832_v14  ;;  %v12936_v8 = vsel %vm1348_vm5, %v12832_v14, 0.0 }
 0xb90   :  { %11166 = vmatprep.subr.msk.bf16.mxu1 %vm12836_vm13, %v11164_v6 }
 0xb91   :  { %11169 = vmatpush3.bf16.msk.msra.mxu1 %vm12836_vm13, %v11164_v6 }
 0xb93   :  { %v1861_v38 = vpop.permute.xlu1 %1860 }
 0xb94   :  { %v12854_v16 = vsel %vm1343_vm4, %v12847_v37, %v1861_v38  ;;  %v1859_v18 = vpop.permute.xlu0 %1858 }
 0xb95   :  { %v12858_v15 = vsel %vm1343_vm4, %v12850_v53, %v1859_v18  ;;  %v12945_v14 = vsel %vm1348_vm5, %v12854_v16, 0.0 }
 0xb96   :  { %v11170_v20 = vpack.c.bf16 %v12854_v16, %v12858_v15 }
 0xb97   :  { %v1223_v23 = vpop.permute.xlu1 %1222 }
 0xb98   :  { %11172 = vmatprep.subr.msk.bf16.mxu1 %vm12836_vm13, %v11170_v20  ;;  %v1221_v21 = vpop.permute.xlu0 %1220  ;;  %v12878_v26 = vsel %vm498_vm2, 0.0, %v1223_v23 }
 0xb99   :  { %11175 = vmatpush3.bf16.msk.msra.mxu1 %vm12836_vm13, %v11170_v20  ;;  %v12871_v25 = vsel %vm498_vm2, 0.0, %v1221_v21  ;;  %v12950_v21 = vsel %vm1348_vm5, %v12858_v15, 0.0 }
 0xb9b   :  { %v1235_v54 = vpop.permute.xlu1 %1234 }
 0xb9c   :  { %10073 = vmatmul.mubr.msk.f32.vlgmr.msra.gmra.mrb[12].mxu1 %vm785_vm3, %v12868_v22  ;;  %v1233_v41 = vpop.permute.xlu0 %1232  ;;  %v12919_v60 = vsel %vm498_vm2, 0.0, %v1235_v54 }
 0xb9d   :  { %10075 = vmatprep.mubr.msk.f32.mxu1 %vm785_vm3, %v12871_v25  ;;  %v12910_v59 = vsel %vm498_vm2, 0.0, %v1233_v41 }
 0xba0   :  { %10076 = vmatmul.mubr.msk.f32.gmra.mrb[14].mxu1 %vm785_vm3, %v12878_v26 }
 0xba1   :  { %10086 = vmatprep.mubr.msk.f32.mxu1 %vm785_vm3, %v12687_v56 }
 0xc6f   :  { %v10074_v50 = vpop.f32.mrb[12].mxu1 }
 0xc70   :  { %v1952_v27 = vpop.f32.mrb[13].mxu1  ;;  %2260 = vrot.lane.b32.xlu1 %v10074_v50, %s12245_s12 }
 0xc71   :  { %v11176_v28 = vpack.c.bf16 %v10074_v50, %v1952_v27  ;;  %2258 = vrot.lane.b32.xlu0 %v1952_v27, %s12245_s12 }
 0xc73   :  { %v10077_v29 = vpop.f32.mrb[14].mxu1  ;;  %11177 = vmatprep.subr.bf16.mxu1 %v11176_v28 }
 0xc74   :  { %v1962_v33 = vpop.f32.mrb[15].mxu1  ;;  %11179 = vmatpush3.bf16.msra.mxu1 %v11176_v28  ;;  %2264 = vrot.lane.b32.xlu1 %v10077_v29, %s12245_s12 }
 0xc75   :  { %v11180_v39 = vpack.c.bf16 %v10077_v29, %v1962_v33 }
 0xc77   :  { %11181 = vmatprep.subr.bf16.mxu1 %v11180_v39 }
 0xc78   :  { %11183 = vmatpush3.bf16.msra.mxu1 %v11180_v39  ;;  %2262 = vrot.lane.b32.xlu1 %v1962_v33, %s12245_s12 }
 0xc79   :  { %11186 = vmatprep.subr.msk.bf16.mxu1 %vm12836_vm13, %v11164_v6 }
 0xc7b   :  { %10087 = vmatmul.mubr.msk.f32.vlgmr.msra.gmra.mrb[16].mxu1 %vm785_vm3, %v12868_v22 }
 0xc7c   :  { %10089 = vmatprep.mubr.msk.f32.mxu1 %vm785_vm3, %v12871_v25  ;;  %11189 = vmatpush3.bf16.msk.msra.mxu1 %vm12836_vm13, %v11164_v6 }
 0xc7d   :  { %11192 = vmatprep.subr.msk.bf16.mxu1 %vm12836_vm13, %v11170_v20 }
 0xc7f   :  { %10090 = vmatmul.mubr.msk.f32.gmra.mrb[18].mxu1 %vm785_vm3, %v12878_v26 }
 0xc80   :  { %11195 = vmatpush3.bf16.msk.msra.mxu1 %vm12836_vm13, %v11170_v20  ;;  %10100 = vmatprep.mubr.msk.f32.mxu1 %vm785_vm3, %v12773_v61 }
 0xc81   :  { %11205 = vmatprep.subr.bf16.mxu1 %v12576_v19 }
 0xc83   :  { %10101 = vmatmul.mubr.msk.f32.vlgmr.msra.gmra.mrb[20].mxu1 %vm785_vm3, %v12907_v43 }
 0xc84   :  { %10103 = vmatprep.mubr.msk.f32.mxu1 %vm785_vm3, %v12910_v59  ;;  %11207 = vmatpush3.bf16.msra.mxu1 %v12576_v19 }
 0xc85   :  { %11209 = vmatprep.subr.bf16.mxu1 %v12603_v35 }
 0xc87   :  { %10104 = vmatmul.mubr.msk.f32.gmra.mrb[22].mxu1 %vm785_vm3, %v12919_v60 }
 0xc88   :  { %11211 = vmatpush3.bf16.msra.mxu1 %v12603_v35 }
 0xc89   :  { %11213 = vmatprep.subr.bf16.mxu1 %v12621_v45 }
 0xc8c   :  { %11215 = vmatpush3.bf16.msra.mxu1 %v12621_v45 }
 0xc8d   :  { %11217 = vmatprep.subr.bf16.mxu1 %v12635_v57 }
 0xc90   :  { %11219 = vmatpush3.bf16.msra.mxu1 %v12635_v57 }
 0xc91   :  { %11221 = vmatprep.subr.bf16.mxu1 %v12647_v4 }
 0xc94   :  { %11223 = vmatpush3.bf16.msra.mxu1 %v12647_v4 }
 0xd4e   :  { %v10088_v7 = vpop.f32.mrb[16].mxu1 }
 0xd4f   :  { %v2057_v63 = vmul.f32 2.0, %v10088_v7  ;;  %v2037_v0 = vpop.f32.mrb[17].mxu1 }
 0xd50   :  { %v2056_v2 = vmul.f32 2.0, %v2037_v0 }
 0xd51   :  { %v2061_v9 = vsub.f32 %v2057_v63, %v12932_v1 }
 0xd52   :  { %v2060_v10 = vsub.f32 %v2056_v2, %v12936_v8  ;;  %v10091_v12 = vpop.f32.mrb[18].mxu1 }
 0xd53   :  { %v2047_v5 = vpop.f32.mrb[19].mxu1  ;;  %2276 = vrot.lane.b32.xlu1 %v2061_v9, %s12242_s25  ;;  %v2059_v6 = vmul.f32 2.0, %v10091_v12  ;;  %v2261_v12 = vpop.permute.xlu1 %2260 }
 0xd54   :  { %2274 = vrot.lane.b32.xlu0 %v2060_v10, %s12242_s25  ;;  %v2058_v38 = vmul.f32 2.0, %v2047_v5  ;;  %v2259_v5 = vpop.permute.xlu0 %2258 }
 0xd55   :  { %v2063_v23 = vsub.f32 %v2059_v6, %v12945_v14 }
 0xd56   :  { %v10102_v18 = vpop.f32.mrb[20].mxu1  ;;  %v2062_v50 = vsub.f32 %v2058_v38, %v12950_v21 }
 0xd57   :  { %2292 = vrot.lane.b32.xlu1 %v10102_v18, %s12246_s20  ;;  %v2142_v32 = vpop.f32.mrb[21].mxu1  ;;  %v2265_v6 = vpop.permute.xlu1 %2264 }
 0xd58   :  { %v11196_v20 = vpack.c.bf16 %v10102_v18, %v2142_v32  ;;  %2290 = vrot.lane.b32.xlu0 %v2142_v32, %s12246_s20 }
 0xd5a   :  { %v10105_v27 = vpop.f32.mrb[22].mxu1  ;;  %11197 = vmatprep.subr.bf16.mxu0 %v11196_v20 }
 0xd5b   :  { %2280 = vrot.lane.b32.xlu1 %v2063_v23, %s12242_s25  ;;  %v2152_v28 = vpop.f32.mrb[23].mxu1  ;;  %11199 = vmatpush3.bf16.msra.mxu0 %v11196_v20  ;;  %v2263_v18 = vpop.permute.xlu1 %2262 }
 0xd5c   :  { %v11200_v29 = vpack.c.bf16 %v10105_v27, %v2152_v28  ;;  %2278 = vrot.lane.b32.xlu0 %v2062_v50, %s12242_s25 }
 0xd5e   :  { %11201 = vmatprep.subr.bf16.mxu0 %v11200_v29 }
 0xd5f   :  { %2296 = vrot.lane.b32.xlu1 %v10105_v27, %s12246_s20  ;;  %11203 = vmatpush3.bf16.msra.mxu0 %v11200_v29 }
 0xd60   :  { %2294 = vrot.lane.b32.xlu0 %v2152_v28, %s12246_s20  ;;  %11225 = vmatprep.subr.bf16.mxu0 %v12540_v3 }
 0xd62   :  { %10115 = vmatmul.mubr.msk.f32.vlgmr.msra.gmra.mrb[22].mxu0 %vm785_vm3, %v12907_v43 }
 0xd63   :  { %10117 = vmatprep.mubr.msk.f32.mxu0 %vm785_vm3, %v12910_v59  ;;  %11227 = vmatpush3.bf16.msra.mxu0 %v12540_v3 }
 0xd64   :  { %11229 = vmatprep.subr.bf16.mxu0 %v12573_v17 }
 0xd66   :  { %10118 = vmatmul.mubr.msk.f32.gmra.mrb[24].mxu0 %vm785_vm3, %v12919_v60 }
 0xd67   :  { %11231 = vmatpush3.bf16.msra.mxu0 %v12573_v17 }
 0xd68   :  { %11233 = vmatprep.subr.bf16.mxu0 %v12588_v24 }
 0xd6b   :  { %11235 = vmatpush3.bf16.msra.mxu0 %v12588_v24 }
 0xd6c   :  { %11237 = vmatprep.subr.bf16.mxu0 %v12601_v34 }
 0xd6f   :  { %11239 = vmatpush3.bf16.msra.mxu0 %v12601_v34 }
 0xd70   :  { %11241 = vmatprep.subr.bf16.mxu0 %v12618_v44 }
 0xd73   :  { %11243 = vmatpush3.bf16.msra.mxu0 %v12618_v44 }
 0xdc5   :  { %v2277_v20 = vpop.permute.xlu1 %2276 }
 0xdc6   :  { %v2275_v38 = vpop.permute.xlu0 %2274 }
 0xdc9   :  { %v2293_v50 = vpop.permute.xlu1 %2292 }
 0xdca   :  { %v2291_v32 = vpop.permute.xlu0 %2290 }
 0xdcd   :  { %v2281_v28 = vpop.permute.xlu1 %2280 }
 0xdce   :  { %v2279_v23 = vpop.permute.xlu0 %2278 }
 0xdd2   :  { %v2295_v27 = vpop.permute.xlu0 %2294 }
 0xe35   :  { %v10116_v16 = vpop.f32.mrb[22].mxu0 }
 0xe36   :  { %v2247_v15 = vmul.f32 2.0, %v10116_v16  ;;  %v2227_v33 = vpop.f32.mrb[23].mxu0  ;;  %v2318_v16 = vsel %vm498_vm2, %v12936_v8, %v2259_v5 }
 0xe37   :  { %v2246_v41 = vmul.f32 2.0, %v2227_v33  ;;  %v2322_v33 = vsel %vm785_vm3, %v2318_v16, %v2275_v38 }
 0xe38   :  { %v2251_v39 = vsub.f32 %v2247_v15, %v12932_v1  ;;  %v2319_v15 = vsel %vm498_vm2, %v12932_v1, %v2261_v12  ;;  %v2321_v1 = vsel %vm498_vm2, %v12945_v14, %v2265_v6 }
 0xe39   :  { %v10119_v54 = vpop.f32.mrb[24].mxu0  ;;  %v2250_v0 = vsub.f32 %v2246_v41, %v12936_v8  ;;  %v2323_v41 = vsel %vm785_vm3, %v2319_v15, %v2277_v20  ;;  %v2325_v12 = vsel %vm785_vm3, %v2321_v1, %v2281_v28 }
 0xe3a   :  { %v2249_v7 = vmul.f32 2.0, %v10119_v54  ;;  %2308 = vrot.lane.b32.xlu0 %v2251_v39, %s12243_s3  ;;  %v2237_v63 = vpop.f32.mrb[25].mxu0  ;;  %v2297_v39 = vpop.permute.xlu1 %2296  ;;  %v2326_v54 = vsel %vm1393_vm8, %v2322_v33, %v2291_v32 }
 0xe3b   :  { %v2248_v9 = vmul.f32 2.0, %v2237_v63  ;;  %v2327_v63 = vsel %vm1393_vm8, %v2323_v41, %v2293_v50  ;;  %v2329_v38 = vsel %vm1393_vm8, %v2325_v12, %v2297_v39 }
 0xe3c   :  { %v2253_v2 = vsub.f32 %v2249_v7, %v12945_v14 }
 0xe3d   :  { %v2252_v10 = vsub.f32 %v2248_v9, %v12950_v21 }
 0xe3e   :  { %2306 = vrot.lane.b32.xlu0 %v2250_v0, %s12243_s3  ;;  %2312 = vrot.lane.b32.xlu1 %v2253_v2, %s12243_s3  ;;  %v2320_v2 = vsel %vm498_vm2, %v12950_v21, %v2263_v18 }
 0xe3f   :  { %v2324_v9 = vsel %vm785_vm3, %v2320_v2, %v2279_v23 }
 0xe40   :  { %v2328_v21 = vsel %vm1393_vm8, %v2324_v9, %v2295_v27 }
 0xe42   :  { %2310 = vrot.lane.b32.xlu0 %v2252_v10, %s12243_s3 }
 0xeac   :  { %v2309_v29 = vpop.permute.xlu0 %2308 }
 0xead   :  { %v2331_v8 = vsel %vm1398_vm9, %v2327_v63, %v2309_v29 }
 0xeb0   :  { %v2307_v7 = vpop.permute.xlu0 %2306  ;;  %v2313_v10 = vpop.permute.xlu1 %2312 }
 0xeb1   :  { %v2330_v0 = vsel %vm1398_vm9, %v2326_v54, %v2307_v7  ;;  %v2333_v32 = vsel %vm1398_vm9, %v2329_v38, %v2313_v10 }
 0xeb2   :  { %10140 = vmatprep.mubr.msk.f32.mxu1 %vm1409_vm10, %v2330_v0  ;;  %10166 = vmatprep.mubr.msk.f32.mxu0 %vm1409_vm10, %v2330_v0 }
 0xeb3   :  { %10141 = vmatmul.mubr.msk.f32.vlgmr.msra.gmra.mrb[24].mxu1 %vm1409_vm10, %v2331_v8  ;;  %10167 = vmatmul.mubr.msk.f32.vlgmr.msra.gmra.mrb[26].mxu0 %vm1409_vm10, %v2331_v8 }
 0xeb4   :  { %v2311_v5 = vpop.permute.xlu0 %2310 }
 0xeb5   :  { %v2332_v18 = vsel %vm1398_vm9, %v2328_v21, %v2311_v5 }
 0xeb6   :  { %10143 = vmatprep.mubr.msk.f32.mxu1 %vm1409_vm10, %v2332_v18  ;;  %10169 = vmatprep.mubr.msk.f32.mxu0 %vm1409_vm10, %v2332_v18 }
 0xeb7   :  { %10144 = vmatmul.mubr.msk.f32.gmra.mrb[26].mxu1 %vm1409_vm10, %v2333_v32  ;;  %10170 = vmatmul.mubr.msk.f32.gmra.mrb[28].mxu0 %vm1409_vm10, %v2333_v32 }
 0xeb8   :  { %10180 = vmatprep.mubr.msk.f32.mxu1 %vm785_vm3, %v12687_v56  ;;  %10194 = vmatprep.mubr.msk.f32.mxu0 %vm785_vm3, %v12687_v56 }
 0xf86   :  { %v10142_v14 = vpop.f32.mrb[24].mxu1  ;;  %v13014_v6 = vpop.f32.mrb[26].mxu0 }
 0xf87   :  { %v2418_v20 = vadd.f32 %v10142_v14, %v12676_v40  ;;  %v2412_v23 = vpop.f32.mrb[25].mxu1  ;;  %v13017_v50 = vpop.f32.mrb[27].mxu0 }
 0xf88   :  { %v2413_v27 = vadd.f32 %v12676_v40, %v2412_v23 }
 0xf89   :  { %v8928_v28 = vmul.f32 -1.442695, %v2418_v20 }
 0xf8a   :  { %v8927_v29 = vmul.f32 -1.442695, %v2413_v27  ;;  %v10145_v16 = vpop.f32.mrb[26].mxu1  ;;  %v13020_v15 = vpop.f32.mrb[28].mxu0 }
 0xf8b   :  { %11975 = vpow2.f32 %v8928_v28  ;;  %v2428_v33 = vadd.f32 %v10145_v16, %v12676_v40  ;;  %v2422_v39 = vpop.f32.mrb[27].mxu1  ;;  %v13023_v41 = vpop.f32.mrb[29].mxu0 }
 0xf8c   :  { %v2423_v54 = vadd.f32 %v12676_v40, %v2422_v39  ;;  %11977 = vpow2.f32 %v8927_v29 }
 0xf8d   :  { %v8930_v7 = vmul.f32 -1.442695, %v2428_v33 }
 0xf8e   :  { %v8929_v63 = vmul.f32 -1.442695, %v2423_v54 }
 0xf8f   :  { %11979 = vpow2.f32 %v8930_v7 }
 0xf90   :  { %11981 = vpow2.f32 %v8929_v63 }
 0xf95   :  { %v11976_v0 = vpop.eup %11975 }
 0xf96   :  { %v2444_v2 = vadd.f32 1.0, %v11976_v0  ;;  %v11978_v8 = vpop.eup %11977 }
 0xf97   :  { %v2443_v1 = vadd.f32 1.0, %v11978_v8 }
 0xf98   :  { %11983 = vrcp.f32 %v2444_v2 }
 0xf99   :  { %v11980_v9 = vpop.eup %11979  ;;  %11985 = vrcp.f32 %v2443_v1 }
 0xf9a   :  { %v2446_v10 = vadd.f32 1.0, %v11980_v9  ;;  %v11982_v12 = vpop.eup %11981 }
 0xf9b   :  { %v2445_v21 = vadd.f32 1.0, %v11982_v12 }
 0xf9c   :  { %11987 = vrcp.f32 %v2446_v10 }
 0xf9d   :  { %11989 = vrcp.f32 %v2445_v21 }
 0xfa2   :  { %v11984_v5 = vpop.eup %11983 }
 0xfa3   :  { %v2565_v40 = vmul.f32 %v11984_v5, %v12796_v46  ;;  %v11986_v38 = vpop.eup %11985 }
 0xfa4   :  { %v2564_v18 = vmul.f32 %v11986_v38, %v12798_v55 }
 0xfa5   :  { %2574 = vrot.lane.b32.xlu1 %v2565_v40, %s12244_s19 }
 0xfa6   :  { %v11988_v32 = vpop.eup %11987  ;;  %2572 = vrot.lane.b32.xlu0 %v2564_v18, %s12244_s19 }
 0xfa7   :  { %v2567_v14 = vmul.f32 %v11988_v32, %v12804_v52  ;;  %v11990_v20 = vpop.eup %11989 }
 0xfa8   :  { %v2566_v23 = vmul.f32 %v11990_v20, %v12806_v11 }
 0xfa9   :  { %2578 = vrot.lane.b32.xlu1 %v2567_v14, %s12244_s19 }
 0xfaa   :  { %2576 = vrot.lane.b32.xlu0 %v2566_v23, %s12244_s19 }
0x1017   :  { %v2575_v27 = vpop.permute.xlu1 %2574 }
0x1018   :  { %v13036_v28 = vsel %vm1343_vm4, %v12821_v31, %v2575_v27  ;;  %v2573_v29 = vpop.permute.xlu0 %2572 }
0x1019   :  { %v13040_v16 = vsel %vm1343_vm4, %v12824_v48, %v2573_v29  ;;  %v2589_v32 = vsel %vm1348_vm5, %v13036_v28, 0.0 }
0x101a   :  { %v11244_v33 = vpack.c.bf16 %v13036_v28, %v13040_v16  ;;  %v2588_v20 = vsel %vm1348_vm5, %v13040_v16, 0.0 }
0x101b   :  { %v2579_v39 = vpop.permute.xlu1 %2578 }
0x101c   :  { %v13046_v54 = vsel %vm1343_vm4, %v12847_v37, %v2579_v39  ;;  %11246 = vmatprep.subr.msk.bf16.mxu1 %vm12836_vm13, %v11244_v33  ;;  %v2577_v7 = vpop.permute.xlu0 %2576 }
0x101d   :  { %v13052_v31 = vsel %vm1343_vm4, %v12850_v53, %v2577_v7  ;;  %11249 = vmatpush3.bf16.msk.msra.mxu1 %vm12836_vm13, %v11244_v33  ;;  %v2591_v7 = vsel %vm1348_vm5, %v13046_v54, 0.0 }
0x101e   :  { %v11250_v48 = vpack.c.bf16 %v13046_v54, %v13052_v31  ;;  %v2590_v28 = vsel %vm1348_vm5, %v13052_v31, 0.0 }
0x1020   :  { %11252 = vmatprep.subr.msk.bf16.mxu1 %vm12836_vm13, %v11250_v48 }
0x1021   :  { %11255 = vmatpush3.bf16.msk.msra.mxu1 %vm12836_vm13, %v11250_v48 }
0x1022   :  { %11266 = vmatprep.subr.msk.bf16.mxu1 %vm12836_vm13, %v11244_v33 }
0x1024   :  { %10181 = vmatmul.mubr.msk.f32.vlgmr.msra.gmra.mrb[28].mxu1 %vm785_vm3, %v12868_v22 }
0x1025   :  { %10183 = vmatprep.mubr.msk.f32.mxu1 %vm785_vm3, %v12871_v25  ;;  %11269 = vmatpush3.bf16.msk.msra.mxu1 %vm12836_vm13, %v11244_v33 }
0x1026   :  { %11272 = vmatprep.subr.msk.bf16.mxu1 %vm12836_vm13, %v11250_v48 }
0x1028   :  { %10184 = vmatmul.mubr.msk.f32.gmra.mrb[30].mxu1 %vm785_vm3, %v12878_v26 }
0x1029   :  { %11275 = vmatpush3.bf16.msk.msra.mxu1 %vm12836_vm13, %v11250_v48  ;;  %10208 = vmatprep.mubr.msk.f32.mxu1 %vm785_vm3, %v12773_v61 }
0x102a   :  { %11285 = vmatprep.subr.bf16.mxu1 %v12703_v30 }
0x102c   :  { %10209 = vmatmul.mubr.msk.f32.vlgmr.msra.gmra.mrb[32].mxu1 %vm785_vm3, %v12907_v43 }
0x102d   :  { %10211 = vmatprep.mubr.msk.f32.mxu1 %vm785_vm3, %v12910_v59  ;;  %11287 = vmatpush3.bf16.msra.mxu1 %v12703_v30 }
0x102e   :  { %11289 = vmatprep.subr.bf16.mxu1 %v12707_v36 }
0x1030   :  { %10212 = vmatmul.mubr.msk.f32.gmra.mrb[34].mxu1 %vm785_vm3, %v12919_v60 }
0x1031   :  { %11291 = vmatpush3.bf16.msra.mxu1 %v12707_v36 }
0x1032   :  { %11293 = vmatprep.subr.bf16.mxu1 %v12715_v42 }
0x1035   :  { %11295 = vmatpush3.bf16.msra.mxu1 %v12715_v42 }
0x1036   :  { %11297 = vmatprep.subr.bf16.mxu1 %v12721_v47 }
0x1039   :  { %11299 = vmatpush3.bf16.msra.mxu1 %v12721_v47 }
0x103a   :  { %11301 = vmatprep.subr.bf16.mxu1 %v12728_v58 }
0x103d   :  { %11303 = vmatpush3.bf16.msra.mxu1 %v12728_v58 }
0x10f7   :  { %v10182_v37 = vpop.f32.mrb[28].mxu1 }
0x10f8   :  { %2954 = vrot.lane.b32.xlu1 %v10182_v37, %s12245_s12  ;;  %v2658_v53 = vpop.f32.mrb[29].mxu1 }
0x10f9   :  { %v11256_v63 = vpack.c.bf16 %v10182_v37, %v2658_v53  ;;  %2952 = vrot.lane.b32.xlu0 %v2658_v53, %s12245_s12 }
0x10fb   :  { %v10185_v0 = vpop.f32.mrb[30].mxu1  ;;  %11257 = vmatprep.subr.bf16.mxu0 %v11256_v63 }
0x10fc   :  { %11259 = vmatpush3.bf16.msra.mxu0 %v11256_v63  ;;  %2958 = vrot.lane.b32.xlu1 %v10185_v0, %s12245_s12  ;;  %v2668_v2 = vpop.f32.mrb[31].mxu1 }
0x10fd   :  { %v11260_v8 = vpack.c.bf16 %v10185_v0, %v2668_v2 }
0x10ff   :  { %11261 = vmatprep.subr.bf16.mxu0 %v11260_v8  ;;  %v10210_v1 = vpop.f32.mrb[32].mxu1 }
0x1100   :  { %2956 = vrot.lane.b32.xlu1 %v2668_v2, %s12245_s12  ;;  %11263 = vmatpush3.bf16.msra.mxu0 %v11260_v8  ;;  %v2836_v9 = vpop.f32.mrb[33].mxu1 }
0x1101   :  { %v11276_v10 = vpack.c.bf16 %v10210_v1, %v2836_v9  ;;  %2984 = vrot.lane.b32.xlu0 %v2836_v9, %s12246_s20 }
0x1103   :  { %10195 = vmatmul.mubr.msk.f32.vlgmr.msra.gmra.mrb[30].mxu0 %vm785_vm3, %v12868_v22  ;;  %v10213_v12 = vpop.f32.mrb[34].mxu1  ;;  %11277 = vmatprep.subr.bf16.mxu0 %v11276_v10 }
0x1104   :  { %2986 = vrot.lane.b32.xlu1 %v10210_v1, %s12246_s20  ;;  %10197 = vmatprep.mubr.msk.f32.mxu0 %vm785_vm3, %v12871_v25  ;;  %v2846_v21 = vpop.f32.mrb[35].mxu1 }
0x1105   :  { %v11280_v5 = vpack.c.bf16 %v10213_v12, %v2846_v21  ;;  %11279 = vmatpush3.bf16.msra.mxu0 %v11276_v10  ;;  %2988 = vrot.lane.b32.xlu0 %v2846_v21, %s12246_s20 }
0x1107   :  { %10198 = vmatmul.mubr.msk.f32.gmra.mrb[32].mxu0 %vm785_vm3, %v12878_v26  ;;  %11281 = vmatprep.subr.bf16.mxu0 %v11280_v5 }
0x1108   :  { %2990 = vrot.lane.b32.xlu1 %v10213_v12, %s12246_s20  ;;  %10222 = vmatprep.mubr.msk.f32.mxu0 %vm785_vm3, %v12773_v61 }
0x1109   :  { %11283 = vmatpush3.bf16.msra.mxu0 %v11280_v5 }
0x110c   :  { %10223 = vmatmul.mubr.msk.f32.vlgmr.msra.gmra.mrb[34].mxu0 %vm785_vm3, %v12907_v43 }
0x110d   :  { %10225 = vmatprep.mubr.msk.f32.mxu0 %vm785_vm3, %v12910_v59 }
0x1110   :  { %10226 = vmatmul.mubr.msk.f32.gmra.mrb[36].mxu0 %vm785_vm3, %v12919_v60 }
0x1111   :  { %10262 = vmatprep.mubr.msk.f32.mxu0 %vm785_vm3, %v12687_v56 }
0x116a   :  { %v2955_v5 = vpop.permute.xlu1 %2954 }
0x11d6   :  { %v10196_v40 = vpop.f32.mrb[30].mxu0 }
0x11d7   :  { %v2763_v38 = vmul.f32 2.0, %v10196_v40  ;;  %v2743_v18 = vpop.f32.mrb[31].mxu0  ;;  %v2959_v40 = vpop.permute.xlu1 %2958 }
0x11d8   :  { %v2762_v14 = vmul.f32 2.0, %v2743_v18 }
0x11d9   :  { %v2767_v23 = vsub.f32 %v2763_v38, %v2589_v32  ;;  %v2953_v38 = vpop.permute.xlu0 %2952 }
0x11da   :  { %v2766_v27 = vsub.f32 %v2762_v14, %v2588_v20  ;;  %v10199_v29 = vpop.f32.mrb[32].mxu0 }
0x11db   :  { %v2765_v33 = vmul.f32 2.0, %v10199_v29  ;;  %2970 = vrot.lane.b32.xlu1 %v2767_v23, %s12242_s25  ;;  %v2753_v39 = vpop.f32.mrb[33].mxu0  ;;  %v2957_v18 = vpop.permute.xlu1 %2956 }
0x11dc   :  { %v2764_v48 = vmul.f32 2.0, %v2753_v39  ;;  %2968 = vrot.lane.b32.xlu0 %v2766_v27, %s12242_s25 }
0x11dd   :  { %v2769_v37 = vsub.f32 %v2765_v33, %v2591_v7  ;;  %v2985_v14 = vpop.permute.xlu0 %2984 }
0x11de   :  { %v2768_v53 = vsub.f32 %v2764_v48, %v2590_v28 }
0x11df   :  { %v10224_v63 = vpop.f32.mrb[34].mxu0  ;;  %2974 = vrot.lane.b32.xlu1 %v2769_v37, %s12242_s25  ;;  %v2987_v23 = vpop.permute.xlu1 %2986  ;;  %v3012_v37 = vsel %vm498_vm2, %v2588_v20, %v2953_v38 }
0x11e0   :  { %v2941_v16 = vmul.f32 2.0, %v10224_v63  ;;  %v2921_v0 = vpop.f32.mrb[35].mxu0  ;;  %2972 = vrot.lane.b32.xlu0 %v2768_v53, %s12242_s25  ;;  %v3013_v63 = vsel %vm498_vm2, %v2589_v32, %v2955_v5 }
0x11e1   :  { %v2940_v8 = vmul.f32 2.0, %v2921_v0  ;;  %v2989_v27 = vpop.permute.xlu0 %2988 }
0x11e2   :  { %v2945_v2 = vsub.f32 %v2941_v16, %v2589_v32 }
0x11e3   :  { %v10227_v1 = vpop.f32.mrb[36].mxu0  ;;  %v2944_v10 = vsub.f32 %v2940_v8, %v2588_v20  ;;  %v2991_v33 = vpop.permute.xlu1 %2990  ;;  %v3014_v8 = vsel %vm498_vm2, %v2590_v28, %v2957_v18  ;;  %v2527_v18 = vadd.f32 %v13014_v6, %v12779_v62 }
0x11e4   :  { %v2943_v9 = vmul.f32 2.0, %v10227_v1  ;;  %v2931_v54 = vpop.f32.mrb[37].mxu0  ;;  %3002 = vrot.lane.b32.xlu0 %v2945_v2, %s12243_s3 }
0x11e5   :  { %v2942_v21 = vmul.f32 2.0, %v2931_v54  ;;  %v3015_v54 = vsel %vm498_vm2, %v2591_v7, %v2959_v40 }
0x11e6   :  { %v2947_v12 = vsub.f32 %v2943_v9, %v2591_v7 }
0x11e7   :  { %v2946_v31 = vsub.f32 %v2942_v21, %v2590_v28 }
0x11e8   :  { %3006 = vrot.lane.b32.xlu1 %v2947_v12, %s12243_s3  ;;  %3000 = vrot.lane.b32.xlu0 %v2944_v10, %s12243_s3 }
0x11ec   :  { %3004 = vrot.lane.b32.xlu0 %v2946_v31, %s12243_s3 }
0x124d   :  { %v2971_v48 = vpop.permute.xlu1 %2970 }
0x124e   :  { %v2969_v29 = vpop.permute.xlu0 %2968  ;;  %v3017_v0 = vsel %vm785_vm3, %v3013_v63, %v2971_v48 }
0x124f   :  { %v3016_v16 = vsel %vm785_vm3, %v3012_v37, %v2969_v29  ;;  %v3021_v12 = vsel %vm1393_vm8, %v3017_v0, %v2987_v23  ;;  %v2537_v23 = vadd.f32 %v13020_v15, %v12779_v62  ;;  %v8936_v29 = vmul.f32 -1.442695, %v2527_v18 }
0x1250   :  { %v3020_v1 = vsel %vm1393_vm8, %v3016_v16, %v2985_v14  ;;  %v2522_v14 = vadd.f32 %v12779_v62, %v13017_v50 }
0x1251   :  { %v2975_v2 = vpop.permute.xlu1 %2974  ;;  %11991 = vpow2.f32 %v8936_v29 }
0x1252   :  { %v2973_v39 = vpop.permute.xlu0 %2972  ;;  %v3019_v32 = vsel %vm785_vm3, %v3015_v54, %v2975_v2 }
0x1253   :  { %v3018_v10 = vsel %vm785_vm3, %v3014_v8, %v2973_v39  ;;  %v3023_v7 = vsel %vm1393_vm8, %v3019_v32, %v2991_v33  ;;  %v8935_v33 = vmul.f32 -1.442695, %v2522_v14  ;;  %v8938_v39 = vmul.f32 -1.442695, %v2537_v23 }
0x1254   :  { %v3022_v28 = vsel %vm1393_vm8, %v3018_v10, %v2989_v27  ;;  %v2532_v27 = vadd.f32 %v12779_v62, %v13023_v41 }
0x1255   :  { %11993 = vpow2.f32 %v8935_v33 }
0x1256   :  { %v3003_v53 = vpop.permute.xlu0 %3002  ;;  %v8937_v48 = vmul.f32 -1.442695, %v2532_v27  ;;  %11995 = vpow2.f32 %v8938_v39 }
0x1257   :  { %v3025_v21 = vsel %vm1398_vm9, %v3021_v12, %v3003_v53 }
0x1258   :  { %11997 = vpow2.f32 %v8937_v48 }
0x125a   :  { %v3001_v9 = vpop.permute.xlu0 %3000  ;;  %v3007_v31 = vpop.permute.xlu1 %3006 }
0x125b   :  { %v3024_v20 = vsel %vm1398_vm9, %v3020_v1, %v3001_v9  ;;  %v3027_v38 = vsel %vm1398_vm9, %v3023_v7, %v3007_v31  ;;  %v11992_v37 = vpop.eup %11991 }
0x125c   :  { %10248 = vmatprep.mubr.msk.f32.mxu1 %vm1409_vm10, %v3024_v20  ;;  %v2553_v16 = vadd.f32 1.0, %v11992_v37 }
0x125d   :  { %10249 = vmatmul.mubr.msk.f32.vlgmr.msra.gmra.mrb[36].mxu1 %vm1409_vm10, %v3025_v21 }
0x125e   :  { %v3005_v5 = vpop.permute.xlu0 %3004  ;;  %11999 = vrcp.f32 %v2553_v16 }
0x125f   :  { %v3026_v40 = vsel %vm1398_vm9, %v3022_v28, %v3005_v5  ;;  %v11994_v53 = vpop.eup %11993 }
0x1260   :  { %10251 = vmatprep.mubr.msk.f32.mxu1 %vm1409_vm10, %v3026_v40  ;;  %v11996_v6 = vpop.eup %11995  ;;  %v2552_v50 = vadd.f32 1.0, %v11994_v53 }
0x1261   :  { %10252 = vmatmul.mubr.msk.f32.gmra.mrb[38].mxu1 %vm1409_vm10, %v3027_v38  ;;  %v2555_v0 = vadd.f32 1.0, %v11996_v6 }
0x1262   :  { %10304 = vmatprep.mubr.msk.f32.mxu1 %vm785_vm3, %v12773_v61  ;;  %v11998_v63 = vpop.eup %11997  ;;  %12001 = vrcp.f32 %v2552_v50 }
0x1263   :  { %v2554_v2 = vadd.f32 1.0, %v11998_v63  ;;  %12003 = vrcp.f32 %v2555_v0  ;;  %v13189_v63 = vld [vmem:[%s14542_s9 + $0x48] sm:$0xff] }
0x1265   :  { %12005 = vrcp.f32 %v2554_v2  ;;  %v13199_v2 = vld [vmem:[%s14542_s9 + $0x58] sm:$0xff] }
0x1268   :  { %v12000_v12 = vpop.eup %11999 }
0x1269   :  { %v3134_v31 = vsub.f32 1.0, %v12000_v12  ;;  %v3130_v40 = vmul.f32 %v12000_v12, %v12796_v46 }
0x126c   :  { %v12002_v20 = vpop.eup %12001 }
0x126d   :  { %v12004_v32 = vpop.eup %12003  ;;  %v3133_v5 = vsub.f32 1.0, %v12002_v20  ;;  %v3129_v18 = vmul.f32 %v12002_v20, %v12798_v55 }
0x126e   :  { %v3132_v46 = vmul.f32 %v12004_v32, %v12804_v52  ;;  %v13192_v52 = vld [vmem:[%s14542_s9 + $0x40] sm:$0xff] }
0x126f   :  { %v12006_v21 = vpop.eup %12005 }
0x1270   :  { %v3135_v33 = vsub.f32 1.0, %v12006_v21  ;;  %v3131_v55 = vmul.f32 %v12006_v21, %v12806_v11 }
0x1330   :  { %v10250_v15 = vpop.f32.mrb[36].mxu1 }
0x1331   :  { %v3112_v62 = vadd.f32 %v10250_v15, %v12790_v13  ;;  %v3106_v41 = vpop.f32.mrb[37].mxu1 }
0x1332   :  { %v3107_v8 = vadd.f32 %v12790_v13, %v3106_v41 }
0x1333   :  { %12007 = vtanh.f32 %v3112_v62  ;;  %v13202_v62 = vld [vmem:[%s14542_s9 + $0x50] sm:$0xff] }
0x1334   :  { %12009 = vtanh.f32 %v3107_v8  ;;  %v10253_v1 = vpop.f32.mrb[38].mxu1 }
0x1335   :  { %v3122_v9 = vadd.f32 %v10253_v1, %v12790_v13  ;;  %v3116_v54 = vpop.f32.mrb[39].mxu1 }
0x1336   :  { %v3117_v10 = vadd.f32 %v12790_v13, %v3116_v54  ;;  %v3136_v13 = vsub.f32 1.0, %v12004_v32 }
0x1337   :  { %12011 = vtanh.f32 %v3122_v9 }
0x1338   :  { %12013 = vtanh.f32 %v3117_v10 }
0x133d   :  { %v12008_v28 = vpop.eup %12007 }
0x133e   :  { %v12010_v7 = vpop.eup %12009  ;;  %v3138_v38 = vmul.f32 %v12008_v28, %v3134_v31 }
0x133f   :  { %v3137_v14 = vmul.f32 %v12010_v7, %v3133_v5 }
0x1340   :  { %v13170_v23 = vadd.f32 %v3138_v38, %v3130_v40 }
0x1341   :  { %v12012_v27 = vpop.eup %12011  ;;  %v13172_v29 = vadd.f32 %v3137_v14, %v3129_v18 }
0x1342   :  { %v12014_v39 = vpop.eup %12013  ;;  %3156 = vrot.lane.b32.xlu1 %v13170_v23, %s12244_s19  ;;  %v3140_v48 = vmul.f32 %v12012_v27, %v3136_v13 }
0x1343   :  { %3154 = vrot.lane.b32.xlu0 %v13172_v29, %s12244_s19  ;;  %v3139_v37 = vmul.f32 %v12014_v39, %v3135_v33 }
0x1344   :  { %v13180_v53 = vadd.f32 %v3140_v48, %v3132_v46 }
0x1345   :  { %v13182_v6 = vadd.f32 %v3139_v37, %v3131_v55 }
0x1346   :  { %3160 = vrot.lane.b32.xlu1 %v13180_v53, %s12244_s19 }
0x1347   :  { %3158 = vrot.lane.b32.xlu0 %v13182_v6, %s12244_s19 }
0x13b4   :  { %v3157_v16 = vpop.permute.xlu1 %3156 }
0x13b5   :  { %v3167_v50 = vsel %vm1343_vm4, %v13189_v63, %v3157_v16  ;;  %v3155_v11 = vpop.permute.xlu0 %3154 }
0x13b6   :  { %v3166_v0 = vsel %vm1343_vm4, %v13192_v52, %v3155_v11  ;;  %v13267_v40 = vsel %vm1348_vm5, %v3167_v50, 0.0 }
0x13b7   :  { %v11304_v15 = vpack.c.bf16 %v3167_v50, %v3166_v0  ;;  %v13270_v18 = vsel %vm1348_vm5, %v3166_v0, 0.0 }
0x13b8   :  { %v3161_v41 = vpop.permute.xlu1 %3160 }
0x13b9   :  { %v13206_v8 = vsel %vm1343_vm4, %v13199_v2, %v3161_v41  ;;  %11306 = vmatprep.subr.msk.bf16.mxu0 %vm12836_vm13, %v11304_v15  ;;  %v3159_v1 = vpop.permute.xlu0 %3158 }
0x13ba   :  { %v13212_v9 = vsel %vm1343_vm4, %v13202_v62, %v3159_v1  ;;  %11309 = vmatpush3.bf16.msk.msra.mxu0 %vm12836_vm13, %v11304_v15  ;;  %v13279_v37 = vsel %vm1348_vm5, %v13206_v8, 0.0 }
0x13bb   :  { %v11310_v54 = vpack.c.bf16 %v13206_v8, %v13212_v9  ;;  %v13284_v50 = vsel %vm1348_vm5, %v13212_v9, 0.0 }
0x13bd   :  { %11312 = vmatprep.subr.msk.bf16.mxu0 %vm12836_vm13, %v11310_v54 }
0x13be   :  { %11315 = vmatpush3.bf16.msk.msra.mxu0 %vm12836_vm13, %v11310_v54 }
0x13c1   :  { %10263 = vmatmul.mubr.msk.f32.vlgmr.msra.gmra.mrb[38].mxu0 %vm785_vm3, %v12868_v22 }
0x13c2   :  { %10265 = vmatprep.mubr.msk.f32.mxu0 %vm785_vm3, %v12871_v25 }
0x13c5   :  { %10266 = vmatmul.mubr.msk.f32.gmra.mrb[40].mxu0 %vm785_vm3, %v12878_v26 }
0x13c6   :  { %10276 = vmatprep.mubr.msk.f32.mxu0 %vm785_vm3, %v12687_v56 }
0x1494   :  { %v10264_v10 = vpop.f32.mrb[38].mxu0 }
0x1495   :  { %3536 = vrot.lane.b32.xlu1 %v10264_v10, %s12245_s12  ;;  %v3240_v12 = vpop.f32.mrb[39].mxu0 }
0x1496   :  { %v11316_v20 = vpack.c.bf16 %v10264_v10, %v3240_v12  ;;  %3534 = vrot.lane.b32.xlu0 %v3240_v12, %s12245_s12 }
0x1498   :  { %v10267_v32 = vpop.f32.mrb[40].mxu0  ;;  %11317 = vmatprep.subr.bf16.mxu0 %v11316_v20 }
0x1499   :  { %11319 = vmatpush3.bf16.msra.mxu0 %v11316_v20  ;;  %3540 = vrot.lane.b32.xlu1 %v10267_v32, %s12245_s12  ;;  %v3250_v21 = vpop.f32.mrb[41].mxu0 }
0x149a   :  { %v11320_v31 = vpack.c.bf16 %v10267_v32, %v3250_v21 }
0x149c   :  { %11321 = vmatprep.subr.bf16.mxu0 %v11320_v31 }
0x149d   :  { %3538 = vrot.lane.b32.xlu1 %v3250_v21, %s12245_s12  ;;  %11323 = vmatpush3.bf16.msra.mxu0 %v11320_v31 }
0x149e   :  { %11326 = vmatprep.subr.msk.bf16.mxu0 %vm12836_vm13, %v11304_v15 }
0x14a0   :  { %10277 = vmatmul.mubr.msk.f32.vlgmr.msra.gmra.mrb[42].mxu0 %vm785_vm3, %v12868_v22 }
0x14a1   :  { %10279 = vmatprep.mubr.msk.f32.mxu0 %vm785_vm3, %v12871_v25  ;;  %11329 = vmatpush3.bf16.msk.msra.mxu0 %vm12836_vm13, %v11304_v15 }
0x14a2   :  { %11332 = vmatprep.subr.msk.bf16.mxu0 %vm12836_vm13, %v11310_v54 }
0x14a4   :  { %10280 = vmatmul.mubr.msk.f32.gmra.mrb[44].mxu0 %vm785_vm3, %v12878_v26 }
0x14a5   :  { %11335 = vmatpush3.bf16.msk.msra.mxu0 %vm12836_vm13, %v11310_v54  ;;  %10290 = vmatprep.mubr.msk.f32.mxu0 %vm785_vm3, %v12773_v61 }
0x14a6   :  { %11345 = vmatprep.subr.bf16.mxu0 %v12576_v19 }
0x14a8   :  { %10291 = vmatmul.mubr.msk.f32.vlgmr.msra.gmra.mrb[46].mxu0 %vm785_vm3, %v12907_v43 }
0x14a9   :  { %10293 = vmatprep.mubr.msk.f32.mxu0 %vm785_vm3, %v12910_v59  ;;  %11347 = vmatpush3.bf16.msra.mxu0 %v12576_v19 }
0x14aa   :  { %11349 = vmatprep.subr.bf16.mxu0 %v12603_v35 }
0x14ac   :  { %10294 = vmatmul.mubr.msk.f32.gmra.mrb[48].mxu0 %vm785_vm3, %v12919_v60 }
0x14ad   :  { %11351 = vmatpush3.bf16.msra.mxu0 %v12603_v35 }
0x14ae   :  { %11353 = vmatprep.subr.bf16.mxu0 %v12621_v45 }
0x14b1   :  { %11355 = vmatpush3.bf16.msra.mxu0 %v12621_v45 }
0x14b2   :  { %11357 = vmatprep.subr.bf16.mxu0 %v12635_v57 }
0x14b5   :  { %11359 = vmatpush3.bf16.msra.mxu0 %v12635_v57 }
0x14b6   :  { %11361 = vmatprep.subr.bf16.mxu0 %v12647_v4 }
0x14b9   :  { %11363 = vmatpush3.bf16.msra.mxu0 %v12647_v4 }
0x1573   :  { %v10278_v28 = vpop.f32.mrb[42].mxu0 }
0x1574   :  { %v3345_v5 = vmul.f32 2.0, %v10278_v28  ;;  %v3325_v7 = vpop.f32.mrb[43].mxu0 }
0x1575   :  { %v3344_v38 = vmul.f32 2.0, %v3325_v7 }
0x1576   :  { %v3349_v14 = vsub.f32 %v3345_v5, %v13267_v40 }
0x1577   :  { %v3348_v13 = vsub.f32 %v3344_v38, %v13270_v18  ;;  %v10281_v27 = vpop.f32.mrb[44].mxu0  ;;  %v3537_v38 = vpop.permute.xlu1 %3536 }
0x1578   :  { %3552 = vrot.lane.b32.xlu1 %v3349_v14, %s12242_s25  ;;  %v3335_v33 = vpop.f32.mrb[45].mxu0  ;;  %v3347_v39 = vmul.f32 2.0, %v10281_v27  ;;  %v3535_v14 = vpop.permute.xlu0 %3534 }
0x1579   :  { %3550 = vrot.lane.b32.xlu0 %v3348_v13, %s12242_s25  ;;  %v3346_v46 = vmul.f32 2.0, %v3335_v33 }
0x157a   :  { %v3351_v11 = vsub.f32 %v3347_v39, %v13279_v37 }
0x157b   :  { %v10292_v48 = vpop.f32.mrb[46].mxu0  ;;  %v3350_v0 = vsub.f32 %v3346_v46, %v13284_v50  ;;  %v3541_v13 = vpop.permute.xlu1 %3540 }
0x157c   :  { %3568 = vrot.lane.b32.xlu1 %v10292_v48, %s12246_s20  ;;  %v3418_v55 = vpop.f32.mrb[47].mxu0 }
0x157d   :  { %v11336_v16 = vpack.c.bf16 %v10292_v48, %v3418_v55  ;;  %3566 = vrot.lane.b32.xlu0 %v3418_v55, %s12246_s20 }
0x157f   :  { %v10295_v15 = vpop.f32.mrb[48].mxu0  ;;  %11337 = vmatprep.subr.bf16.mxu1 %v11336_v16  ;;  %v3539_v33 = vpop.permute.xlu1 %3538 }
0x1580   :  { %3556 = vrot.lane.b32.xlu1 %v3351_v11, %s12242_s25  ;;  %v3428_v41 = vpop.f32.mrb[49].mxu0  ;;  %11339 = vmatpush3.bf16.msra.mxu1 %v11336_v16 }
0x1581   :  { %v11340_v1 = vpack.c.bf16 %v10295_v15, %v3428_v41  ;;  %3554 = vrot.lane.b32.xlu0 %v3350_v0, %s12242_s25 }
0x1583   :  { %11341 = vmatprep.subr.bf16.mxu1 %v11340_v1 }
0x1584   :  { %3572 = vrot.lane.b32.xlu1 %v10295_v15, %s12246_s20  ;;  %11343 = vmatpush3.bf16.msra.mxu1 %v11340_v1  ;;  %v3594_v15 = vsel %vm498_vm2, %v13270_v18, %v3535_v14 }
0x1585   :  { %3570 = vrot.lane.b32.xlu0 %v3428_v41, %s12246_s20  ;;  %11365 = vmatprep.subr.bf16.mxu1 %v12540_v3  ;;  %v3595_v41 = vsel %vm498_vm2, %v13267_v40, %v3537_v38 }
0x1587   :  { %10305 = vmatmul.mubr.msk.f32.vlgmr.msra.gmra.mrb[40].mxu1 %vm785_vm3, %v12907_v43 }
0x1588   :  { %10307 = vmatprep.mubr.msk.f32.mxu1 %vm785_vm3, %v12910_v59  ;;  %11367 = vmatpush3.bf16.msra.mxu1 %v12540_v3 }
0x1589   :  { %11369 = vmatprep.subr.bf16.mxu1 %v12573_v17 }
0x158b   :  { %10308 = vmatmul.mubr.msk.f32.gmra.mrb[42].mxu1 %vm785_vm3, %v12919_v60 }
0x158c   :  { %11371 = vmatpush3.bf16.msra.mxu1 %v12573_v17 }
0x158d   :  { %11373 = vmatprep.subr.bf16.mxu1 %v12588_v24 }
0x1590   :  { %11375 = vmatpush3.bf16.msra.mxu1 %v12588_v24 }
0x1591   :  { %11377 = vmatprep.subr.bf16.mxu1 %v12601_v34 }
0x1594   :  { %11379 = vmatpush3.bf16.msra.mxu1 %v12601_v34 }
0x1595   :  { %11381 = vmatprep.subr.bf16.mxu1 %v12618_v44 }
0x1598   :  { %11383 = vmatpush3.bf16.msra.mxu1 %v12618_v44 }
0x15ea   :  { %v3553_v46 = vpop.permute.xlu1 %3552 }
0x15eb   :  { %v3551_v27 = vpop.permute.xlu0 %3550 }
0x15ec   :  { %v3598_v1 = vsel %vm785_vm3, %v3594_v15, %v3551_v27  ;;  %v13351_v27 = vld [vmem:[%s14548_s8] ss:$0 sm:$0xff] }
0x15ee   :  { %v3569_v55 = vpop.permute.xlu1 %3568 }
0x15ef   :  { %v3567_v39 = vpop.permute.xlu0 %3566 }
0x15f2   :  { %v3557_v11 = vpop.permute.xlu1 %3556 }
0x15f3   :  { %v3555_v48 = vpop.permute.xlu0 %3554 }
0x15f7   :  { %v3571_v16 = vpop.permute.xlu0 %3570 }
0x165a   :  { %v10306_v8 = vpop.f32.mrb[40].mxu1 }
0x165b   :  { %v3523_v9 = vmul.f32 2.0, %v10306_v8  ;;  %v3503_v54 = vpop.f32.mrb[41].mxu1  ;;  %v3573_v8 = vpop.permute.xlu1 %3572 }
0x165c   :  { %v3522_v12 = vmul.f32 2.0, %v3503_v54  ;;  %v3602_v54 = vsel %vm1393_vm8, %v3598_v1, %v3567_v39 }
0x165d   :  { %v3527_v10 = vsub.f32 %v3523_v9, %v13267_v40  ;;  %v3599_v9 = vsel %vm785_vm3, %v3595_v41, %v3553_v46  ;;  %v3597_v40 = vsel %vm498_vm2, %v13279_v37, %v3541_v13 }
0x165e   :  { %v10309_v20 = vpop.f32.mrb[42].mxu1  ;;  %v3526_v31 = vsub.f32 %v3522_v12, %v13270_v18  ;;  %v3603_v12 = vsel %vm1393_vm8, %v3599_v9, %v3569_v55 }
0x165f   :  { %v3525_v32 = vmul.f32 2.0, %v10309_v20  ;;  %v3513_v21 = vpop.f32.mrb[43].mxu1  ;;  %3584 = vrot.lane.b32.xlu0 %v3527_v10, %s12243_s3 }
0x1660   :  { %v3524_v5 = vmul.f32 2.0, %v3513_v21 }
0x1661   :  { %v3529_v28 = vsub.f32 %v3525_v32, %v13279_v37  ;;  %v3596_v32 = vsel %vm498_vm2, %v13284_v50, %v3539_v33 }
0x1662   :  { %v3528_v7 = vsub.f32 %v3524_v5, %v13284_v50  ;;  %v3600_v21 = vsel %vm785_vm3, %v3596_v32, %v3555_v48 }
0x1663   :  { %3588 = vrot.lane.b32.xlu1 %v3529_v28, %s12243_s3  ;;  %3582 = vrot.lane.b32.xlu0 %v3526_v31, %s12243_s3  ;;  %v3601_v28 = vsel %vm785_vm3, %v3597_v40, %v3557_v11  ;;  %v3604_v50 = vsel %vm1393_vm8, %v3600_v21, %v3571_v16 }
0x1667   :  { %3586 = vrot.lane.b32.xlu0 %v3528_v7, %s12243_s3  ;;  %v3605_v7 = vsel %vm1393_vm8, %v3601_v28, %v3573_v8 }
0x16d1   :  { %v3585_v0 = vpop.permute.xlu0 %3584 }
0x16d2   :  { %v3607_v18 = vsel %vm1398_vm9, %v3603_v12, %v3585_v0 }
0x16d5   :  { %v3583_v10 = vpop.permute.xlu0 %3582  ;;  %v3589_v31 = vpop.permute.xlu1 %3588 }
0x16d6   :  { %v3606_v20 = vsel %vm1398_vm9, %v3602_v54, %v3583_v10  ;;  %v3609_v14 = vsel %vm1398_vm9, %v3605_v7, %v3589_v31 }
0x16d7   :  { %10330 = vmatprep.mubr.msk.f32.mxu0 %vm1409_vm10, %v3606_v20  ;;  %10356 = vmatprep.mubr.msk.f32.mxu1 %vm1409_vm10, %v3606_v20 }
0x16d8   :  { %10331 = vmatmul.mubr.msk.f32.vlgmr.msra.gmra.mrb[50].mxu0 %vm1409_vm10, %v3607_v18  ;;  %10357 = vmatmul.mubr.msk.f32.vlgmr.msra.gmra.mrb[44].mxu1 %vm1409_vm10, %v3607_v18 }
0x16d9   :  { %v3587_v5 = vpop.permute.xlu0 %3586 }
0x16da   :  { %v3608_v38 = vsel %vm1398_vm9, %v3604_v50, %v3587_v5 }
0x16db   :  { %10333 = vmatprep.mubr.msk.f32.mxu0 %vm1409_vm10, %v3608_v38  ;;  %10359 = vmatprep.mubr.msk.f32.mxu1 %vm1409_vm10, %v3608_v38 }
0x16dc   :  { %10334 = vmatmul.mubr.msk.f32.gmra.mrb[52].mxu0 %vm1409_vm10, %v3609_v14  ;;  %10360 = vmatmul.mubr.msk.f32.gmra.mrb[46].mxu1 %vm1409_vm10, %v3609_v14 }
0x16dd   :  { %10370 = vmatprep.mubr.msk.f32.mxu0 %vm785_vm3, %v12687_v56  ;;  %10384 = vmatprep.mubr.msk.f32.mxu1 %vm785_vm3, %v12687_v56 }
0x17ab   :  { %v10332_v37 = vpop.f32.mrb[50].mxu0  ;;  %v13348_v13 = vpop.f32.mrb[44].mxu1 }
0x17ac   :  { %v3694_v33 = vadd.f32 %v13351_v27, %v10332_v37  ;;  %v3688_v39 = vpop.f32.mrb[51].mxu0  ;;  %v13354_v46 = vpop.f32.mrb[45].mxu1 }
0x17ad   :  { %v3689_v48 = vadd.f32 %v13351_v27, %v3688_v39 }
0x17ae   :  { %v9000_v55 = vmul.f32 -1.442695, %v3694_v33 }
0x17af   :  { %v8999_v16 = vmul.f32 -1.442695, %v3689_v48  ;;  %v10335_v11 = vpop.f32.mrb[52].mxu0  ;;  %v13357_v0 = vpop.f32.mrb[46].mxu1 }
0x17b0   :  { %12015 = vpow2.f32 %v9000_v55  ;;  %v3704_v15 = vadd.f32 %v13351_v27, %v10335_v11  ;;  %v3698_v41 = vpop.f32.mrb[53].mxu0  ;;  %v13360_v1 = vpop.f32.mrb[47].mxu1 }
0x17b1   :  { %v3699_v8 = vadd.f32 %v13351_v27, %v3698_v41  ;;  %12017 = vpow2.f32 %v8999_v16 }
0x17b2   :  { %v9002_v9 = vmul.f32 -1.442695, %v3704_v15 }
0x17b3   :  { %v9001_v54 = vmul.f32 -1.442695, %v3699_v8 }
0x17b4   :  { %12019 = vpow2.f32 %v9002_v9 }
0x17b5   :  { %12021 = vpow2.f32 %v9001_v54 }
0x17ba   :  { %v12016_v10 = vpop.eup %12015 }
0x17bb   :  { %v3720_v12 = vadd.f32 1.0, %v12016_v10  ;;  %v12018_v20 = vpop.eup %12017 }
0x17bc   :  { %v3719_v32 = vadd.f32 1.0, %v12018_v20 }
0x17bd   :  { %12023 = vrcp.f32 %v3720_v12 }
0x17be   :  { %v12020_v18 = vpop.eup %12019  ;;  %12025 = vrcp.f32 %v3719_v32 }
0x17bf   :  { %v3722_v40 = vadd.f32 1.0, %v12020_v18  ;;  %v12022_v21 = vpop.eup %12021 }
0x17c0   :  { %v3721_v31 = vadd.f32 1.0, %v12022_v21 }
0x17c1   :  { %12027 = vrcp.f32 %v3722_v40 }
0x17c2   :  { %12029 = vrcp.f32 %v3721_v31 }
0x17c7   :  { %v12024_v28 = vpop.eup %12023 }
0x17c8   :  { %v3841_v50 = vmul.f32 %v12024_v28, %v13170_v23  ;;  %v12026_v5 = vpop.eup %12025 }
0x17c9   :  { %v3840_v7 = vmul.f32 %v12026_v5, %v13172_v29 }
0x17ca   :  { %3850 = vrot.lane.b32.xlu1 %v3841_v50, %s12244_s19 }
0x17cb   :  { %v12028_v38 = vpop.eup %12027  ;;  %3848 = vrot.lane.b32.xlu0 %v3840_v7, %s12244_s19 }
0x17cc   :  { %v3843_v14 = vmul.f32 %v12028_v38, %v13180_v53  ;;  %v12030_v37 = vpop.eup %12029 }
0x17cd   :  { %v3842_v33 = vmul.f32 %v12030_v37, %v13182_v6 }
0x17ce   :  { %3854 = vrot.lane.b32.xlu1 %v3843_v14, %s12244_s19 }
0x17cf   :  { %3852 = vrot.lane.b32.xlu0 %v3842_v33, %s12244_s19 }
0x183c   :  { %v3851_v39 = vpop.permute.xlu1 %3850 }
0x183d   :  { %v13373_v48 = vsel %vm1343_vm4, %v13189_v63, %v3851_v39  ;;  %v3849_v55 = vpop.permute.xlu0 %3848 }
0x183e   :  { %v13377_v16 = vsel %vm1343_vm4, %v13192_v52, %v3849_v55  ;;  %v3865_v7 = vsel %vm1348_vm5, %v13373_v48, 0.0 }
0x183f   :  { %v11384_v11 = vpack.c.bf16 %v13373_v48, %v13377_v16  ;;  %v3864_v14 = vsel %vm1348_vm5, %v13377_v16, 0.0 }
0x1840   :  { %v3855_v15 = vpop.permute.xlu1 %3854 }
0x1841   :  { %v13383_v41 = vsel %vm1343_vm4, %v13199_v2, %v3855_v15  ;;  %11386 = vmatprep.subr.msk.bf16.mxu0 %vm12836_vm13, %v11384_v11  ;;  %v3853_v8 = vpop.permute.xlu0 %3852 }
0x1842   :  { %v13389_v63 = vsel %vm1343_vm4, %v13202_v62, %v3853_v8  ;;  %11389 = vmatpush3.bf16.msk.msra.mxu0 %vm12836_vm13, %v11384_v11  ;;  %v3867_v15 = vsel %vm1348_vm5, %v13383_v41, 0.0 }
0x1843   :  { %v11390_v52 = vpack.c.bf16 %v13383_v41, %v13389_v63  ;;  %v3866_v48 = vsel %vm1348_vm5, %v13389_v63, 0.0 }
0x1845   :  { %11392 = vmatprep.subr.msk.bf16.mxu0 %vm12836_vm13, %v11390_v52 }
0x1846   :  { %11395 = vmatpush3.bf16.msk.msra.mxu0 %vm12836_vm13, %v11390_v52 }
0x1847   :  { %11406 = vmatprep.subr.msk.bf16.mxu0 %vm12836_vm13, %v11384_v11 }
0x1849   :  { %10371 = vmatmul.mubr.msk.f32.vlgmr.msra.gmra.mrb[54].mxu0 %vm785_vm3, %v12868_v22 }
0x184a   :  { %10373 = vmatprep.mubr.msk.f32.mxu0 %vm785_vm3, %v12871_v25  ;;  %11409 = vmatpush3.bf16.msk.msra.mxu0 %vm12836_vm13, %v11384_v11 }
0x184b   :  { %11412 = vmatprep.subr.msk.bf16.mxu0 %vm12836_vm13, %v11390_v52 }
0x184d   :  { %10374 = vmatmul.mubr.msk.f32.gmra.mrb[56].mxu0 %vm785_vm3, %v12878_v26 }
0x184e   :  { %11415 = vmatpush3.bf16.msk.msra.mxu0 %vm12836_vm13, %v11390_v52  ;;  %10398 = vmatprep.mubr.msk.f32.mxu0 %vm785_vm3, %v12773_v61 }
0x184f   :  { %11425 = vmatprep.subr.bf16.mxu0 %v12703_v30 }
0x1851   :  { %10399 = vmatmul.mubr.msk.f32.vlgmr.msra.gmra.mrb[58].mxu0 %vm785_vm3, %v12907_v43 }
0x1852   :  { %10401 = vmatprep.mubr.msk.f32.mxu0 %vm785_vm3, %v12910_v59  ;;  %11427 = vmatpush3.bf16.msra.mxu0 %v12703_v30 }
0x1853   :  { %11429 = vmatprep.subr.bf16.mxu0 %v12707_v36 }
0x1855   :  { %10402 = vmatmul.mubr.msk.f32.gmra.mrb[60].mxu0 %vm785_vm3, %v12919_v60 }
0x1856   :  { %11431 = vmatpush3.bf16.msra.mxu0 %v12707_v36 }
0x1857   :  { %11433 = vmatprep.subr.bf16.mxu0 %v12715_v42 }
0x185a   :  { %11435 = vmatpush3.bf16.msra.mxu0 %v12715_v42 }
0x185b   :  { %11437 = vmatprep.subr.bf16.mxu0 %v12721_v47 }
0x185e   :  { %11439 = vmatpush3.bf16.msra.mxu0 %v12721_v47 }
0x185f   :  { %11441 = vmatprep.subr.bf16.mxu0 %v12728_v58 }
0x1862   :  { %11443 = vmatpush3.bf16.msra.mxu0 %v12728_v58 }
0x191c   :  { %v10372_v2 = vpop.f32.mrb[54].mxu0 }
0x191d   :  { %4230 = vrot.lane.b32.xlu1 %v10372_v2, %s12245_s12  ;;  %v3934_v62 = vpop.f32.mrb[55].mxu0 }
0x191e   :  { %v11396_v9 = vpack.c.bf16 %v10372_v2, %v3934_v62  ;;  %4228 = vrot.lane.b32.xlu0 %v3934_v62, %s12245_s12 }
0x1920   :  { %v10375_v54 = vpop.f32.mrb[56].mxu0  ;;  %11397 = vmatprep.subr.bf16.mxu1 %v11396_v9 }
0x1921   :  { %11399 = vmatpush3.bf16.msra.mxu1 %v11396_v9  ;;  %4234 = vrot.lane.b32.xlu1 %v10375_v54, %s12245_s12  ;;  %v3944_v10 = vpop.f32.mrb[57].mxu0 }
0x1922   :  { %v11400_v12 = vpack.c.bf16 %v10375_v54, %v3944_v10 }
0x1924   :  { %11401 = vmatprep.subr.bf16.mxu1 %v11400_v12  ;;  %v10400_v20 = vpop.f32.mrb[58].mxu0 }
0x1925   :  { %4232 = vrot.lane.b32.xlu1 %v3944_v10, %s12245_s12  ;;  %11403 = vmatpush3.bf16.msra.mxu1 %v11400_v12  ;;  %v4112_v32 = vpop.f32.mrb[59].mxu0 }
0x1926   :  { %v11416_v18 = vpack.c.bf16 %v10400_v20, %v4112_v32  ;;  %4260 = vrot.lane.b32.xlu0 %v4112_v32, %s12246_s20 }
0x1928   :  { %10385 = vmatmul.mubr.msk.f32.vlgmr.msra.gmra.mrb[48].mxu1 %vm785_vm3, %v12868_v22  ;;  %v10403_v40 = vpop.f32.mrb[60].mxu0  ;;  %11417 = vmatprep.subr.bf16.mxu1 %v11416_v18 }
0x1929   :  { %4262 = vrot.lane.b32.xlu1 %v10400_v20, %s12246_s20  ;;  %10387 = vmatprep.mubr.msk.f32.mxu1 %vm785_vm3, %v12871_v25  ;;  %v4122_v21 = vpop.f32.mrb[61].mxu0 }
0x192a   :  { %v11420_v31 = vpack.c.bf16 %v10403_v40, %v4122_v21  ;;  %11419 = vmatpush3.bf16.msra.mxu1 %v11416_v18  ;;  %4264 = vrot.lane.b32.xlu0 %v4122_v21, %s12246_s20 }
0x192c   :  { %10388 = vmatmul.mubr.msk.f32.gmra.mrb[50].mxu1 %vm785_vm3, %v12878_v26  ;;  %11421 = vmatprep.subr.bf16.mxu1 %v11420_v31 }
0x192d   :  { %4266 = vrot.lane.b32.xlu1 %v10403_v40, %s12246_s20  ;;  %10412 = vmatprep.mubr.msk.f32.mxu1 %vm785_vm3, %v12773_v61 }
0x192e   :  { %11423 = vmatpush3.bf16.msra.mxu1 %v11420_v31 }
0x1931   :  { %10413 = vmatmul.mubr.msk.f32.vlgmr.msra.gmra.mrb[52].mxu1 %vm785_vm3, %v12907_v43 }
0x1932   :  { %10415 = vmatprep.mubr.msk.f32.mxu1 %vm785_vm3, %v12910_v59 }
0x1935   :  { %10416 = vmatmul.mubr.msk.f32.gmra.mrb[54].mxu1 %vm785_vm3, %v12919_v60 }
0x1936   :  { %10452 = vmatprep.mubr.msk.f32.mxu1 %vm785_vm3, %v12687_v56 }
0x198f   :  { %v4231_v21 = vpop.permute.xlu1 %4230 }
0x1993   :  { %v4235_v31 = vpop.permute.xlu1 %4234 }
0x19fb   :  { %v10386_v28 = vpop.f32.mrb[48].mxu1 }
0x19fc   :  { %v4039_v50 = vmul.f32 2.0, %v10386_v28  ;;  %v4019_v5 = vpop.f32.mrb[49].mxu1  ;;  %v4229_v28 = vpop.permute.xlu0 %4228 }
0x19fd   :  { %v4038_v38 = vmul.f32 2.0, %v4019_v5 }
0x19fe   :  { %v4043_v37 = vsub.f32 %v4039_v50, %v3865_v7  ;;  %v4233_v50 = vpop.permute.xlu1 %4232 }
0x19ff   :  { %v4042_v33 = vsub.f32 %v4038_v38, %v3864_v14  ;;  %v10389_v39 = vpop.f32.mrb[50].mxu1 }
0x1a00   :  { %v4041_v55 = vmul.f32 2.0, %v10389_v39  ;;  %4246 = vrot.lane.b32.xlu1 %v4043_v37, %s12242_s25  ;;  %v4029_v11 = vpop.f32.mrb[51].mxu1  ;;  %v4261_v5 = vpop.permute.xlu0 %4260 }
0x1a01   :  { %v4040_v8 = vmul.f32 2.0, %v4029_v11  ;;  %4244 = vrot.lane.b32.xlu0 %v4042_v33, %s12242_s25 }
0x1a02   :  { %v4045_v52 = vsub.f32 %v4041_v55, %v3867_v15  ;;  %v4263_v38 = vpop.permute.xlu1 %4262 }
0x1a03   :  { %v4044_v2 = vsub.f32 %v4040_v8, %v3866_v48  ;;  %v4288_v8 = vsel %vm498_vm2, %v3864_v14, %v4229_v28  ;;  %v13494_v28 = vld [vmem:[%s14550_s24] ss:$0 sm:$0xff] }
0x1a04   :  { %v10414_v62 = vpop.f32.mrb[52].mxu1  ;;  %4250 = vrot.lane.b32.xlu1 %v4045_v52, %s12242_s25  ;;  %v4265_v37 = vpop.permute.xlu0 %4264 }
0x1a05   :  { %v4217_v16 = vmul.f32 2.0, %v10414_v62  ;;  %v4197_v9 = vpop.f32.mrb[53].mxu1  ;;  %4248 = vrot.lane.b32.xlu0 %v4044_v2, %s12242_s25  ;;  %v4289_v2 = vsel %vm498_vm2, %v3865_v7, %v4231_v21 }
0x1a06   :  { %v4216_v10 = vmul.f32 2.0, %v4197_v9  ;;  %v4267_v39 = vpop.permute.xlu1 %4266 }
0x1a07   :  { %v4221_v54 = vsub.f32 %v4217_v16, %v3865_v7 }
0x1a08   :  { %v10417_v12 = vpop.f32.mrb[54].mxu1  ;;  %v4220_v32 = vsub.f32 %v4216_v10, %v3864_v14 }
0x1a09   :  { %v4219_v20 = vmul.f32 2.0, %v10417_v12  ;;  %v4207_v41 = vpop.f32.mrb[55].mxu1  ;;  %4278 = vrot.lane.b32.xlu0 %v4221_v54, %s12243_s3  ;;  %v4290_v54 = vsel %vm498_vm2, %v3866_v48, %v4233_v50  ;;  %v3803_v50 = vadd.f32 %v13494_v28, %v13348_v13 }
0x1a0a   :  { %v4218_v40 = vmul.f32 2.0, %v4207_v41 }
0x1a0b   :  { %v4223_v18 = vsub.f32 %v4219_v20, %v3867_v15  ;;  %v4291_v20 = vsel %vm498_vm2, %v3867_v15, %v4235_v31 }
0x1a0c   :  { %v4222_v63 = vsub.f32 %v4218_v40, %v3866_v48 }
0x1a0d   :  { %4282 = vrot.lane.b32.xlu1 %v4223_v18, %s12243_s3  ;;  %4276 = vrot.lane.b32.xlu0 %v4220_v32, %s12243_s3 }
0x1a11   :  { %4280 = vrot.lane.b32.xlu0 %v4222_v63, %s12243_s3 }
0x1a72   :  { %v4247_v11 = vpop.permute.xlu1 %4246 }
0x1a73   :  { %v4245_v33 = vpop.permute.xlu0 %4244  ;;  %v4293_v16 = vsel %vm785_vm3, %v4289_v2, %v4247_v11 }
0x1a74   :  { %v4292_v62 = vsel %vm785_vm3, %v4288_v8, %v4245_v33  ;;  %v4297_v14 = vsel %vm1393_vm8, %v4293_v16, %v4263_v38  ;;  %v3813_v38 = vadd.f32 %v13494_v28, %v13357_v0  ;;  %v9008_v33 = vmul.f32 -1.442695, %v3803_v50 }
0x1a75   :  { %v4296_v10 = vsel %vm1393_vm8, %v4292_v62, %v4261_v5  ;;  %v3798_v5 = vadd.f32 %v13494_v28, %v13354_v46 }
0x1a76   :  { %v4251_v9 = vpop.permute.xlu1 %4250  ;;  %12031 = vpow2.f32 %v9008_v33 }
0x1a77   :  { %v4249_v55 = vpop.permute.xlu0 %4248  ;;  %v4295_v7 = vsel %vm785_vm3, %v4291_v20, %v4251_v9  ;;  %v13505_v9 = vld [vmem:[%s14551_s30] ss:$0 sm:$0xff] }
0x1a78   :  { %v4294_v41 = vsel %vm785_vm3, %v4290_v54, %v4249_v55  ;;  %v4299_v15 = vsel %vm1393_vm8, %v4295_v7, %v4267_v39  ;;  %v9007_v39 = vmul.f32 -1.442695, %v3798_v5  ;;  %v9010_v55 = vmul.f32 -1.442695, %v3813_v38 }
0x1a79   :  { %v4298_v48 = vsel %vm1393_vm8, %v4294_v41, %v4265_v37  ;;  %v3808_v37 = vadd.f32 %v13494_v28, %v13360_v1 }
0x1a7a   :  { %12033 = vpow2.f32 %v9007_v39 }
0x1a7b   :  { %v4279_v52 = vpop.permute.xlu0 %4278  ;;  %v9009_v11 = vmul.f32 -1.442695, %v3808_v37  ;;  %12035 = vpow2.f32 %v9010_v55 }
0x1a7c   :  { %v4301_v18 = vsel %vm1398_vm9, %v4297_v14, %v4279_v52 }
0x1a7d   :  { %12037 = vpow2.f32 %v9009_v11 }
0x1a7f   :  { %v4277_v12 = vpop.permute.xlu0 %4276  ;;  %v4283_v40 = vpop.permute.xlu1 %4282 }
0x1a80   :  { %v4300_v32 = vsel %vm1398_vm9, %v4296_v10, %v4277_v12  ;;  %v4303_v31 = vsel %vm1398_vm9, %v4299_v15, %v4283_v40  ;;  %v12032_v8 = vpop.eup %12031 }
0x1a81   :  { %10438 = vmatprep.mubr.msk.f32.mxu0 %vm1409_vm10, %v4300_v32  ;;  %v3829_v46 = vadd.f32 1.0, %v12032_v8 }
0x1a82   :  { %10439 = vmatmul.mubr.msk.f32.vlgmr.msra.gmra.mrb[62].mxu0 %vm1409_vm10, %v4301_v18 }
0x1a83   :  { %v4281_v63 = vpop.permute.xlu0 %4280  ;;  %12039 = vrcp.f32 %v3829_v46 }
0x1a84   :  { %v4302_v21 = vsel %vm1398_vm9, %v4298_v48, %v4281_v63  ;;  %v12034_v13 = vpop.eup %12033 }
0x1a85   :  { %10441 = vmatprep.mubr.msk.f32.mxu0 %vm1409_vm10, %v4302_v21  ;;  %v12036_v52 = vpop.eup %12035  ;;  %v3828_v62 = vadd.f32 1.0, %v12034_v13 }
0x1a86   :  { %10442 = vmatmul.mubr.msk.f32.gmra.mrb[64].mxu0 %vm1409_vm10, %v4303_v31  ;;  %v3831_v16 = vadd.f32 1.0, %v12036_v52 }
0x1a87   :  { %10494 = vmatprep.mubr.msk.f32.mxu0 %vm785_vm3, %v12773_v61  ;;  %v12038_v2 = vpop.eup %12037  ;;  %12041 = vrcp.f32 %v3828_v62 }
0x1a88   :  { %v3830_v0 = vadd.f32 1.0, %v12038_v2  ;;  %12043 = vrcp.f32 %v3831_v16  ;;  %v13532_v16 = vld [vmem:[%s14542_s9 + $0x68] sm:$0xff] }
0x1a8a   :  { %12045 = vrcp.f32 %v3830_v0 }
0x1a8d   :  { %v12040_v7 = vpop.eup %12039 }
0x1a8e   :  { %v4410_v63 = vsub.f32 1.0, %v12040_v7  ;;  %v4406_v50 = vmul.f32 %v12040_v7, %v13170_v23 }
0x1a91   :  { %v12042_v18 = vpop.eup %12041 }
0x1a92   :  { %v12044_v40 = vpop.eup %12043  ;;  %v4409_v21 = vsub.f32 1.0, %v12042_v18  ;;  %v4405_v38 = vmul.f32 %v12042_v18, %v13172_v29 }
0x1a93   :  { %v4412_v39 = vsub.f32 1.0, %v12044_v40  ;;  %v4408_v23 = vmul.f32 %v12044_v40, %v13180_v53  ;;  %v13535_v53 = vld [vmem:[%s14542_s9 + $0x60] sm:$0xff] }
0x1a94   :  { %v12046_v48 = vpop.eup %12045 }
0x1a95   :  { %v4411_v8 = vsub.f32 1.0, %v12046_v48  ;;  %v4407_v29 = vmul.f32 %v12046_v48, %v13182_v6 }
0x1b55   :  { %v10440_v1 = vpop.f32.mrb[62].mxu0 }
0x1b56   :  { %v4388_v54 = vadd.f32 %v13505_v9, %v10440_v1  ;;  %v4382_v10 = vpop.f32.mrb[63].mxu0 }
0x1b57   :  { %v4383_v12 = vadd.f32 %v13505_v9, %v4382_v10  ;;  %v13542_v10 = vld [vmem:[%s14542_s9 + $0x78] sm:$0xff] }
0x1b58   :  { %12047 = vtanh.f32 %v4388_v54 }
0x1b59   :  { %12049 = vtanh.f32 %v4383_v12  ;;  %v10443_v20 = vpop.f32.mrb[64].mxu0 }
0x1b5a   :  { %v4398_v41 = vadd.f32 %v13505_v9, %v10443_v20  ;;  %v4392_v14 = vpop.f32.mrb[65].mxu0  ;;  %v13545_v20 = vld [vmem:[%s14542_s9 + $0x70] sm:$0xff]  ;;  %s12249_s9 = smov [#allocation3]  }
0x1b5b   :  { %v4393_v32 = vadd.f32 %v13505_v9, %v4392_v14  ;;  %s8786_s13 = sshll.u32 %s12249_s9, 4  ;;  %s8787_s13 = int_to_ptr.vmem [resolvable:$true] %s8786_s13 }
0x1b5c   :  { %12051 = vtanh.f32 %v4398_v41  ;;  %s12178_s17 = scalar_lea.vmem %s8787_s13, 256  ;;  %p12183_p1 = scmp.lt.s32.totalorder %s8787_s13, %s8787_s13 }
0x1b5d   :  { %12053 = vtanh.f32 %v4393_v32  ;;  %p12179_p0 = scmp.ne.s32.totalorder %s8787_s13, %s12178_s17  ;;  %p12184_p2 = scmp.lt.s32.totalorder %s12178_s17, %s12178_s17 }
0x1b5f   :  { %p12185_p3 = por %p12184_p2, %p12183_p1 }
0x1b61   :  { %p12186_p4 = pnand %p12185_p3, %p12179_p0 }
0x1b62   :  { %v12048_v15 = vpop.eup %12047 }
0x1b63   :  { %v12050_v31 = vpop.eup %12049  ;;  %v4414_v5 = vmul.f32 %v12048_v15, %v4410_v63 }
0x1b64   :  { %v4413_v37 = vmul.f32 %v12050_v31, %v4409_v21 }
0x1b65   :  { %v13513_v33 = vadd.f32 %v4414_v5, %v4406_v50 }
0x1b66   :  { %v12052_v55 = vpop.eup %12051  ;;  %v13515_v11 = vadd.f32 %v4413_v37, %v4405_v38 }
0x1b67   :  { %v12054_v13 = vpop.eup %12053  ;;  %4432 = vrot.lane.b32.xlu1 %v13513_v33, %s12244_s19  ;;  %v4416_v52 = vmul.f32 %v12052_v55, %v4412_v39 }
0x1b68   :  { %4430 = vrot.lane.b32.xlu0 %v13515_v11, %s12244_s19  ;;  %v4415_v2 = vmul.f32 %v12054_v13, %v4411_v8 }
0x1b69   :  { %v13523_v46 = vadd.f32 %v4416_v52, %v4408_v23 }
0x1b6a   :  { %v13525_v62 = vadd.f32 %v4415_v2, %v4407_v29 }
0x1b6b   :  { %4436 = vrot.lane.b32.xlu1 %v13523_v46, %s12244_s19 }
0x1b6c   :  { %4434 = vrot.lane.b32.xlu0 %v13525_v62, %s12244_s19 }
0x1bd9   :  { %v4433_v0 = vpop.permute.xlu1 %4432 }
0x1bda   :  { %v4443_v1 = vsel %vm1343_vm4, %v13532_v16, %v4433_v0  ;;  %v4431_v6 = vpop.permute.xlu0 %4430 }
0x1bdb   :  { %v4442_v54 = vsel %vm1343_vm4, %v13535_v53, %v4431_v6  ;;  %v13610_v38 = vsel %vm1348_vm5, %v4443_v1, 0.0 }
0x1bdc   :  { %v11444_v12 = vpack.c.bf16 %v4443_v1, %v4442_v54 }
0x1bdd   :  { %v4437_v41 = vpop.permute.xlu1 %4436 }
0x1bde   :  { %v13549_v14 = vsel %vm1343_vm4, %v13542_v10, %v4437_v41  ;;  %11446 = vmatprep.subr.msk.bf16.mxu1 %vm12836_vm13, %v11444_v12  ;;  %v4435_v32 = vpop.permute.xlu0 %4434 }
0x1bdf   :  { %v13555_v7 = vsel %vm1343_vm4, %v13545_v20, %v4435_v32  ;;  %11449 = vmatpush3.bf16.msk.msra.mxu1 %vm12836_vm13, %v11444_v12  ;;  %v13622_v52 = vsel %vm1348_vm5, %v13549_v14, 0.0 }
0x1be0   :  { %v11450_v18 = vpack.c.bf16 %v13549_v14, %v13555_v7  ;;  %v13627_v2 = vsel %vm1348_vm5, %v13555_v7, 0.0 }
0x1be2   :  { %11452 = vmatprep.subr.msk.bf16.mxu1 %vm12836_vm13, %v11450_v18 }
0x1be3   :  { %11455 = vmatpush3.bf16.msk.msra.mxu1 %vm12836_vm13, %v11450_v18 }
0x1be6   :  { %10453 = vmatmul.mubr.msk.f32.vlgmr.msra.gmra.mrb[56].mxu1 %vm785_vm3, %v12868_v22 }
0x1be7   :  { %10455 = vmatprep.mubr.msk.f32.mxu1 %vm785_vm3, %v12871_v25 }
0x1bea   :  { %10456 = vmatmul.mubr.msk.f32.gmra.mrb[58].mxu1 %vm785_vm3, %v12878_v26 }
0x1beb   :  { %10466 = vmatprep.mubr.msk.f32.mxu1 %vm785_vm3, %v12687_v56 }
0x1cb9   :  { %v10454_v40 = vpop.f32.mrb[56].mxu1 }
0x1cba   :  { %4812 = vrot.lane.b32.xlu1 %v10454_v40, %s12245_s12  ;;  %v4516_v48 = vpop.f32.mrb[57].mxu1 }
0x1cbb   :  { %v11456_v63 = vpack.c.bf16 %v10454_v40, %v4516_v48  ;;  %4810 = vrot.lane.b32.xlu0 %v4516_v48, %s12245_s12 }
0x1cbd   :  { %v10457_v15 = vpop.f32.mrb[58].mxu1  ;;  %11457 = vmatprep.subr.bf16.mxu1 %v11456_v63 }
0x1cbe   :  { %11459 = vmatpush3.bf16.msra.mxu1 %v11456_v63  ;;  %4816 = vrot.lane.b32.xlu1 %v10457_v15, %s12245_s12  ;;  %v4526_v21 = vpop.f32.mrb[59].mxu1 }
0x1cbf   :  { %v11460_v31 = vpack.c.bf16 %v10457_v15, %v4526_v21 }
0x1cc1   :  { %11461 = vmatprep.subr.bf16.mxu1 %v11460_v31 }
0x1cc2   :  { %4814 = vrot.lane.b32.xlu1 %v4526_v21, %s12245_s12  ;;  %11463 = vmatpush3.bf16.msra.mxu1 %v11460_v31 }
0x1cc3   :  { %11466 = vmatprep.subr.msk.bf16.mxu1 %vm12836_vm13, %v11444_v12 }
0x1cc5   :  { %10467 = vmatmul.mubr.msk.f32.vlgmr.msra.gmra.mrb[60].mxu1 %vm785_vm3, %v12868_v22 }
0x1cc6   :  { %10469 = vmatprep.mubr.msk.f32.mxu1 %vm785_vm3, %v12871_v25  ;;  %11469 = vmatpush3.bf16.msk.msra.mxu1 %vm12836_vm13, %v11444_v12 }
0x1cc7   :  { %11472 = vmatprep.subr.msk.bf16.mxu1 %vm12836_vm13, %v11450_v18 }
0x1cc9   :  { %10470 = vmatmul.mubr.msk.f32.gmra.mrb[62].mxu1 %vm785_vm3, %v12878_v26 }
0x1cca   :  { %11475 = vmatpush3.bf16.msk.msra.mxu1 %vm12836_vm13, %v11450_v18  ;;  %10480 = vmatprep.mubr.msk.f32.mxu1 %vm785_vm3, %v12773_v61 }
0x1ccb   :  { %11485 = vmatprep.subr.bf16.mxu1 %v12576_v19 }
0x1ccd   :  { %10481 = vmatmul.mubr.msk.f32.vlgmr.msra.gmra.mrb[64].mxu1 %vm785_vm3, %v12907_v43 }
0x1cce   :  { %10483 = vmatprep.mubr.msk.f32.mxu1 %vm785_vm3, %v12910_v59  ;;  %11487 = vmatpush3.bf16.msra.mxu1 %v12576_v19 }
0x1ccf   :  { %11489 = vmatprep.subr.bf16.mxu1 %v12603_v35 }
0x1cd1   :  { %10484 = vmatmul.mubr.msk.f32.gmra.mrb[66].mxu1 %vm785_vm3, %v12919_v60 }
0x1cd2   :  { %11491 = vmatpush3.bf16.msra.mxu1 %v12603_v35  ;;  %v13613_v35 = vsel %vm1348_vm5, %v4442_v54, 0.0 }
0x1cd3   :  { %11493 = vmatprep.subr.bf16.mxu1 %v12621_v45 }
0x1cd6   :  { %11495 = vmatpush3.bf16.msra.mxu1 %v12621_v45 }
0x1cd7   :  { %11497 = vmatprep.subr.bf16.mxu1 %v12635_v57 }
0x1cda   :  { %11499 = vmatpush3.bf16.msra.mxu1 %v12635_v57 }
0x1cdb   :  { %11501 = vmatprep.subr.bf16.mxu1 %v12647_v4 }
0x1cde   :  { %11503 = vmatpush3.bf16.msra.mxu1 %v12647_v4 }
0x1d2c   :  { %v4813_v63 = vpop.permute.xlu1 %4812 }
0x1d2d   :  { %v4811_v15 = vpop.permute.xlu0 %4810 }
0x1d30   :  { %v4817_v21 = vpop.permute.xlu1 %4816 }
0x1d98   :  { %v10468_v19 = vpop.f32.mrb[60].mxu1 }
0x1d99   :  { %v4621_v50 = vmul.f32 2.0, %v10468_v19  ;;  %v4601_v5 = vpop.f32.mrb[61].mxu1  ;;  %v4815_v19 = vpop.permute.xlu1 %4814 }
0x1d9a   :  { %v4620_v37 = vmul.f32 2.0, %v4601_v5 }
0x1d9b   :  { %v4625_v45 = vsub.f32 %v4621_v50, %v13610_v38 }
0x1d9c   :  { %v4624_v39 = vsub.f32 %v4620_v37, %v13613_v35  ;;  %v10471_v55 = vpop.f32.mrb[62].mxu1 }
0x1d9d   :  { %4828 = vrot.lane.b32.xlu1 %v4625_v45, %s12242_s25  ;;  %v4611_v57 = vpop.f32.mrb[63].mxu1  ;;  %v4623_v4 = vmul.f32 2.0, %v10471_v55 }
0x1d9e   :  { %4826 = vrot.lane.b32.xlu0 %v4624_v39, %s12242_s25  ;;  %v4622_v8 = vmul.f32 2.0, %v4611_v57 }
0x1d9f   :  { %v4627_v0 = vsub.f32 %v4623_v4, %v13622_v52  ;;  %v4870_v4 = vsel %vm498_vm2, %v13613_v35, %v4811_v15 }
0x1da0   :  { %v10482_v13 = vpop.f32.mrb[64].mxu1  ;;  %v4626_v1 = vsub.f32 %v4622_v8, %v13627_v2  ;;  %v4871_v8 = vsel %vm498_vm2, %v13610_v38, %v4813_v63 }
0x1da1   :  { %4844 = vrot.lane.b32.xlu1 %v10482_v13, %s12246_s20  ;;  %v4694_v23 = vpop.f32.mrb[65].mxu1 }
0x1da2   :  { %v11476_v29 = vpack.c.bf16 %v10482_v13, %v4694_v23  ;;  %4842 = vrot.lane.b32.xlu0 %v4694_v23, %s12246_s20 }
0x1da4   :  { %v10485_v6 = vpop.f32.mrb[66].mxu1  ;;  %11477 = vmatprep.subr.bf16.mxu0 %v11476_v29 }
0x1da5   :  { %4832 = vrot.lane.b32.xlu1 %v4627_v0, %s12242_s25  ;;  %v4704_v54 = vpop.f32.mrb[67].mxu1  ;;  %11479 = vmatpush3.bf16.msra.mxu0 %v11476_v29 }
0x1da6   :  { %v11480_v12 = vpack.c.bf16 %v10485_v6, %v4704_v54  ;;  %4830 = vrot.lane.b32.xlu0 %v4626_v1, %s12242_s25 }
0x1da8   :  { %11481 = vmatprep.subr.bf16.mxu0 %v11480_v12 }
0x1da9   :  { %4848 = vrot.lane.b32.xlu1 %v10485_v6, %s12246_s20  ;;  %11483 = vmatpush3.bf16.msra.mxu0 %v11480_v12  ;;  %v4872_v12 = vsel %vm498_vm2, %v13627_v2, %v4815_v19 }
0x1daa   :  { %4846 = vrot.lane.b32.xlu0 %v4704_v54, %s12246_s20  ;;  %11505 = vmatprep.subr.bf16.mxu0 %v12540_v3 }
0x1dac   :  { %10495 = vmatmul.mubr.msk.f32.vlgmr.msra.gmra.mrb[66].mxu0 %vm785_vm3, %v12907_v43 }
0x1dad   :  { %10497 = vmatprep.mubr.msk.f32.mxu0 %vm785_vm3, %v12910_v59  ;;  %11507 = vmatpush3.bf16.msra.mxu0 %v12540_v3 }
0x1dae   :  { %11509 = vmatprep.subr.bf16.mxu0 %v12573_v17 }
0x1db0   :  { %10498 = vmatmul.mubr.msk.f32.gmra.mrb[68].mxu0 %vm785_vm3, %v12919_v60 }
0x1db1   :  { %11511 = vmatpush3.bf16.msra.mxu0 %v12573_v17 }
0x1db2   :  { %11513 = vmatprep.subr.bf16.mxu0 %v12588_v24 }
0x1db5   :  { %11515 = vmatpush3.bf16.msra.mxu0 %v12588_v24 }
0x1db6   :  { %11517 = vmatprep.subr.bf16.mxu0 %v12601_v34 }
0x1db9   :  { %11519 = vmatpush3.bf16.msra.mxu0 %v12601_v34 }
0x1dba   :  { %11521 = vmatprep.subr.bf16.mxu0 %v12618_v44 }
0x1dbd   :  { %11523 = vmatpush3.bf16.msra.mxu0 %v12618_v44 }
0x1e0f   :  { %v4829_v5 = vpop.permute.xlu1 %4828 }
0x1e10   :  { %v4827_v31 = vpop.permute.xlu0 %4826  ;;  %v4875_v29 = vsel %vm785_vm3, %v4871_v8, %v4829_v5 }
0x1e11   :  { %v4874_v13 = vsel %vm785_vm3, %v4870_v4, %v4827_v31 }
0x1e13   :  { %v4845_v45 = vpop.permute.xlu1 %4844 }
0x1e14   :  { %v4843_v50 = vpop.permute.xlu0 %4842  ;;  %v4879_v6 = vsel %vm1393_vm8, %v4875_v29, %v4845_v45 }
0x1e15   :  { %v4878_v0 = vsel %vm1393_vm8, %v4874_v13, %v4843_v50 }
0x1e17   :  { %v4833_v55 = vpop.permute.xlu1 %4832 }
0x1e18   :  { %v4831_v37 = vpop.permute.xlu0 %4830 }
0x1e1b   :  { %v4849_v23 = vpop.permute.xlu1 %4848 }
0x1e1c   :  { %v4847_v39 = vpop.permute.xlu0 %4846 }
0x1e7f   :  { %v10496_v3 = vpop.f32.mrb[66].mxu0 }
0x1e80   :  { %v4799_v41 = vmul.f32 2.0, %v10496_v3  ;;  %v4779_v14 = vpop.f32.mrb[67].mxu0  ;;  %v4876_v3 = vsel %vm785_vm3, %v4872_v12, %v4831_v37 }
0x1e81   :  { %v4798_v7 = vmul.f32 2.0, %v4779_v14 }
0x1e82   :  { %v4803_v32 = vsub.f32 %v4799_v41, %v13610_v38  ;;  %v4873_v38 = vsel %vm498_vm2, %v13622_v52, %v4817_v21 }
0x1e83   :  { %v10499_v18 = vpop.f32.mrb[68].mxu0  ;;  %v4802_v24 = vsub.f32 %v4798_v7, %v13613_v35  ;;  %v4877_v14 = vsel %vm785_vm3, %v4873_v38, %v4833_v55 }
0x1e84   :  { %v4801_v17 = vmul.f32 2.0, %v10499_v18  ;;  %v4789_v40 = vpop.f32.mrb[69].mxu0  ;;  %4860 = vrot.lane.b32.xlu0 %v4803_v32, %s12243_s3  ;;  %v4881_v7 = vsel %vm1393_vm8, %v4877_v14, %v4849_v23 }
0x1e85   :  { %v4800_v34 = vmul.f32 2.0, %v4789_v40 }
0x1e86   :  { %v4805_v48 = vsub.f32 %v4801_v17, %v13622_v52 }
0x1e87   :  { %v4804_v44 = vsub.f32 %v4800_v34, %v13627_v2  ;;  %v4880_v2 = vsel %vm1393_vm8, %v4876_v3, %v4847_v39 }
0x1e88   :  { %4864 = vrot.lane.b32.xlu1 %v4805_v48, %s12243_s3  ;;  %4858 = vrot.lane.b32.xlu0 %v4802_v24, %s12243_s3 }
0x1e8c   :  { %4862 = vrot.lane.b32.xlu0 %v4804_v44, %s12243_s3 }
0x1ef6   :  { %v4861_v57 = vpop.permute.xlu0 %4860 }
0x1ef7   :  { %v4883_v35 = vsel %vm1398_vm9, %v4879_v6, %v4861_v57 }
0x1efa   :  { %v4859_v1 = vpop.permute.xlu0 %4858  ;;  %v4865_v41 = vpop.permute.xlu1 %4864 }
0x1efb   :  { %v4882_v54 = vsel %vm1398_vm9, %v4878_v0, %v4859_v1  ;;  %v4885_v17 = vsel %vm1398_vm9, %v4881_v7, %v4865_v41 }
0x1efc   :  { %10520 = vmatprep.mubr.msk.f32.mxu1 %vm1409_vm10, %v4882_v54  ;;  %10546 = vmatprep.mubr.msk.f32.mxu0 %vm1409_vm10, %v4882_v54 }
0x1efd   :  { %10521 = vmatmul.mubr.msk.f32.vlgmr.msra.gmra.mrb[68].mxu1 %vm1409_vm10, %v4883_v35  ;;  %10547 = vmatmul.mubr.msk.f32.vlgmr.msra.gmra.mrb[70].mxu0 %vm1409_vm10, %v4883_v35 }
0x1efe   :  { %v4863_v32 = vpop.permute.xlu0 %4862 }
0x1eff   :  { %v4884_v18 = vsel %vm1398_vm9, %v4880_v2, %v4863_v32 }
0x1f00   :  { %10523 = vmatprep.mubr.msk.f32.mxu1 %vm1409_vm10, %v4884_v18  ;;  %10549 = vmatprep.mubr.msk.f32.mxu0 %vm1409_vm10, %v4884_v18 }
0x1f01   :  { %10524 = vmatmul.mubr.msk.f32.gmra.mrb[70].mxu1 %vm1409_vm10, %v4885_v17  ;;  %10550 = vmatmul.mubr.msk.f32.gmra.mrb[72].mxu0 %vm1409_vm10, %v4885_v17 }
0x1f02   :  { %10560 = vmatprep.mubr.msk.f32.mxu1 %vm785_vm3, %v12687_v56  ;;  %10574 = vmatprep.mubr.msk.f32.mxu0 %vm785_vm3, %v12687_v56 }
0x1fd0   :  { %v10522_v52 = vpop.f32.mrb[68].mxu1  ;;  %v13691_v40 = vpop.f32.mrb[70].mxu0 }
0x1fd1   :  { %v4970_v24 = vadd.f32 %v13351_v27, %v10522_v52  ;;  %v4964_v48 = vpop.f32.mrb[69].mxu1  ;;  %v13694_v34 = vpop.f32.mrb[71].mxu0 }
0x1fd2   :  { %v4965_v44 = vadd.f32 %v13351_v27, %v4964_v48 }
0x1fd3   :  { %v9072_v63 = vmul.f32 -1.442695, %v4970_v24 }
0x1fd4   :  { %v9071_v15 = vmul.f32 -1.442695, %v4965_v44  ;;  %v10525_v21 = vpop.f32.mrb[70].mxu1  ;;  %v13697_v31 = vpop.f32.mrb[72].mxu0 }
0x1fd5   :  { %12055 = vpow2.f32 %v9072_v63  ;;  %v4980_v19 = vadd.f32 %v13351_v27, %v10525_v21  ;;  %v4974_v50 = vpop.f32.mrb[71].mxu1  ;;  %v13700_v5 = vpop.f32.mrb[73].mxu0  ;;  %v5698_v21 = vld [vmem:[%s12437_s27 + $0x8] sm:$0xff] }
0x1fd6   :  { %v4975_v37 = vadd.f32 %v13351_v27, %v4974_v50  ;;  %12057 = vpow2.f32 %v9071_v15  ;;  %v5697_v15 = vld [vmem:[%s12437_s27] sm:$0xff]  ;;  %v5700_v50 = vld [vmem:[%s12437_s27 + $0x18] sm:$0xff] }
0x1fd7   :  { %v9074_v45 = vmul.f32 -1.442695, %v4980_v19  ;;  %v5699_v19 = vld [vmem:[%s12437_s27 + $0x10] sm:$0xff] }
0x1fd8   :  { %v9073_v39 = vmul.f32 -1.442695, %v4975_v37  ;;  %v9115_v37 = vld [vmem:[%s12437_s27 + $0x20] sm:$0xff] }
0x1fd9   :  { %12059 = vpow2.f32 %v9074_v45  ;;  %v9116_v45 = vld [vmem:[%s12437_s27 + $0x28] sm:$0xff] }
0x1fda   :  { %12061 = vpow2.f32 %v9073_v39  ;;  %v9117_v39 = vld [vmem:[%s12437_s27 + $0x30] sm:$0xff] }
0x1fdf   :  { %v12056_v55 = vpop.eup %12055 }
0x1fe0   :  { %v4996_v57 = vadd.f32 1.0, %v12056_v55  ;;  %v12058_v4 = vpop.eup %12057  ;;  %v9118_v55 = vld [vmem:[%s12437_s27 + $0x38] sm:$0xff]  ;;  %s12247_s27 = smov 1  }
0x1fe1   :  { %v4995_v8 = vadd.f32 1.0, %v12058_v4 }
0x1fe2   :  { %12063 = vrcp.f32 %v4996_v57  ;;  %v9124_v57 = vld [vmem:[%s12442_s4 + $0x18] sm:$0xff] }
0x1fe3   :  { %v12060_v13 = vpop.eup %12059  ;;  %12065 = vrcp.f32 %v4995_v8  ;;  %v5798_v8 = vld [vmem:[%s12442_s4] sm:$0xff] }
0x1fe4   :  { %v4998_v23 = vadd.f32 1.0, %v12060_v13  ;;  %v12062_v29 = vpop.eup %12061  ;;  %v5799_v13 = vld [vmem:[%s12442_s4 + $0x8] sm:$0xff] }
0x1fe5   :  { %v4997_v0 = vadd.f32 1.0, %v12062_v29 }
0x1fe6   :  { %12067 = vrcp.f32 %v4998_v23  ;;  %v11596_v23 = vpack.c.bf16 %v5799_v13, %v5798_v8 }
0x1fe7   :  { %12069 = vrcp.f32 %v4997_v0 }
0x1fec   :  { %v12064_v1 = vpop.eup %12063 }
0x1fed   :  { %v5117_v27 = vmul.f32 %v12064_v1, %v13513_v33  ;;  %v12066_v6 = vpop.eup %12065 }
0x1fee   :  { %v5116_v54 = vmul.f32 %v12066_v6, %v13515_v11 }
0x1fef   :  { %5126 = vrot.lane.b32.xlu1 %v5117_v27, %s12244_s19 }
0x1ff0   :  { %v12068_v12 = vpop.eup %12067  ;;  %5124 = vrot.lane.b32.xlu0 %v5116_v54, %s12244_s19 }
0x1ff1   :  { %v5119_v35 = vmul.f32 %v12068_v12, %v13523_v46  ;;  %v12070_v38 = vpop.eup %12069 }
0x1ff2   :  { %v5118_v3 = vmul.f32 %v12070_v38, %v13525_v62 }
0x1ff3   :  { %5130 = vrot.lane.b32.xlu1 %v5119_v35, %s12244_s19 }
0x1ff4   :  { %5128 = vrot.lane.b32.xlu0 %v5118_v3, %s12244_s19 }
0x2061   :  { %v5127_v41 = vpop.permute.xlu1 %5126 }
0x2062   :  { %v13713_v14 = vsel %vm1343_vm4, %v13532_v16, %v5127_v41  ;;  %v5125_v2 = vpop.permute.xlu0 %5124 }
0x2063   :  { %v13717_v32 = vsel %vm1343_vm4, %v13535_v53, %v5125_v2  ;;  %v13819_v27 = vsel %vm1348_vm5, %v13713_v14, 0.0 }
0x2064   :  { %v11524_v7 = vpack.c.bf16 %v13713_v14, %v13717_v32  ;;  %v5140_v54 = vsel %vm1348_vm5, %v13717_v32, 0.0 }
0x2065   :  { %v5131_v18 = vpop.permute.xlu1 %5130 }
0x2066   :  { %v13723_v17 = vsel %vm1343_vm4, %v13542_v10, %v5131_v18  ;;  %11526 = vmatprep.subr.msk.bf16.mxu1 %vm12836_vm13, %v11524_v7  ;;  %v5129_v52 = vpop.permute.xlu0 %5128 }
0x2067   :  { %v13729_v16 = vsel %vm1343_vm4, %v13545_v20, %v5129_v52  ;;  %11529 = vmatpush3.bf16.msk.msra.mxu1 %vm12836_vm13, %v11524_v7  ;;  %v13827_v2 = vsel %vm1348_vm5, %v13723_v17, 0.0 }
0x2068   :  { %v11530_v53 = vpack.c.bf16 %v13723_v17, %v13729_v16  ;;  %v5142_v14 = vsel %vm1348_vm5, %v13729_v16, 0.0 }
0x206a   :  { %11532 = vmatprep.subr.msk.bf16.mxu1 %vm12836_vm13, %v11530_v53 }
0x206b   :  { %11535 = vmatpush3.bf16.msk.msra.mxu1 %vm12836_vm13, %v11530_v53 }
0x206c   :  { %11546 = vmatprep.subr.msk.bf16.mxu1 %vm12836_vm13, %v11524_v7 }
0x206e   :  { %10561 = vmatmul.mubr.msk.f32.vlgmr.msra.gmra.mrb[72].mxu1 %vm785_vm3, %v12868_v22 }
0x206f   :  { %10563 = vmatprep.mubr.msk.f32.mxu1 %vm785_vm3, %v12871_v25  ;;  %11549 = vmatpush3.bf16.msk.msra.mxu1 %vm12836_vm13, %v11524_v7 }
0x2070   :  { %11552 = vmatprep.subr.msk.bf16.mxu1 %vm12836_vm13, %v11530_v53 }
0x2072   :  { %10564 = vmatmul.mubr.msk.f32.gmra.mrb[74].mxu1 %vm785_vm3, %v12878_v26 }
0x2073   :  { %11555 = vmatpush3.bf16.msk.msra.mxu1 %vm12836_vm13, %v11530_v53  ;;  %10588 = vmatprep.mubr.msk.f32.mxu1 %vm785_vm3, %v12773_v61 }
0x2074   :  { %11565 = vmatprep.subr.bf16.mxu1 %v12703_v30 }
0x2076   :  { %10589 = vmatmul.mubr.msk.f32.vlgmr.msra.gmra.mrb[76].mxu1 %vm785_vm3, %v12907_v43 }
0x2077   :  { %10591 = vmatprep.mubr.msk.f32.mxu1 %vm785_vm3, %v12910_v59  ;;  %11567 = vmatpush3.bf16.msra.mxu1 %v12703_v30 }
0x2078   :  { %11569 = vmatprep.subr.bf16.mxu1 %v12707_v36 }
0x207a   :  { %10592 = vmatmul.mubr.msk.f32.gmra.mrb[78].mxu1 %vm785_vm3, %v12919_v60 }
0x207b   :  { %11571 = vmatpush3.bf16.msra.mxu1 %v12707_v36 }
0x207c   :  { %11573 = vmatprep.subr.bf16.mxu1 %v12715_v42 }
0x207f   :  { %11575 = vmatpush3.bf16.msra.mxu1 %v12715_v42 }
0x2080   :  { %11577 = vmatprep.subr.bf16.mxu1 %v12721_v47 }
0x2083   :  { %11579 = vmatpush3.bf16.msra.mxu1 %v12721_v47 }
0x2084   :  { %11581 = vmatprep.subr.bf16.mxu1 %v12728_v58 }
0x2087   :  { %11583 = vmatpush3.bf16.msra.mxu1 %v12728_v58 }
0x2141   :  { %v10562_v30 = vpop.f32.mrb[72].mxu1 }
0x2142   :  { %5506 = vrot.lane.b32.xlu1 %v10562_v30, %s12245_s12  ;;  %v5210_v49 = vpop.f32.mrb[73].mxu1 }
0x2143   :  { %v11536_v10 = vpack.c.bf16 %v10562_v30, %v5210_v49  ;;  %5504 = vrot.lane.b32.xlu0 %v5210_v49, %s12245_s12 }
0x2145   :  { %v10565_v36 = vpop.f32.mrb[74].mxu1  ;;  %11537 = vmatprep.subr.bf16.mxu0 %v11536_v10 }
0x2146   :  { %11539 = vmatpush3.bf16.msra.mxu0 %v11536_v10  ;;  %5510 = vrot.lane.b32.xlu1 %v10565_v36, %s12245_s12  ;;  %v5220_v42 = vpop.f32.mrb[75].mxu1 }
0x2147   :  { %v11540_v20 = vpack.c.bf16 %v10565_v36, %v5220_v42 }
0x2149   :  { %11541 = vmatprep.subr.bf16.mxu0 %v11540_v20  ;;  %v10590_v47 = vpop.f32.mrb[76].mxu1 }
0x214a   :  { %5508 = vrot.lane.b32.xlu1 %v5220_v42, %s12245_s12  ;;  %11543 = vmatpush3.bf16.msra.mxu0 %v11540_v20  ;;  %v5388_v58 = vpop.f32.mrb[77].mxu1 }
0x214b   :  { %v11556_v24 = vpack.c.bf16 %v10590_v47, %v5388_v58  ;;  %5536 = vrot.lane.b32.xlu0 %v5388_v58, %s12246_s20 }
0x214d   :  { %10575 = vmatmul.mubr.msk.f32.vlgmr.msra.gmra.mrb[74].mxu0 %vm785_vm3, %v12868_v22  ;;  %v10593_v48 = vpop.f32.mrb[78].mxu1  ;;  %11557 = vmatprep.subr.bf16.mxu0 %v11556_v24 }
0x214e   :  { %5538 = vrot.lane.b32.xlu1 %v10590_v47, %s12246_s20  ;;  %10577 = vmatprep.mubr.msk.f32.mxu0 %vm785_vm3, %v12871_v25  ;;  %v5398_v44 = vpop.f32.mrb[79].mxu1 }
0x214f   :  { %v11560_v63 = vpack.c.bf16 %v10593_v48, %v5398_v44  ;;  %11559 = vmatpush3.bf16.msra.mxu0 %v11556_v24  ;;  %5540 = vrot.lane.b32.xlu0 %v5398_v44, %s12246_s20 }
0x2151   :  { %10578 = vmatmul.mubr.msk.f32.gmra.mrb[76].mxu0 %vm785_vm3, %v12878_v26  ;;  %11561 = vmatprep.subr.bf16.mxu0 %v11560_v63 }
0x2152   :  { %5542 = vrot.lane.b32.xlu1 %v10593_v48, %s12246_s20  ;;  %10602 = vmatprep.mubr.msk.f32.mxu0 %vm785_vm3, %v12773_v61 }
0x2153   :  { %11563 = vmatpush3.bf16.msra.mxu0 %v11560_v63 }
0x2154   :  { %11585 = vmatprep.subr.bf16.mxu0 %v12484_v51 }
0x2156   :  { %10603 = vmatmul.mubr.msk.f32.vlgmr.msra.gmra.mrb[78].mxu0 %vm785_vm3, %v12907_v43 }
0x2157   :  { %10605 = vmatprep.mubr.msk.f32.mxu0 %vm785_vm3, %v12910_v59  ;;  %11587 = vmatpush3.bf16.msra.mxu0 %v12484_v51 }
0x2158   :  { %11589 = vmatprep.subr.bf16.mxu0 %v12484_v51 }
0x215a   :  { %10606 = vmatmul.mubr.msk.f32.gmra.mrb[80].mxu0 %vm785_vm3, %v12919_v60 }
0x215b   :  { %10638 = vmatprep.mubr.msk.f32.mxu0 %vm498_vm2, %v5697_v15 }
0x215e   :  { %10639 = vmatmul.mubr.msk.f32.vlgmr.msra.gmra.mrb[82].mxu0 %vm498_vm2, %v5698_v21 }
0x215f   :  { %11591 = vmatpush3.bf16.msra.mxu0 %v12484_v51  ;;  %10641 = vmatprep.mubr.msk.f32.mxu0 %vm498_vm2, %v5699_v19  ;;  %v9123_v51 = vld [vmem:[%s12442_s4 + $0x10] sm:$0xff]  ;;  %s14556_s4 = sld [smem:[#allocation15_spill]] }
0x2160   :  { %v11592_v4 = vpack.c.bf16 %v9124_v57, %v9123_v51 }
0x2162   :  { %10642 = vmatmul.mubr.msk.f32.gmra.mrb[84].mxu0 %vm498_vm2, %v5700_v50  ;;  %11593 = vmatprep.subr.bf16.mxu0 %v11592_v4 }
0x2163   :  { %10648 = vmatprep.mubr.msk.f32.mxu0 %vm498_vm2, %v9115_v37 }
0x2166   :  { %10649 = vmatmul.mubr.msk.f32.vlgmr.msra.gmra.mrb[86].mxu0 %vm498_vm2, %v9116_v45 }
0x2167   :  { %10651 = vmatprep.mubr.msk.f32.mxu0 %vm498_vm2, %v9117_v39  ;;  %11595 = vmatpush3.bf16.msra.mxu0 %v11592_v4 }
0x2168   :  { %11597 = vmatprep.subr.bf16.mxu0 %v11596_v23 }
0x216a   :  { %10652 = vmatmul.mubr.msk.f32.gmra.mrb[88].mxu0 %vm498_vm2, %v9118_v55 }
0x21b4   :  { %v5507_v37 = vpop.permute.xlu1 %5506 }
0x21b5   :  { %v5505_v39 = vpop.permute.xlu0 %5504 }
0x21b8   :  { %v5511_v45 = vpop.permute.xlu1 %5510 }
0x21bc   :  { %v5509_v55 = vpop.permute.xlu1 %5508 }
0x21bd   :  { %v5537_v51 = vpop.permute.xlu0 %5536 }
0x21c0   :  { %v5539_v57 = vpop.permute.xlu1 %5538 }
0x21c1   :  { %v5541_v4 = vpop.permute.xlu0 %5540 }
0x21c4   :  { %v5543_v13 = vpop.permute.xlu1 %5542 }
0x2220   :  { %v10576_v29 = vpop.f32.mrb[74].mxu0 }
0x2221   :  { %v5315_v0 = vmul.f32 2.0, %v10576_v29  ;;  %v5295_v1 = vpop.f32.mrb[75].mxu0 }
0x2222   :  { %v5314_v6 = vmul.f32 2.0, %v5295_v1 }
0x2223   :  { %v5319_v12 = vsub.f32 %v5315_v0, %v13819_v27  ;;  %v5564_v0 = vsel %vm498_vm2, %v5140_v54, %v5505_v39 }
0x2224   :  { %v5318_v35 = vsub.f32 %v5314_v6, %v5140_v54  ;;  %v10579_v38 = vpop.f32.mrb[76].mxu0  ;;  %v5565_v6 = vsel %vm498_vm2, %v13819_v27, %v5507_v37 }
0x2225   :  { %v5317_v3 = vmul.f32 2.0, %v10579_v38  ;;  %5522 = vrot.lane.b32.xlu1 %v5319_v12, %s12242_s25  ;;  %v5305_v41 = vpop.f32.mrb[77].mxu0 }
0x2226   :  { %v5316_v7 = vmul.f32 2.0, %v5305_v41  ;;  %5520 = vrot.lane.b32.xlu0 %v5318_v35, %s12242_s25 }
0x2227   :  { %v5321_v32 = vsub.f32 %v5317_v3, %v13827_v2  ;;  %v5566_v3 = vsel %vm498_vm2, %v5142_v14, %v5509_v55 }
0x2228   :  { %v5320_v18 = vsub.f32 %v5316_v7, %v5142_v14 }
0x2229   :  { %v10604_v52 = vpop.f32.mrb[78].mxu0  ;;  %5526 = vrot.lane.b32.xlu1 %v5321_v32, %s12242_s25  ;;  %v5567_v32 = vsel %vm498_vm2, %v13827_v2, %v5511_v45 }
0x222a   :  { %v5493_v53 = vmul.f32 2.0, %v10604_v52  ;;  %v5473_v30 = vpop.f32.mrb[79].mxu0  ;;  %5524 = vrot.lane.b32.xlu0 %v5320_v18, %s12242_s25 }
0x222b   :  { %v5492_v17 = vmul.f32 2.0, %v5473_v30 }
0x222c   :  { %v5497_v49 = vsub.f32 %v5493_v53, %v13819_v27 }
0x222d   :  { %v10607_v10 = vpop.f32.mrb[80].mxu0  ;;  %v5496_v20 = vsub.f32 %v5492_v17, %v5140_v54 }
0x222e   :  { %v5495_v36 = vmul.f32 2.0, %v10607_v10  ;;  %v5483_v42 = vpop.f32.mrb[81].mxu0  ;;  %5554 = vrot.lane.b32.xlu0 %v5497_v49, %s12243_s3 }
0x222f   :  { %v5494_v47 = vmul.f32 2.0, %v5483_v42  ;;  %v5074_v42 = vadd.f32 %v13494_v28, %v13694_v34 }
0x2230   :  { %v5499_v16 = vsub.f32 %v5495_v36, %v13827_v2  ;;  %v5079_v36 = vadd.f32 %v13494_v28, %v13691_v40 }
0x2231   :  { %v10640_v58 = vpop.f32.mrb[82].mxu0  ;;  %v5498_v48 = vsub.f32 %v5494_v47, %v5142_v14 }
0x2232   :  { %5558 = vrot.lane.b32.xlu1 %v5499_v16, %s12243_s3  ;;  %5552 = vrot.lane.b32.xlu0 %v5496_v20, %s12243_s3  ;;  %v5779_v24 = vpop.f32.mrb[83].mxu0  ;;  %v5089_v20 = vadd.f32 %v13494_v28, %v13697_v31  ;;  %v5084_v16 = vadd.f32 %v13494_v28, %v13700_v5  ;;  %v9080_v47 = vmul.f32 -1.442695, %v5079_v36 }
0x2234   :  { %12071 = vpow2.f32 %v9080_v47 }
0x2235   :  { %v10643_v44 = vpop.f32.mrb[84].mxu0 }
0x2236   :  { %5556 = vrot.lane.b32.xlu0 %v5498_v48, %s12243_s3  ;;  %v5789_v63 = vpop.f32.mrb[85].mxu0  ;;  %v9081_v48 = vmul.f32 -1.442695, %v5084_v16 }
0x2239   :  { %v10650_v15 = vpop.f32.mrb[86].mxu0 }
0x223a   :  { %v5883_v21 = vpop.f32.mrb[87].mxu0 }
0x223b   :  { %10658 = vmatprep.mubr.msk.f32.mxu0 %vm498_vm2, %v5883_v21 }
0x223c   :  { %10659 = vmatmul.mubr.msk.f32.vlgmr.msra.gmra.mrb[90].mxu0 %vm498_vm2, %v10650_v15 }
0x223d   :  { %v10653_v19 = vpop.f32.mrb[88].mxu0  ;;  %11599 = vmatpush3.bf16.msra.mxu0 %v11596_v23 }
0x223e   :  { %v5893_v50 = vpop.f32.mrb[89].mxu0 }
0x223f   :  { %10661 = vmatprep.mubr.msk.f32.mxu0 %vm498_vm2, %v5893_v50 }
0x2240   :  { %10662 = vmatmul.mubr.msk.f32.gmra.mrb[92].mxu0 %vm498_vm2, %v10653_v19 }
0x2241   :  { %10668 = vmatprep.mubr.msk.f32.mxu0 %vm498_vm2, %v5779_v24  ;;  %v9082_v24 = vmul.f32 -1.442695, %v5089_v20 }
0x2244   :  { %10669 = vmatmul.mubr.msk.f32.vlgmr.msra.gmra.mrb[90].mxu0 %vm498_vm2, %v10640_v58  ;;  %v9079_v58 = vmul.f32 -1.442695, %v5074_v42 }
0x2245   :  { %10671 = vmatprep.mubr.msk.f32.mxu0 %vm498_vm2, %v5789_v63 }
0x2246   :  { %12073 = vpow2.f32 %v9079_v58 }
0x2247   :  { %12075 = vpow2.f32 %v9082_v24 }
0x2248   :  { %10672 = vmatmul.mubr.msk.f32.gmra.mrb[92].mxu0 %vm498_vm2, %v10643_v44  ;;  %12077 = vpow2.f32 %v9081_v48  ;;  %v12072_v44 = vpop.eup %12071 }
0x2249   :  { %10710 = vmatprep.mubr.msk.f32.mxu0 %vm785_vm3, %v12773_v61  ;;  %v5105_v21 = vadd.f32 1.0, %v12072_v44 }
0x224b   :  { %12079 = vrcp.f32 %v5105_v21 }
0x2250   :  { %v12074_v63 = vpop.eup %12073 }
0x2251   :  { %v12076_v40 = vpop.eup %12075  ;;  %v5104_v34 = vadd.f32 1.0, %v12074_v63 }
0x2252   :  { %v12078_v15 = vpop.eup %12077  ;;  %v5107_v19 = vadd.f32 1.0, %v12076_v40 }
0x2253   :  { %v5106_v50 = vadd.f32 1.0, %v12078_v15  ;;  %12081 = vrcp.f32 %v5104_v34 }
0x2254   :  { %12083 = vrcp.f32 %v5107_v19 }
0x2255   :  { %12085 = vrcp.f32 %v5106_v50 }
0x2297   :  { %v5523_v29 = vpop.permute.xlu1 %5522 }
0x2298   :  { %v5521_v8 = vpop.permute.xlu0 %5520  ;;  %v5569_v35 = vsel %vm785_vm3, %v5565_v6, %v5523_v29 }
0x2299   :  { %v5568_v12 = vsel %vm785_vm3, %v5564_v0, %v5521_v8  ;;  %v5573_v54 = vsel %vm1393_vm8, %v5569_v35, %v5539_v57  ;;  %v12080_v57 = vpop.eup %12079 }
0x229a   :  { %v5572_v41 = vsel %vm1393_vm8, %v5568_v12, %v5537_v51  ;;  %v5682_v6 = vmul.f32 %v12080_v57, %v13513_v33 }
0x229b   :  { %v5527_v38 = vpop.permute.xlu1 %5526 }
0x229c   :  { %v5525_v23 = vpop.permute.xlu0 %5524  ;;  %v5571_v27 = vsel %vm785_vm3, %v5567_v32, %v5527_v38 }
0x229d   :  { %v5570_v18 = vsel %vm785_vm3, %v5566_v3, %v5525_v23  ;;  %v5575_v2 = vsel %vm1393_vm8, %v5571_v27, %v5543_v13  ;;  %v5686_v23 = vsub.f32 1.0, %v12080_v57  ;;  %v1275_v57 = vld [vmem:[%s14556_s4 + $0x10] sm:$0xff] }
0x229e   :  { %v5574_v14 = vsel %vm1393_vm8, %v5570_v18, %v5541_v4  ;;  %v12082_v4 = vpop.eup %12081 }
0x229f   :  { %v12084_v8 = vpop.eup %12083  ;;  %v5685_v0 = vsub.f32 1.0, %v12082_v4  ;;  %v5681_v35 = vmul.f32 %v12082_v4, %v13515_v11  ;;  %v1276_v4 = vld [vmem:[%s14556_s4 + $0x18] sm:$0xff] }
0x22a0   :  { %v5555_v1 = vpop.permute.xlu0 %5554  ;;  %v12086_v13 = vpop.eup %12085 }
0x22a1   :  { %v5577_v53 = vsel %vm1398_vm9, %v5573_v54, %v5555_v1  ;;  %v5687_v32 = vsub.f32 1.0, %v12086_v13  ;;  %v5684_v54 = vmul.f32 %v12084_v8, %v13523_v46  ;;  %v5683_v33 = vmul.f32 %v12086_v13, %v13525_v62 }
0x22a2   :  { %v11644_v13 = vpack.c.bf16 %v1276_v4, %v1275_v57 }
0x22a4   :  { %v5553_v7 = vpop.permute.xlu0 %5552  ;;  %v5559_v30 = vpop.permute.xlu1 %5558 }
0x22a5   :  { %v5576_v52 = vsel %vm1398_vm9, %v5572_v41, %v5553_v7  ;;  %v5579_v10 = vsel %vm1398_vm9, %v5575_v2, %v5559_v30  ;;  %v5688_v41 = vsub.f32 1.0, %v12084_v8 }
0x22a6   :  { %10628 = vmatprep.mubr.msk.f32.mxu1 %vm1409_vm10, %v5576_v52 }
0x22a7   :  { %10629 = vmatmul.mubr.msk.f32.vlgmr.msra.gmra.mrb[80].mxu1 %vm1409_vm10, %v5577_v53 }
0x22a8   :  { %v5557_v49 = vpop.permute.xlu0 %5556 }
0x22a9   :  { %v5578_v17 = vsel %vm1398_vm9, %v5574_v14, %v5557_v49 }
0x22aa   :  { %10631 = vmatprep.mubr.msk.f32.mxu1 %vm1409_vm10, %v5578_v17 }
0x22ab   :  { %10632 = vmatmul.mubr.msk.f32.gmra.mrb[82].mxu1 %vm1409_vm10, %v5579_v10 }
0x22ac   :  { %10682 = vmatprep.mubr.msk.f32.mxu1 %vm785_vm3, %v12687_v56 }
0x2317   :  { %v13905_v30 = vpop.f32.mrb[90].mxu0 }
0x2318   :  { %v13909_v46 = vpop.f32.mrb[91].mxu0 }
0x231b   :  { %v13911_v14 = vpop.f32.mrb[92].mxu0 }
0x231c   :  { %v13913_v49 = vpop.f32.mrb[93].mxu0 }
0x237a   :  { %v10630_v31 = vpop.f32.mrb[80].mxu1 }
0x237b   :  { %v5664_v28 = vadd.f32 %v13505_v9, %v10630_v31  ;;  %v5658_v5 = vpop.f32.mrb[81].mxu1 }
0x237c   :  { %v5659_v37 = vadd.f32 %v13505_v9, %v5658_v5 }
0x237d   :  { %12087 = vtanh.f32 %v5664_v28 }
0x237e   :  { %12089 = vtanh.f32 %v5659_v37  ;;  %v10633_v45 = vpop.f32.mrb[82].mxu1  ;;  %v1273_v37 = vld [vmem:[%s14556_s4] sm:$0xff] }
0x237f   :  { %v5674_v39 = vadd.f32 %v13505_v9, %v10633_v45  ;;  %v5668_v55 = vpop.f32.mrb[83].mxu1  ;;  %v1274_v45 = vld [vmem:[%s14556_s4 + $0x8] sm:$0xff] }
0x2380   :  { %v5669_v51 = vadd.f32 %v13505_v9, %v5668_v55  ;;  %v11640_v55 = vpack.c.bf16 %v1274_v45, %v1273_v37 }
0x2381   :  { %12091 = vtanh.f32 %v5674_v39  ;;  %v1283_v39 = vld [vmem:[%s14557_s23] sm:$0xff] }
0x2382   :  { %12093 = vtanh.f32 %v5669_v51  ;;  %v1284_v51 = vld [vmem:[%s14557_s23 + $0x8] sm:$0xff] }
0x2383   :  { %v11660_v8 = vpack.c.bf16 %v1284_v51, %v1283_v39 }
0x2387   :  { %v12088_v29 = vpop.eup %12087 }
0x2388   :  { %v12090_v1 = vpop.eup %12089  ;;  %v5690_v12 = vmul.f32 %v12088_v29, %v5686_v23  ;;  %v1285_v23 = vld [vmem:[%s14557_s23 + $0x10] sm:$0xff]  ;;  %v1286_v29 = vld [vmem:[%s14557_s23 + $0x18] sm:$0xff] }
0x2389   :  { %v5689_v38 = vmul.f32 %v12090_v1, %v5685_v0  ;;  %v11664_v0 = vpack.c.bf16 %v1286_v29, %v1285_v23  ;;  %v1277_v1 = vld [vmem:[%s14556_s4 + $0x20] sm:$0xff] }
0x238a   :  { %v13889_v3 = vadd.f32 %v5690_v12, %v5682_v6  ;;  %v1278_v6 = vld [vmem:[%s14556_s4 + $0x28] sm:$0xff]  ;;  %v1287_v12 = vld [vmem:[%s14557_s23 + $0x20] sm:$0xff] }
0x238b   :  { %v12092_v9 = vpop.eup %12091  ;;  %v13891_v7 = vadd.f32 %v5689_v38, %v5681_v35  ;;  %v11648_v35 = vpack.c.bf16 %v1278_v6, %v1277_v1  ;;  %v1288_v38 = vld [vmem:[%s14557_s23 + $0x28] sm:$0xff] }
0x238c   :  { %v12094_v18 = vpop.eup %12093  ;;  %6107 = vrot.lane.b32.xlu1 %v13889_v3, %s12247_s27  ;;  %v5692_v52 = vmul.f32 %v12092_v9, %v5688_v41  ;;  %v11668_v41 = vpack.c.bf16 %v1288_v38, %v1287_v12  ;;  %v1279_v9 = vld [vmem:[%s14556_s4 + $0x30] sm:$0xff] }
0x238d   :  { %6105 = vrot.lane.b32.xlu0 %v13891_v7, %s12247_s27  ;;  %v5691_v11 = vmul.f32 %v12094_v18, %v5687_v32  ;;  %v1280_v32 = vld [vmem:[%s14556_s4 + $0x38] sm:$0xff]  ;;  %v1289_v18 = vld [vmem:[%s14557_s23 + $0x30] sm:$0xff] }
0x238e   :  { %v13899_v27 = vadd.f32 %v5692_v52, %v5684_v54  ;;  %v11652_v54 = vpack.c.bf16 %v1280_v32, %v1279_v9  ;;  %v1290_v52 = vld [vmem:[%s14557_s23 + $0x38] sm:$0xff] }
0x238f   :  { %v13901_v53 = vadd.f32 %v5691_v11, %v5683_v33  ;;  %v11672_v33 = vpack.c.bf16 %v1290_v52, %v1289_v18 }
0x2390   :  { %6111 = vrot.lane.b32.xlu1 %v13899_v27, %s12247_s27 }
0x2391   :  { %6109 = vrot.lane.b32.xlu0 %v13901_v53, %s12247_s27 }
0x23fe   :  { %v6108_v62 = vpop.permute.xlu1 %6107 }
0x23ff   :  { %v13916_v2 = vsel %vm1025_vm6, 0.0, %v6108_v62  ;;  %v6106_v17 = vpop.permute.xlu0 %6105 }
0x2400   :  { %v13925_v36 = vsel %vm1025_vm6, 0.0, %v6106_v17 }
0x2401   :  { %v11600_v42 = vpack.c.bf16 %v13916_v2, %v13925_v36 }
0x2402   :  { %v6112_v20 = vpop.permute.xlu1 %6111 }
0x2403   :  { %v13930_v16 = vsel %vm1025_vm6, 0.0, %v6112_v20  ;;  %11602 = vmatprep.subr.msk.bf16.mxu1 %vm13920_vm15, %v11600_v42  ;;  %11622 = vmatprep.subr.msk.bf16.mxu0 %vm13920_vm15, %v11600_v42  ;;  %v6110_v47 = vpop.permute.xlu0 %6109  ;;  %v1282_v20 = vld [vmem:[%s14556_s4 + $0x48] sm:$0xff] }
0x2404   :  { %v13937_v58 = vsel %vm1025_vm6, 0.0, %v6110_v47  ;;  %11605 = vmatpush3.bf16.msk.msra.mxu1 %vm13920_vm15, %v11600_v42  ;;  %11625 = vmatpush3.bf16.msk.msra.mxu0 %vm13920_vm15, %v11600_v42  ;;  %v1281_v42 = vld [vmem:[%s14556_s4 + $0x40] sm:$0xff] }
0x2405   :  { %v11606_v24 = vpack.c.bf16 %v13930_v16, %v13937_v58  ;;  %v1291_v47 = vld [vmem:[%s14557_s23 + $0x40] sm:$0xff] }
0x2407   :  { %11608 = vmatprep.subr.msk.bf16.mxu1 %vm13920_vm15, %v11606_v24  ;;  %11628 = vmatprep.subr.msk.bf16.mxu0 %vm13920_vm15, %v11606_v24 }
0x2408   :  { %11611 = vmatpush3.bf16.msk.msra.mxu1 %vm13920_vm15, %v11606_v24  ;;  %11631 = vmatpush3.bf16.msk.msra.mxu0 %vm13920_vm15, %v11606_v24  ;;  %v6123_v24 = vsel %vm6121_vm14, %v13916_v2, 0.0  ;;  %v6125_v2 = vsel %vm6121_vm14, %v13930_v16, 0.0 }
0x2409   :  { %11641 = vmatprep.subr.bf16.mxu0 %v11640_v55 }
0x240b   :  { %10683 = vmatmul.mubr.msk.f32.vlgmr.msra.gmra.mrb[84].mxu1 %vm785_vm3, %v12868_v22  ;;  %10711 = vmatmul.mubr.msk.f32.vlgmr.msra.gmra.mrb[94].mxu0 %vm785_vm3, %v12907_v43 }
0x240c   :  { %10685 = vmatprep.mubr.msk.f32.mxu1 %vm785_vm3, %v12871_v25  ;;  %10713 = vmatprep.mubr.msk.f32.mxu0 %vm785_vm3, %v12910_v59 }
0x240d   :  { %11643 = vmatpush3.bf16.msra.mxu0 %v11640_v55 }
0x240e   :  { %11645 = vmatprep.subr.bf16.mxu0 %v11644_v13 }
0x240f   :  { %10686 = vmatmul.mubr.msk.f32.gmra.mrb[86].mxu1 %vm785_vm3, %v12878_v26  ;;  %10714 = vmatmul.mubr.msk.f32.gmra.mrb[96].mxu0 %vm785_vm3, %v12919_v60 }
0x2410   :  { %10696 = vmatprep.mubr.msk.f32.mxu1 %vm785_vm3, %v12687_v56 }
0x2411   :  { %11647 = vmatpush3.bf16.msra.mxu0 %v11644_v13 }
0x2412   :  { %11649 = vmatprep.subr.bf16.mxu0 %v11648_v35 }
0x2415   :  { %11651 = vmatpush3.bf16.msra.mxu0 %v11648_v35 }
0x2416   :  { %11653 = vmatprep.subr.bf16.mxu0 %v11652_v54 }
0x2419   :  { %11655 = vmatpush3.bf16.msra.mxu0 %v11652_v54 }
0x24de   :  { %v10684_v48 = vpop.f32.mrb[84].mxu1  ;;  %v10712_v44 = vpop.f32.mrb[94].mxu0 }
0x24df   :  { %v6370_v63 = vpop.f32.mrb[95].mxu0  ;;  %6488 = vrot.lane.b32.xlu1 %v10684_v48, %s12245_s12  ;;  %v6192_v40 = vpop.f32.mrb[85].mxu1 }
0x24e0   :  { %v11632_v15 = vpack.c.bf16 %v10712_v44, %v6370_v63  ;;  %v11612_v21 = vpack.c.bf16 %v10684_v48, %v6192_v40  ;;  %6486 = vrot.lane.b32.xlu0 %v6192_v40, %s12245_s12  ;;  %v6122_v40 = vsel %vm6121_vm14, %v13925_v36, 0.0  ;;  %v6124_v36 = vsel %vm6121_vm14, %v13937_v58, 0.0 }
0x24e2   :  { %v10687_v34 = vpop.f32.mrb[86].mxu1  ;;  %11613 = vmatprep.subr.bf16.mxu1 %v11612_v21  ;;  %v10715_v19 = vpop.f32.mrb[96].mxu0 }
0x24e3   :  { %v6380_v50 = vpop.f32.mrb[97].mxu0  ;;  %6520 = vrot.lane.b32.xlu1 %v10712_v44, %s12246_s20  ;;  %v6202_v31 = vpop.f32.mrb[87].mxu1  ;;  %11615 = vmatpush3.bf16.msra.mxu1 %v11612_v21  ;;  %v11656_v44 = vpack.c.bf16 %v1282_v20, %v1281_v42 }
0x24e4   :  { %v11636_v28 = vpack.c.bf16 %v10715_v19, %v6380_v50  ;;  %v11616_v5 = vpack.c.bf16 %v10687_v34, %v6202_v31  ;;  %6518 = vrot.lane.b32.xlu0 %v6370_v63, %s12246_s20  ;;  %v1292_v63 = vld [vmem:[%s14557_s23 + $0x48] sm:$0xff] }
0x24e5   :  { %v11676_v21 = vpack.c.bf16 %v1292_v63, %v1291_v47  ;;  %11657 = vmatprep.subr.bf16.mxu0 %v11656_v44 }
0x24e6   :  { %11617 = vmatprep.subr.bf16.mxu1 %v11616_v5  ;;  %11659 = vmatpush3.bf16.msra.mxu0 %v11656_v44 }
0x24e7   :  { %6492 = vrot.lane.b32.xlu1 %v10687_v34, %s12245_s12  ;;  %11619 = vmatpush3.bf16.msra.mxu1 %v11616_v5 }
0x24e8   :  { %6522 = vrot.lane.b32.xlu0 %v6380_v50, %s12246_s20  ;;  %11633 = vmatprep.subr.bf16.mxu1 %v11632_v15 }
0x24ea   :  { %10697 = vmatmul.mubr.msk.f32.vlgmr.msra.gmra.mrb[88].mxu1 %vm785_vm3, %v12868_v22 }
0x24eb   :  { %6524 = vrot.lane.b32.xlu1 %v10715_v19, %s12246_s20  ;;  %10699 = vmatprep.mubr.msk.f32.mxu1 %vm785_vm3, %v12871_v25 }
0x24ec   :  { %11635 = vmatpush3.bf16.msra.mxu1 %v11632_v15 }
0x24ed   :  { %11637 = vmatprep.subr.bf16.mxu1 %v11636_v28 }
0x24ee   :  { %10700 = vmatmul.mubr.msk.f32.gmra.mrb[90].mxu1 %vm785_vm3, %v12878_v26 }
0x24ef   :  { %6490 = vrot.lane.b32.xlu1 %v6202_v31, %s12245_s12  ;;  %10724 = vmatprep.mubr.msk.f32.mxu1 %vm785_vm3, %v12773_v61 }
0x24f0   :  { %11639 = vmatpush3.bf16.msra.mxu1 %v11636_v28 }
0x24f1   :  { %11661 = vmatprep.subr.bf16.mxu1 %v11660_v8 }
0x24f3   :  { %10725 = vmatmul.mubr.msk.f32.vlgmr.msra.gmra.mrb[92].mxu1 %vm785_vm3, %v12907_v43 }
0x24f4   :  { %10727 = vmatprep.mubr.msk.f32.mxu1 %vm785_vm3, %v12910_v59  ;;  %11663 = vmatpush3.bf16.msra.mxu1 %v11660_v8 }
0x24f5   :  { %11665 = vmatprep.subr.bf16.mxu1 %v11664_v0 }
0x24f7   :  { %10728 = vmatmul.mubr.msk.f32.gmra.mrb[94].mxu1 %vm785_vm3, %v12919_v60 }
0x24f8   :  { %11667 = vmatpush3.bf16.msra.mxu1 %v11664_v0 }
0x24f9   :  { %11669 = vmatprep.subr.bf16.mxu1 %v11668_v41 }
0x24fc   :  { %11671 = vmatpush3.bf16.msra.mxu1 %v11668_v41 }
0x24fd   :  { %11673 = vmatprep.subr.bf16.mxu1 %v11672_v33 }
0x2500   :  { %11675 = vmatpush3.bf16.msra.mxu1 %v11672_v33 }
0x2501   :  { %11677 = vmatprep.subr.bf16.mxu1 %v11676_v21 }
0x2504   :  { %11679 = vmatpush3.bf16.msra.mxu1 %v11676_v21 }
0x2551   :  { %v6489_v0 = vpop.permute.xlu1 %6488 }
0x2552   :  { %v6487_v6 = vpop.permute.xlu0 %6486 }
0x2553   :  { %v6546_v52 = vsel %vm498_vm2, %v6122_v40, %v6487_v6 }
0x2555   :  { %v6521_v1 = vpop.permute.xlu1 %6520 }
0x2556   :  { %v6519_v35 = vpop.permute.xlu0 %6518 }
0x2559   :  { %v6493_v12 = vpop.permute.xlu1 %6492 }
0x255a   :  { %v6523_v41 = vpop.permute.xlu0 %6522  ;;  %v6549_v44 = vsel %vm498_vm2, %v6125_v2, %v6493_v12 }
0x255d   :  { %v6525_v38 = vpop.permute.xlu1 %6524 }
0x2561   :  { %v6491_v32 = vpop.permute.xlu1 %6490 }
0x2562   :  { %v6548_v20 = vsel %vm498_vm2, %v6124_v36, %v6491_v32 }
0x25bd   :  { %v10698_v11 = vpop.f32.mrb[88].mxu1 }
0x25be   :  { %v6297_v62 = vmul.f32 2.0, %v10698_v11  ;;  %v6277_v17 = vpop.f32.mrb[89].mxu1  ;;  %v6547_v11 = vsel %vm498_vm2, %v6123_v24, %v6489_v0 }
0x25bf   :  { %v6296_v48 = vmul.f32 2.0, %v6277_v17 }
0x25c0   :  { %v6301_v15 = vsub.f32 %v6297_v62, %v6123_v24 }
0x25c1   :  { %v6300_v34 = vsub.f32 %v6296_v48, %v6122_v40  ;;  %v10701_v19 = vpop.f32.mrb[90].mxu1 }
0x25c2   :  { %v6299_v50 = vmul.f32 2.0, %v10701_v19  ;;  %6504 = vrot.lane.b32.xlu1 %v6301_v15, %s12242_s25  ;;  %v6287_v31 = vpop.f32.mrb[91].mxu1 }
0x25c3   :  { %v6298_v28 = vmul.f32 2.0, %v6287_v31  ;;  %6502 = vrot.lane.b32.xlu0 %v6300_v34, %s12242_s25 }
0x25c4   :  { %v6303_v5 = vsub.f32 %v6299_v50, %v6125_v2 }
0x25c5   :  { %v6302_v37 = vsub.f32 %v6298_v28, %v6124_v36 }
0x25c6   :  { %v10726_v45 = vpop.f32.mrb[92].mxu1  ;;  %6508 = vrot.lane.b32.xlu1 %v6303_v5, %s12242_s25 }
0x25c7   :  { %v6475_v39 = vmul.f32 2.0, %v10726_v45  ;;  %v6455_v55 = vpop.f32.mrb[93].mxu1  ;;  %6506 = vrot.lane.b32.xlu0 %v6302_v37, %s12242_s25 }
0x25c8   :  { %v6474_v57 = vmul.f32 2.0, %v6455_v55 }
0x25c9   :  { %v6479_v51 = vsub.f32 %v6475_v39, %v6123_v24 }
0x25ca   :  { %v10729_v16 = vpop.f32.mrb[94].mxu1  ;;  %v6478_v13 = vsub.f32 %v6474_v57, %v6122_v40 }
0x25cb   :  { %v6477_v4 = vmul.f32 2.0, %v10729_v16  ;;  %v6465_v8 = vpop.f32.mrb[95].mxu1  ;;  %6536 = vrot.lane.b32.xlu0 %v6479_v51, %s12243_s3 }
0x25cc   :  { %v6476_v58 = vmul.f32 2.0, %v6465_v8 }
0x25cd   :  { %v6481_v23 = vsub.f32 %v6477_v4, %v6125_v2 }
0x25ce   :  { %v6480_v29 = vsub.f32 %v6476_v58, %v6124_v36  ;;  %v9157_v36 = vld [vmem:[%s14558_s22] ss:$0 sm:$0xff] }
0x25cf   :  { %6540 = vrot.lane.b32.xlu1 %v6481_v23, %s12243_s3  ;;  %6534 = vrot.lane.b32.xlu0 %v6478_v13, %s12243_s3 }
0x25d3   :  { %6538 = vrot.lane.b32.xlu0 %v6480_v29, %s12243_s3 }
0x2634   :  { %v6505_v54 = vpop.permute.xlu1 %6504 }
0x2635   :  { %v6503_v9 = vpop.permute.xlu0 %6502  ;;  %v6551_v17 = vsel %vm785_vm3, %v6547_v11, %v6505_v54 }
0x2636   :  { %v6550_v62 = vsel %vm785_vm3, %v6546_v52, %v6503_v9  ;;  %v6555_v15 = vsel %vm1393_vm8, %v6551_v17, %v6521_v1 }
0x2637   :  { %v6554_v47 = vsel %vm1393_vm8, %v6550_v62, %v6519_v35 }
0x2638   :  { %v6509_v42 = vpop.permute.xlu1 %6508 }
0x2639   :  { %v6507_v18 = vpop.permute.xlu0 %6506  ;;  %v6553_v24 = vsel %vm785_vm3, %v6549_v44, %v6509_v42 }
0x263a   :  { %v6552_v63 = vsel %vm785_vm3, %v6548_v20, %v6507_v18  ;;  %v6557_v31 = vsel %vm1393_vm8, %v6553_v24, %v6525_v38 }
0x263b   :  { %v6556_v19 = vsel %vm1393_vm8, %v6552_v63, %v6523_v41 }
0x263d   :  { %v6537_v33 = vpop.permute.xlu0 %6536 }
0x263e   :  { %v6559_v21 = vsel %vm1398_vm9, %v6555_v15, %v6537_v33 }
0x2641   :  { %v6535_v48 = vpop.permute.xlu0 %6534  ;;  %v6541_v34 = vpop.permute.xlu1 %6540 }
0x2642   :  { %v6558_v40 = vsel %vm1398_vm9, %v6554_v47, %v6535_v48  ;;  %v6561_v28 = vsel %vm1398_vm9, %v6557_v31, %v6541_v34 }
0x2643   :  { %10750 = vmatprep.mubr.msk.f32.mxu0 %vm1409_vm10, %v6558_v40  ;;  %10776 = vmatprep.mubr.msk.f32.mxu1 %vm1409_vm10, %v6558_v40 }
0x2644   :  { %10751 = vmatmul.mubr.msk.f32.vlgmr.msra.gmra.mrb[98].mxu0 %vm1409_vm10, %v6559_v21  ;;  %10777 = vmatmul.mubr.msk.f32.vlgmr.msra.gmra.mrb[96].mxu1 %vm1409_vm10, %v6559_v21 }
0x2645   :  { %v6539_v50 = vpop.permute.xlu0 %6538 }
0x2646   :  { %v6560_v2 = vsel %vm1398_vm9, %v6556_v19, %v6539_v50 }
0x2647   :  { %10753 = vmatprep.mubr.msk.f32.mxu0 %vm1409_vm10, %v6560_v2  ;;  %10779 = vmatprep.mubr.msk.f32.mxu1 %vm1409_vm10, %v6560_v2 }
0x2648   :  { %10754 = vmatmul.mubr.msk.f32.gmra.mrb[100].mxu0 %vm1409_vm10, %v6561_v28  ;;  %10780 = vmatmul.mubr.msk.f32.gmra.mrb[98].mxu1 %vm1409_vm10, %v6561_v28 }
0x2649   :  { %10790 = vmatprep.mubr.msk.f32.mxu0 %vm785_vm3, %v12687_v56  ;;  %10804 = vmatprep.mubr.msk.f32.mxu1 %vm785_vm3, %v12687_v56 }
0x2717   :  { %v10752_v5 = vpop.f32.mrb[98].mxu0  ;;  %v14054_v37 = vpop.f32.mrb[96].mxu1 }
0x2718   :  { %v6652_v45 = vadd.f32 %v10752_v5, %v9157_v36  ;;  %v6646_v39 = vpop.f32.mrb[99].mxu0  ;;  %v14056_v55 = vpop.f32.mrb[97].mxu1 }
0x2719   :  { %v6647_v51 = vadd.f32 %v9157_v36, %v6646_v39 }
0x271a   :  { %v9163_v57 = vmul.f32 -1.442695, %v6652_v45 }
0x271b   :  { %v9162_v16 = vmul.f32 -1.442695, %v6647_v51  ;;  %v10755_v4 = vpop.f32.mrb[100].mxu0  ;;  %v14058_v8 = vpop.f32.mrb[98].mxu1 }
0x271c   :  { %12095 = vpow2.f32 %v9163_v57  ;;  %v6662_v13 = vadd.f32 %v10755_v4, %v9157_v36  ;;  %v6656_v23 = vpop.f32.mrb[101].mxu0  ;;  %v14060_v58 = vpop.f32.mrb[99].mxu1  ;;  %v1293_v4 = vld [vmem:[%s14559_s26] sm:$0xff] }
0x271d   :  { %v6657_v29 = vadd.f32 %v9157_v36, %v6656_v23  ;;  %12097 = vpow2.f32 %v9162_v16  ;;  %v1295_v23 = vld [vmem:[%s14559_s26 + $0x10] sm:$0xff] }
0x271e   :  { %v9165_v0 = vmul.f32 -1.442695, %v6662_v13  ;;  %v1294_v13 = vld [vmem:[%s14559_s26 + $0x8] sm:$0xff] }
0x271f   :  { %v9164_v1 = vmul.f32 -1.442695, %v6657_v29  ;;  %v11720_v29 = vpack.c.bf16 %v1294_v13, %v1293_v4 }
0x2720   :  { %12099 = vpow2.f32 %v9165_v0  ;;  %v1296_v0 = vld [vmem:[%s14559_s26 + $0x18] sm:$0xff] }
0x2721   :  { %12101 = vpow2.f32 %v9164_v1  ;;  %v11724_v1 = vpack.c.bf16 %v1296_v0, %v1295_v23 }
0x2726   :  { %v12096_v6 = vpop.eup %12095 }
0x2727   :  { %v6678_v12 = vadd.f32 1.0, %v12096_v6  ;;  %v12098_v35 = vpop.eup %12097  ;;  %v1297_v6 = vld [vmem:[%s14559_s26 + $0x20] sm:$0xff] }
0x2728   :  { %v6677_v38 = vadd.f32 1.0, %v12098_v35 }
0x2729   :  { %12103 = vrcp.f32 %v6678_v12  ;;  %v1298_v12 = vld [vmem:[%s14559_s26 + $0x28] sm:$0xff] }
0x272a   :  { %v12100_v41 = vpop.eup %12099  ;;  %12105 = vrcp.f32 %v6677_v38  ;;  %v11728_v35 = vpack.c.bf16 %v1298_v12, %v1297_v6  ;;  %v1299_v38 = vld [vmem:[%s14559_s26 + $0x30] sm:$0xff] }
0x272b   :  { %v6680_v9 = vadd.f32 1.0, %v12100_v41  ;;  %v12102_v32 = vpop.eup %12101  ;;  %v1300_v41 = vld [vmem:[%s14559_s26 + $0x38] sm:$0xff] }
0x272c   :  { %v6679_v18 = vadd.f32 1.0, %v12102_v32 }
0x272d   :  { %12107 = vrcp.f32 %v6680_v9  ;;  %v11732_v9 = vpack.c.bf16 %v1300_v41, %v1299_v38 }
0x272e   :  { %12109 = vrcp.f32 %v6679_v18 }
0x2733   :  { %v12104_v54 = vpop.eup %12103 }
0x2734   :  { %v6805_v52 = vmul.f32 %v12104_v54, %v13889_v3  ;;  %v12106_v33 = vpop.eup %12105 }
0x2735   :  { %v6804_v11 = vmul.f32 %v12106_v33, %v13891_v7  ;;  %v1302_v33 = vld [vmem:[%s14559_s26 + $0x48] sm:$0xff] }
0x2736   :  { %6814 = vrot.lane.b32.xlu1 %v6805_v52, %s12247_s27  ;;  %v1301_v52 = vld [vmem:[%s14559_s26 + $0x40] sm:$0xff] }
0x2737   :  { %v12108_v62 = vpop.eup %12107  ;;  %6812 = vrot.lane.b32.xlu0 %v6804_v11, %s12247_s27 }
0x2738   :  { %v6807_v17 = vmul.f32 %v12108_v62, %v13899_v27  ;;  %v12110_v42 = vpop.eup %12109 }
0x2739   :  { %v6806_v20 = vmul.f32 %v12110_v42, %v13901_v53 }
0x273a   :  { %6818 = vrot.lane.b32.xlu1 %v6807_v17, %s12247_s27  ;;  %v11736_v17 = vpack.c.bf16 %v1302_v33, %v1301_v52 }
0x273b   :  { %6816 = vrot.lane.b32.xlu0 %v6806_v20, %s12247_s27 }
0x27a8   :  { %v6815_v47 = vpop.permute.xlu1 %6814 }
0x27a9   :  { %v14071_v48 = vsel %vm1025_vm6, 0.0, %v6815_v47  ;;  %v6813_v44 = vpop.permute.xlu0 %6812 }
0x27aa   :  { %v14074_v63 = vsel %vm1025_vm6, 0.0, %v6813_v44  ;;  %v6829_v11 = vsel %vm6121_vm14, %v14071_v48, 0.0 }
0x27ab   :  { %v11680_v15 = vpack.c.bf16 %v14071_v48, %v14074_v63  ;;  %v6828_v42 = vsel %vm6121_vm14, %v14074_v63, 0.0 }
0x27ac   :  { %v6819_v40 = vpop.permute.xlu1 %6818 }
0x27ad   :  { %v14079_v24 = vsel %vm1025_vm6, 0.0, %v6819_v40  ;;  %11682 = vmatprep.subr.msk.bf16.mxu0 %vm13920_vm15, %v11680_v15  ;;  %v6817_v21 = vpop.permute.xlu0 %6816 }
0x27ae   :  { %v14084_v34 = vsel %vm1025_vm6, 0.0, %v6817_v21  ;;  %11685 = vmatpush3.bf16.msk.msra.mxu0 %vm13920_vm15, %v11680_v15  ;;  %v6831_v21 = vsel %vm6121_vm14, %v14079_v24, 0.0 }
0x27af   :  { %v11686_v19 = vpack.c.bf16 %v14079_v24, %v14084_v34  ;;  %v6830_v48 = vsel %vm6121_vm14, %v14084_v34, 0.0 }
0x27b1   :  { %11688 = vmatprep.subr.msk.bf16.mxu0 %vm13920_vm15, %v11686_v19 }
0x27b2   :  { %11691 = vmatpush3.bf16.msk.msra.mxu0 %vm13920_vm15, %v11686_v19 }
0x27b3   :  { %11702 = vmatprep.subr.msk.bf16.mxu0 %vm13920_vm15, %v11680_v15 }
0x27b5   :  { %10791 = vmatmul.mubr.msk.f32.vlgmr.msra.gmra.mrb[102].mxu0 %vm785_vm3, %v12868_v22 }
0x27b6   :  { %10793 = vmatprep.mubr.msk.f32.mxu0 %vm785_vm3, %v12871_v25  ;;  %11705 = vmatpush3.bf16.msk.msra.mxu0 %vm13920_vm15, %v11680_v15 }
0x27b7   :  { %11708 = vmatprep.subr.msk.bf16.mxu0 %vm13920_vm15, %v11686_v19 }
0x27b9   :  { %10794 = vmatmul.mubr.msk.f32.gmra.mrb[104].mxu0 %vm785_vm3, %v12878_v26 }
0x27ba   :  { %11711 = vmatpush3.bf16.msk.msra.mxu0 %vm13920_vm15, %v11686_v19  ;;  %10818 = vmatprep.mubr.msk.f32.mxu0 %vm785_vm3, %v12773_v61 }
0x27bb   :  { %11721 = vmatprep.subr.bf16.mxu0 %v11720_v29 }
0x27bd   :  { %10819 = vmatmul.mubr.msk.f32.vlgmr.msra.gmra.mrb[106].mxu0 %vm785_vm3, %v12907_v43 }
0x27be   :  { %10821 = vmatprep.mubr.msk.f32.mxu0 %vm785_vm3, %v12910_v59  ;;  %11723 = vmatpush3.bf16.msra.mxu0 %v11720_v29 }
0x27bf   :  { %11725 = vmatprep.subr.bf16.mxu0 %v11724_v1 }
0x27c1   :  { %10822 = vmatmul.mubr.msk.f32.gmra.mrb[108].mxu0 %vm785_vm3, %v12919_v60 }
0x27c2   :  { %11727 = vmatpush3.bf16.msra.mxu0 %v11724_v1 }
0x27c3   :  { %11729 = vmatprep.subr.bf16.mxu0 %v11728_v35 }
0x27c6   :  { %11731 = vmatpush3.bf16.msra.mxu0 %v11728_v35 }
0x27c7   :  { %11733 = vmatprep.subr.bf16.mxu0 %v11732_v9 }
0x27ca   :  { %11735 = vmatpush3.bf16.msra.mxu0 %v11732_v9 }
0x27cb   :  { %11737 = vmatprep.subr.bf16.mxu0 %v11736_v17 }
0x27ce   :  { %11739 = vmatpush3.bf16.msra.mxu0 %v11736_v17 }
0x2888   :  { %v10792_v50 = vpop.f32.mrb[102].mxu0 }
0x2889   :  { %7194 = vrot.lane.b32.xlu1 %v10792_v50, %s12245_s12  ;;  %v6898_v31 = vpop.f32.mrb[103].mxu0 }
0x288a   :  { %v11692_v2 = vpack.c.bf16 %v10792_v50, %v6898_v31  ;;  %7192 = vrot.lane.b32.xlu0 %v6898_v31, %s12245_s12 }
0x288c   :  { %v10795_v10 = vpop.f32.mrb[104].mxu0  ;;  %11693 = vmatprep.subr.bf16.mxu1 %v11692_v2 }
0x288d   :  { %11695 = vmatpush3.bf16.msra.mxu1 %v11692_v2  ;;  %7198 = vrot.lane.b32.xlu1 %v10795_v10, %s12245_s12  ;;  %v6908_v28 = vpop.f32.mrb[105].mxu0 }
0x288e   :  { %v11696_v36 = vpack.c.bf16 %v10795_v10, %v6908_v28 }
0x2890   :  { %11697 = vmatprep.subr.bf16.mxu1 %v11696_v36  ;;  %v10820_v5 = vpop.f32.mrb[106].mxu0 }
0x2891   :  { %7196 = vrot.lane.b32.xlu1 %v6908_v28, %s12245_s12  ;;  %11699 = vmatpush3.bf16.msra.mxu1 %v11696_v36  ;;  %v7076_v45 = vpop.f32.mrb[107].mxu0 }
0x2892   :  { %v11712_v39 = vpack.c.bf16 %v10820_v5, %v7076_v45  ;;  %7224 = vrot.lane.b32.xlu0 %v7076_v45, %s12246_s20 }
0x2894   :  { %10805 = vmatmul.mubr.msk.f32.vlgmr.msra.gmra.mrb[100].mxu1 %vm785_vm3, %v12868_v22  ;;  %v10823_v51 = vpop.f32.mrb[108].mxu0  ;;  %11713 = vmatprep.subr.bf16.mxu1 %v11712_v39 }
0x2895   :  { %7226 = vrot.lane.b32.xlu1 %v10820_v5, %s12246_s20  ;;  %10807 = vmatprep.mubr.msk.f32.mxu1 %vm785_vm3, %v12871_v25  ;;  %v7086_v57 = vpop.f32.mrb[109].mxu0 }
0x2896   :  { %v11716_v16 = vpack.c.bf16 %v10823_v51, %v7086_v57  ;;  %11715 = vmatpush3.bf16.msra.mxu1 %v11712_v39  ;;  %7228 = vrot.lane.b32.xlu0 %v7086_v57, %s12246_s20 }
0x2898   :  { %10808 = vmatmul.mubr.msk.f32.gmra.mrb[102].mxu1 %vm785_vm3, %v12878_v26  ;;  %11717 = vmatprep.subr.bf16.mxu1 %v11716_v16 }
0x2899   :  { %7230 = vrot.lane.b32.xlu1 %v10823_v51, %s12246_s20  ;;  %10832 = vmatprep.mubr.msk.f32.mxu1 %vm785_vm3, %v12773_v61 }
0x289a   :  { %11719 = vmatpush3.bf16.msra.mxu1 %v11716_v16 }
0x289d   :  { %10833 = vmatmul.mubr.msk.f32.vlgmr.msra.gmra.mrb[104].mxu1 %vm785_vm3, %v12907_v43 }
0x289e   :  { %10835 = vmatprep.mubr.msk.f32.mxu1 %vm785_vm3, %v12910_v59 }
0x28a1   :  { %10836 = vmatmul.mubr.msk.f32.gmra.mrb[106].mxu1 %vm785_vm3, %v12919_v60 }
0x28a2   :  { %10872 = vmatprep.mubr.msk.f32.mxu1 %vm785_vm3, %v12687_v56 }
0x28fb   :  { %v7195_v16 = vpop.permute.xlu1 %7194 }
0x28fc   :  { %v7193_v13 = vpop.permute.xlu0 %7192 }
0x28fd   :  { %v7252_v41 = vsel %vm498_vm2, %v6828_v42, %v7193_v13 }
0x28ff   :  { %v7199_v4 = vpop.permute.xlu1 %7198 }
0x2903   :  { %v7197_v23 = vpop.permute.xlu1 %7196 }
0x2904   :  { %v7225_v29 = vpop.permute.xlu0 %7224  ;;  %v7254_v33 = vsel %vm498_vm2, %v6830_v48, %v7197_v23 }
0x2907   :  { %v7227_v0 = vpop.permute.xlu1 %7226 }
0x2908   :  { %v7229_v1 = vpop.permute.xlu0 %7228 }
0x290b   :  { %v7231_v12 = vpop.permute.xlu1 %7230 }
0x2967   :  { %v10806_v32 = vpop.f32.mrb[100].mxu1 }
0x2968   :  { %v7003_v18 = vmul.f32 2.0, %v10806_v32  ;;  %v6983_v54 = vpop.f32.mrb[101].mxu1  ;;  %v7253_v32 = vsel %vm498_vm2, %v6829_v11, %v7195_v16 }
0x2969   :  { %v7002_v62 = vmul.f32 2.0, %v6983_v54 }
0x296a   :  { %v7007_v20 = vsub.f32 %v7003_v18, %v6829_v11 }
0x296b   :  { %v7006_v47 = vsub.f32 %v7002_v62, %v6828_v42  ;;  %v10809_v44 = vpop.f32.mrb[102].mxu1 }
0x296c   :  { %v7005_v15 = vmul.f32 2.0, %v10809_v44  ;;  %7210 = vrot.lane.b32.xlu1 %v7007_v20, %s12242_s25  ;;  %v6993_v40 = vpop.f32.mrb[103].mxu1  ;;  %v7255_v20 = vsel %vm498_vm2, %v6831_v21, %v7199_v4 }
0x296d   :  { %v7004_v19 = vmul.f32 2.0, %v6993_v40  ;;  %7208 = vrot.lane.b32.xlu0 %v7006_v47, %s12242_s25 }
0x296e   :  { %v7009_v50 = vsub.f32 %v7005_v15, %v6831_v21 }
0x296f   :  { %v7008_v63 = vsub.f32 %v7004_v19, %v6830_v48 }
0x2970   :  { %v10834_v31 = vpop.f32.mrb[104].mxu1  ;;  %7214 = vrot.lane.b32.xlu1 %v7009_v50, %s12242_s25 }
0x2971   :  { %v7181_v2 = vmul.f32 2.0, %v10834_v31  ;;  %v7161_v10 = vpop.f32.mrb[105].mxu1  ;;  %7212 = vrot.lane.b32.xlu0 %v7008_v63, %s12242_s25  ;;  %v9166_v31 = vld [vmem:[%s14560_s28] ss:$0 sm:$0xff] }
0x2972   :  { %v7180_v36 = vmul.f32 2.0, %v7161_v10  ;;  %v6762_v10 = vadd.f32 %v9166_v31, %v14056_v55 }
0x2973   :  { %v7185_v28 = vsub.f32 %v7181_v2, %v6829_v11  ;;  %v6767_v2 = vadd.f32 %v14054_v37, %v9166_v31 }
0x2974   :  { %v10837_v5 = vpop.f32.mrb[106].mxu1  ;;  %v7184_v39 = vsub.f32 %v7180_v36, %v6828_v42  ;;  %v6772_v36 = vadd.f32 %v9166_v31, %v14060_v58 }
0x2975   :  { %v7183_v45 = vmul.f32 2.0, %v10837_v5  ;;  %v7171_v24 = vpop.f32.mrb[107].mxu1  ;;  %7242 = vrot.lane.b32.xlu0 %v7185_v28, %s12243_s3  ;;  %v6777_v28 = vadd.f32 %v14058_v8, %v9166_v31  ;;  %v9172_v5 = vmul.f32 -1.442695, %v6767_v2  ;;  %v9199_v8 = vld [vmem:[%s14561_s2] ss:$0 sm:$0xff] }
0x2976   :  { %v7182_v57 = vmul.f32 2.0, %v7171_v24 }
0x2977   :  { %v7187_v51 = vsub.f32 %v7183_v45, %v6831_v21  ;;  %v9171_v45 = vmul.f32 -1.442695, %v6762_v10  ;;  %v9174_v24 = vmul.f32 -1.442695, %v6777_v28  ;;  %12111 = vpow2.f32 %v9172_v5 }
0x2978   :  { %v7186_v34 = vsub.f32 %v7182_v57, %v6830_v48 }
0x2979   :  { %7246 = vrot.lane.b32.xlu1 %v7187_v51, %s12243_s3  ;;  %7240 = vrot.lane.b32.xlu0 %v7184_v39, %s12243_s3  ;;  %v9173_v39 = vmul.f32 -1.442695, %v6772_v36  ;;  %12113 = vpow2.f32 %v9171_v45 }
0x297a   :  { %12115 = vpow2.f32 %v9174_v24 }
0x297b   :  { %12117 = vpow2.f32 %v9173_v39 }
0x297d   :  { %7397 = vrot.lane.b32.xlu1 %v13905_v30, %s12248_s1  ;;  %7244 = vrot.lane.b32.xlu0 %v7186_v34, %s12243_s3 }
0x2981   :  { %7401 = vrot.lane.b32.xlu1 %v13911_v14, %s12248_s1  ;;  %7395 = vrot.lane.b32.xlu0 %v13909_v46, %s12248_s1  ;;  %v12112_v51 = vpop.eup %12111 }
0x2982   :  { %v6793_v37 = vadd.f32 1.0, %v12112_v51 }
0x2983   :  { %v12114_v57 = vpop.eup %12113 }
0x2984   :  { %v12116_v34 = vpop.eup %12115  ;;  %v6792_v4 = vadd.f32 1.0, %v12114_v57  ;;  %12119 = vrcp.f32 %v6793_v37 }
0x2985   :  { %7399 = vrot.lane.b32.xlu0 %v13913_v49, %s12248_s1  ;;  %v12118_v16 = vpop.eup %12117  ;;  %v6795_v55 = vadd.f32 1.0, %v12116_v34 }
0x2986   :  { %v6794_v13 = vadd.f32 1.0, %v12118_v16  ;;  %12121 = vrcp.f32 %v6792_v4 }
0x2987   :  { %12123 = vrcp.f32 %v6795_v55 }
0x2988   :  { %12125 = vrcp.f32 %v6794_v13 }
0x29de   :  { %v7211_v38 = vpop.permute.xlu1 %7210 }
0x29df   :  { %v7209_v6 = vpop.permute.xlu0 %7208  ;;  %v7257_v54 = vsel %vm785_vm3, %v7253_v32, %v7211_v38  ;;  %v12120_v38 = vpop.eup %12119 }
0x29e0   :  { %v7256_v18 = vsel %vm785_vm3, %v7252_v41, %v7209_v6  ;;  %v7261_v42 = vsel %vm1393_vm8, %v7257_v54, %v7227_v0  ;;  %v12122_v41 = vpop.eup %12121 }
0x29e1   :  { %v7260_v62 = vsel %vm1393_vm8, %v7256_v18, %v7225_v29  ;;  %v7380_v18 = vsub.f32 1.0, %v12120_v38 }
0x29e2   :  { %v7215_v52 = vpop.permute.xlu1 %7214 }
0x29e3   :  { %v7213_v35 = vpop.permute.xlu0 %7212  ;;  %v7259_v11 = vsel %vm785_vm3, %v7255_v20, %v7215_v52  ;;  %v7379_v52 = vsub.f32 1.0, %v12122_v41  ;;  %v7375_v20 = vmul.f32 %v12122_v41, %v13891_v7 }
0x29e4   :  { %v7258_v47 = vsel %vm785_vm3, %v7254_v33, %v7213_v35  ;;  %v7263_v21 = vsel %vm1393_vm8, %v7259_v11, %v7231_v12 }
0x29e5   :  { %v7262_v19 = vsel %vm1393_vm8, %v7258_v47, %v7229_v1 }
0x29e7   :  { %v7243_v9 = vpop.permute.xlu0 %7242 }
0x29e8   :  { %v7265_v15 = vsel %vm1398_vm9, %v7261_v42, %v7243_v9  ;;  %v12124_v9 = vpop.eup %12123 }
0x29e9   :  { %v12126_v32 = vpop.eup %12125 }
0x29ea   :  { %v7377_v7 = vmul.f32 %v12126_v32, %v13901_v53 }
0x29eb   :  { %v7241_v17 = vpop.permute.xlu0 %7240  ;;  %v7247_v40 = vpop.permute.xlu1 %7246 }
0x29ec   :  { %v7264_v44 = vsel %vm1398_vm9, %v7260_v62, %v7241_v17  ;;  %v7267_v63 = vsel %vm1398_vm9, %v7263_v21, %v7247_v40  ;;  %v7376_v62 = vmul.f32 %v12120_v38, %v13889_v3 }
0x29ed   :  { %10858 = vmatprep.mubr.msk.f32.mxu0 %vm1409_vm10, %v7264_v44 }
0x29ee   :  { %10859 = vmatmul.mubr.msk.f32.vlgmr.msra.gmra.mrb[110].mxu0 %vm1409_vm10, %v7265_v15  ;;  %v7382_v15 = vsub.f32 1.0, %v12124_v9 }
0x29ef   :  { %v7245_v48 = vpop.permute.xlu0 %7244  ;;  %v7398_v47 = vpop.permute.xlu1 %7397 }
0x29f0   :  { %v7266_v50 = vsel %vm1398_vm9, %v7262_v19, %v7245_v48  ;;  %v7381_v48 = vsub.f32 1.0, %v12126_v32 }
0x29f1   :  { %10861 = vmatprep.mubr.msk.f32.mxu0 %vm1409_vm10, %v7266_v50  ;;  %v7378_v50 = vmul.f32 %v12124_v9, %v13899_v27 }
0x29f2   :  { %10862 = vmatmul.mubr.msk.f32.gmra.mrb[112].mxu0 %vm1409_vm10, %v7267_v63 }
0x29f3   :  { %10914 = vmatprep.mubr.msk.f32.mxu0 %vm785_vm3, %v12773_v61  ;;  %v7396_v44 = vpop.permute.xlu0 %7395  ;;  %v7402_v36 = vpop.permute.xlu1 %7401 }
0x29f7   :  { %v7400_v27 = vpop.permute.xlu0 %7399 }
0x2ac1   :  { %v10860_v58 = vpop.f32.mrb[110].mxu0 }
0x2ac2   :  { %v7358_v23 = vadd.f32 %v10860_v58, %v9199_v8  ;;  %v7352_v29 = vpop.f32.mrb[111].mxu0 }
0x2ac3   :  { %v7353_v0 = vadd.f32 %v9199_v8, %v7352_v29 }
0x2ac4   :  { %12127 = vtanh.f32 %v7358_v23 }
0x2ac5   :  { %12129 = vtanh.f32 %v7353_v0  ;;  %v10863_v1 = vpop.f32.mrb[112].mxu0 }
0x2ac6   :  { %v7368_v6 = vadd.f32 %v10863_v1, %v9199_v8  ;;  %v7362_v12 = vpop.f32.mrb[113].mxu0 }
0x2ac7   :  { %v7363_v35 = vadd.f32 %v9199_v8, %v7362_v12 }
0x2ac8   :  { %12131 = vtanh.f32 %v7368_v6 }
0x2ac9   :  { %12133 = vtanh.f32 %v7363_v35 }
0x2ace   :  { %v12128_v54 = vpop.eup %12127 }
0x2acf   :  { %v12130_v33 = vpop.eup %12129  ;;  %v7384_v17 = vmul.f32 %v12128_v54, %v7380_v18 }
0x2ad0   :  { %v7383_v42 = vmul.f32 %v12130_v33, %v7379_v52  ;;  %v1306_v52 = vld [vmem:[%s14562_s10] sm:$0xff]  ;;  %v1307_v33 = vld [vmem:[%s14562_s10 + $0x8] sm:$0xff] }
0x2ad1   :  { %v14204_v11 = vadd.f32 %v7384_v17, %v7376_v62  ;;  %v1316_v62 = vld [vmem:[%s14563_s7] sm:$0xff]  ;;  %v11772_v17 = vpack.c.bf16 %v1307_v33, %v1306_v52 }
0x2ad2   :  { %v12132_v40 = vpop.eup %12131  ;;  %v14206_v19 = vadd.f32 %v7383_v42, %v7375_v20  ;;  %v1317_v20 = vld [vmem:[%s14563_s7 + $0x8] sm:$0xff]  ;;  %v1309_v42 = vld [vmem:[%s14562_s10 + $0x18] sm:$0xff] }
0x2ad3   :  { %v12134_v21 = vpop.eup %12133  ;;  %v7386_v63 = vmul.f32 %v12132_v40, %v7382_v15  ;;  %v14211_v3 = vsel %vm169_vm0, %v14204_v11, %v7398_v47  ;;  %v1308_v47 = vld [vmem:[%s14562_s10 + $0x10] sm:$0xff] }
0x2ad4   :  { %v7385_v31 = vmul.f32 %v12134_v21, %v7381_v48  ;;  %v14216_v2 = vsel %vm169_vm0, %v14206_v19, %v7396_v44  ;;  %v11792_v44 = vpack.c.bf16 %v1317_v20, %v1316_v62  ;;  %v11776_v15 = vpack.c.bf16 %v1309_v42, %v1308_v47  ;;  %v1318_v40 = vld [vmem:[%s14563_s7 + $0x10] sm:$0xff]  ;;  %v1319_v48 = vld [vmem:[%s14563_s7 + $0x18] sm:$0xff]  ;;  %v1310_v21 = vld [vmem:[%s14562_s10 + $0x20] sm:$0xff] }
0x2ad5   :  { %v14218_v10 = vadd.f32 %v7386_v63, %v7378_v50  ;;  %v11740_v28 = vpack.c.bf16 %v14211_v3, %v14216_v2  ;;  %v11796_v50 = vpack.c.bf16 %v1319_v48, %v1318_v40  ;;  %v1311_v63 = vld [vmem:[%s14562_s10 + $0x28] sm:$0xff] }
0x2ad6   :  { %v14222_v5 = vadd.f32 %v7385_v31, %v7377_v7  ;;  %v1320_v7 = vld [vmem:[%s14563_s7 + $0x20] sm:$0xff]  ;;  %v1321_v31 = vld [vmem:[%s14563_s7 + $0x28] sm:$0xff] }
0x2ad7   :  { %11741 = vmatprep.subr.bf16.mxu1 %v11740_v28  ;;  %v14226_v45 = vsel %vm169_vm0, %v14218_v10, %v7402_v36  ;;  %v11800_v36 = vpack.c.bf16 %v1321_v31, %v1320_v7 }
0x2ad8   :  { %11743 = vmatpush3.bf16.msra.mxu1 %v11740_v28  ;;  %v14230_v53 = vsel %vm169_vm0, %v14222_v5, %v7400_v27  ;;  %v1312_v27 = vld [vmem:[%s14562_s10 + $0x30] sm:$0xff] }
0x2ad9   :  { %v11744_v24 = vpack.c.bf16 %v14226_v45, %v14230_v53 }
0x2adb   :  { %11745 = vmatprep.subr.bf16.mxu1 %v11744_v24 }
0x2adc   :  { %11747 = vmatpush3.bf16.msra.mxu1 %v11744_v24 }
0x2adf   :  { %10873 = vmatmul.mubr.msk.f32.vlgmr.msra.gmra.mrb[108].mxu1 %vm785_vm3, %v12868_v22 }
0x2ae0   :  { %10875 = vmatprep.mubr.msk.f32.mxu1 %vm785_vm3, %v12871_v25 }
0x2ae3   :  { %10876 = vmatmul.mubr.msk.f32.gmra.mrb[110].mxu1 %vm785_vm3, %v12878_v26 }
0x2ae4   :  { %10886 = vmatprep.mubr.msk.f32.mxu1 %vm785_vm3, %v12687_v56 }
0x2bb2   :  { %v10874_v39 = vpop.f32.mrb[108].mxu1 }
0x2bb3   :  { %7773 = vrot.lane.b32.xlu1 %v10874_v39, %s12245_s12  ;;  %v7477_v51 = vpop.f32.mrb[109].mxu1 }
0x2bb4   :  { %v11748_v57 = vpack.c.bf16 %v10874_v39, %v7477_v51  ;;  %7771 = vrot.lane.b32.xlu0 %v7477_v51, %s12245_s12  ;;  %v1322_v39 = vld [vmem:[%s14563_s7 + $0x30] sm:$0xff]  ;;  %v1323_v51 = vld [vmem:[%s14563_s7 + $0x38] sm:$0xff] }
0x2bb6   :  { %v10877_v34 = vpop.f32.mrb[110].mxu1  ;;  %11749 = vmatprep.subr.bf16.mxu1 %v11748_v57 }
0x2bb7   :  { %11751 = vmatpush3.bf16.msra.mxu1 %v11748_v57  ;;  %7777 = vrot.lane.b32.xlu1 %v10877_v34, %s12245_s12  ;;  %v7487_v16 = vpop.f32.mrb[111].mxu1 }
0x2bb8   :  { %v11752_v37 = vpack.c.bf16 %v10877_v34, %v7487_v16  ;;  %v11804_v34 = vpack.c.bf16 %v1323_v51, %v1322_v39 }
0x2bba   :  { %11753 = vmatprep.subr.bf16.mxu1 %v11752_v37 }
0x2bbb   :  { %7775 = vrot.lane.b32.xlu1 %v7487_v16, %s12245_s12  ;;  %11755 = vmatpush3.bf16.msra.mxu1 %v11752_v37  ;;  %v1314_v16 = vld [vmem:[%s14562_s10 + $0x40] sm:$0xff]  ;;  %v1315_v37 = vld [vmem:[%s14562_s10 + $0x48] sm:$0xff] }
0x2bbc   :  { %11757 = vmatprep.subr.bf16.mxu1 %v11740_v28 }
0x2bbe   :  { %10887 = vmatmul.mubr.msk.f32.vlgmr.msra.gmra.mrb[112].mxu1 %vm785_vm3, %v12868_v22 }
0x2bbf   :  { %10889 = vmatprep.mubr.msk.f32.mxu1 %vm785_vm3, %v12871_v25  ;;  %11759 = vmatpush3.bf16.msra.mxu1 %v11740_v28  ;;  %v11780_v28 = vpack.c.bf16 %v1311_v63, %v1310_v21 }
0x2bc0   :  { %11761 = vmatprep.subr.bf16.mxu1 %v11744_v24 }
0x2bc2   :  { %10890 = vmatmul.mubr.msk.f32.gmra.mrb[114].mxu1 %vm785_vm3, %v12878_v26 }
0x2bc3   :  { %11763 = vmatpush3.bf16.msra.mxu1 %v11744_v24  ;;  %10900 = vmatprep.mubr.msk.f32.mxu1 %vm785_vm3, %v12773_v61  ;;  %v1313_v24 = vld [vmem:[%s14562_s10 + $0x38] sm:$0xff] }
0x2bc4   :  { %11773 = vmatprep.subr.bf16.mxu1 %v11772_v17  ;;  %v11784_v57 = vpack.c.bf16 %v1313_v24, %v1312_v27 }
0x2bc6   :  { %10901 = vmatmul.mubr.msk.f32.vlgmr.msra.gmra.mrb[116].mxu1 %vm785_vm3, %v12907_v43 }
0x2bc7   :  { %10903 = vmatprep.mubr.msk.f32.mxu1 %vm785_vm3, %v12910_v59  ;;  %11775 = vmatpush3.bf16.msra.mxu1 %v11772_v17 }
0x2bc8   :  { %11777 = vmatprep.subr.bf16.mxu1 %v11776_v15 }
0x2bca   :  { %10904 = vmatmul.mubr.msk.f32.gmra.mrb[118].mxu1 %vm785_vm3, %v12919_v60 }
0x2bcb   :  { %11779 = vmatpush3.bf16.msra.mxu1 %v11776_v15 }
0x2bcc   :  { %11781 = vmatprep.subr.bf16.mxu1 %v11780_v28 }
0x2bcf   :  { %11783 = vmatpush3.bf16.msra.mxu1 %v11780_v28 }
0x2bd0   :  { %11785 = vmatprep.subr.bf16.mxu1 %v11784_v57 }
0x2bd3   :  { %11787 = vmatpush3.bf16.msra.mxu1 %v11784_v57 }
0x2c91   :  { %v10888_v4 = vpop.f32.mrb[112].mxu1 }
0x2c92   :  { %v7582_v55 = vmul.f32 2.0, %v10888_v4  ;;  %v7562_v13 = vpop.f32.mrb[113].mxu1  ;;  %v1324_v4 = vld [vmem:[%s14563_s7 + $0x40] sm:$0xff] }
0x2c93   :  { %v7581_v8 = vmul.f32 2.0, %v7562_v13  ;;  %v1325_v13 = vld [vmem:[%s14563_s7 + $0x48] sm:$0xff] }
0x2c94   :  { %v7586_v58 = vsub.f32 %v7582_v55, %v14211_v3  ;;  %v11788_v55 = vpack.c.bf16 %v1315_v37, %v1314_v16 }
0x2c95   :  { %v7585_v23 = vsub.f32 %v7581_v8, %v14216_v2  ;;  %v10891_v29 = vpop.f32.mrb[114].mxu1  ;;  %v11808_v8 = vpack.c.bf16 %v1325_v13, %v1324_v4  ;;  %v9220_v4 = vld [vmem:[%s14564_s11] ss:$0 sm:$0xff] }
0x2c96   :  { %7789 = vrot.lane.b32.xlu1 %v7586_v58, %s12242_s25  ;;  %v7572_v0 = vpop.f32.mrb[115].mxu1  ;;  %v7584_v1 = vmul.f32 2.0, %v10891_v29  ;;  %11789 = vmatprep.subr.bf16.mxu1 %v11788_v55 }
0x2c97   :  { %7787 = vrot.lane.b32.xlu0 %v7585_v23, %s12242_s25  ;;  %v7583_v6 = vmul.f32 2.0, %v7572_v0  ;;  %11791 = vmatpush3.bf16.msra.mxu1 %v11788_v55  ;;  %v9229_v55 = vld [vmem:[%s14565_s16] ss:$0 sm:$0xff] }
0x2c98   :  { %v7588_v41 = vsub.f32 %v7584_v1, %v14226_v45 }
0x2c99   :  { %v10902_v12 = vpop.f32.mrb[116].mxu1  ;;  %v7587_v9 = vsub.f32 %v7583_v6, %v14230_v53 }
0x2c9a   :  { %7805 = vrot.lane.b32.xlu1 %v10902_v12, %s12246_s20  ;;  %v7655_v35 = vpop.f32.mrb[117].mxu1 }
0x2c9b   :  { %v11764_v38 = vpack.c.bf16 %v10902_v12, %v7655_v35  ;;  %7803 = vrot.lane.b32.xlu0 %v7655_v35, %s12246_s20 }
0x2c9d   :  { %v10905_v32 = vpop.f32.mrb[118].mxu1  ;;  %11765 = vmatprep.subr.bf16.mxu0 %v11764_v38 }
0x2c9e   :  { %7793 = vrot.lane.b32.xlu1 %v7588_v41, %s12242_s25  ;;  %v7665_v18 = vpop.f32.mrb[119].mxu1  ;;  %11767 = vmatpush3.bf16.msra.mxu0 %v11764_v38 }
0x2c9f   :  { %v11768_v54 = vpack.c.bf16 %v10905_v32, %v7665_v18  ;;  %7791 = vrot.lane.b32.xlu0 %v7587_v9, %s12242_s25 }
0x2ca1   :  { %11769 = vmatprep.subr.bf16.mxu0 %v11768_v54 }
0x2ca2   :  { %7809 = vrot.lane.b32.xlu1 %v10905_v32, %s12246_s20  ;;  %11771 = vmatpush3.bf16.msra.mxu0 %v11768_v54  ;;  %v7772_v54 = vpop.permute.xlu0 %7771 }
0x2ca3   :  { %7807 = vrot.lane.b32.xlu0 %v7665_v18, %s12246_s20  ;;  %11793 = vmatprep.subr.bf16.mxu0 %v11792_v44  ;;  %v7774_v18 = vpop.permute.xlu1 %7773  ;;  %v7831_v48 = vsel %vm498_vm2, %v14216_v2, %v7772_v54 }
0x2ca4   :  { %v7832_v21 = vsel %vm498_vm2, %v14211_v3, %v7774_v18 }
0x2ca5   :  { %10915 = vmatmul.mubr.msk.f32.vlgmr.msra.gmra.mrb[114].mxu0 %vm785_vm3, %v12907_v43 }
0x2ca6   :  { %10917 = vmatprep.mubr.msk.f32.mxu0 %vm785_vm3, %v12910_v59  ;;  %11795 = vmatpush3.bf16.msra.mxu0 %v11792_v44 }
0x2ca7   :  { %11797 = vmatprep.subr.bf16.mxu0 %v11796_v50  ;;  %v7778_v52 = vpop.permute.xlu1 %7777 }
0x2ca9   :  { %10918 = vmatmul.mubr.msk.f32.gmra.mrb[116].mxu0 %vm785_vm3, %v12919_v60 }
0x2caa   :  { %11799 = vmatpush3.bf16.msra.mxu0 %v11796_v50 }
0x2cab   :  { %11801 = vmatprep.subr.bf16.mxu0 %v11800_v36  ;;  %v7776_v62 = vpop.permute.xlu1 %7775 }
0x2cac   :  { %v7833_v24 = vsel %vm498_vm2, %v14230_v53, %v7776_v62 }
0x2cae   :  { %11803 = vmatpush3.bf16.msra.mxu0 %v11800_v36 }
0x2caf   :  { %11805 = vmatprep.subr.bf16.mxu0 %v11804_v34 }
0x2cb2   :  { %11807 = vmatpush3.bf16.msra.mxu0 %v11804_v34 }
0x2cb3   :  { %11809 = vmatprep.subr.bf16.mxu0 %v11808_v8 }
0x2cb6   :  { %11811 = vmatpush3.bf16.msra.mxu0 %v11808_v8 }
0x2d08   :  { %v7790_v20 = vpop.permute.xlu1 %7789 }
0x2d09   :  { %v7788_v33 = vpop.permute.xlu0 %7787  ;;  %v7836_v7 = vsel %vm785_vm3, %v7832_v21, %v7790_v20 }
0x2d0a   :  { %v7835_v50 = vsel %vm785_vm3, %v7831_v48, %v7788_v33 }
0x2d0c   :  { %v7806_v42 = vpop.permute.xlu1 %7805 }
0x2d0d   :  { %v7804_v17 = vpop.permute.xlu0 %7803  ;;  %v7840_v36 = vsel %vm1393_vm8, %v7836_v7, %v7806_v42 }
0x2d0e   :  { %v7839_v31 = vsel %vm1393_vm8, %v7835_v50, %v7804_v17 }
0x2d10   :  { %v7794_v15 = vpop.permute.xlu1 %7793 }
0x2d11   :  { %v7792_v47 = vpop.permute.xlu0 %7791 }
0x2d12   :  { %v7837_v39 = vsel %vm785_vm3, %v7833_v24, %v7792_v47 }
0x2d14   :  { %v7810_v63 = vpop.permute.xlu1 %7809 }
0x2d15   :  { %v7808_v44 = vpop.permute.xlu0 %7807 }
0x2d16   :  { %v7841_v57 = vsel %vm1393_vm8, %v7837_v39, %v7808_v44 }
0x2d78   :  { %v10916_v58 = vpop.f32.mrb[114].mxu0 }
0x2d79   :  { %v7760_v23 = vmul.f32 2.0, %v10916_v58  ;;  %v7740_v29 = vpop.f32.mrb[115].mxu0 }
0x2d7a   :  { %v7759_v1 = vmul.f32 2.0, %v7740_v29 }
0x2d7b   :  { %v7764_v0 = vsub.f32 %v7760_v23, %v14211_v3  ;;  %v7834_v3 = vsel %vm498_vm2, %v14226_v45, %v7778_v52 }
0x2d7c   :  { %v10919_v6 = vpop.f32.mrb[116].mxu0  ;;  %v7763_v38 = vsub.f32 %v7759_v1, %v14216_v2 }
0x2d7d   :  { %v7762_v12 = vmul.f32 2.0, %v10919_v6  ;;  %v7750_v35 = vpop.f32.mrb[117].mxu0  ;;  %7821 = vrot.lane.b32.xlu0 %v7764_v0, %s12243_s3 }
0x2d7e   :  { %v7761_v9 = vmul.f32 2.0, %v7750_v35 }
0x2d7f   :  { %v7766_v41 = vsub.f32 %v7762_v12, %v14226_v45 }
0x2d80   :  { %v7765_v32 = vsub.f32 %v7761_v9, %v14230_v53  ;;  %v7838_v53 = vsel %vm785_vm3, %v7834_v3, %v7794_v15 }
0x2d81   :  { %7825 = vrot.lane.b32.xlu1 %v7766_v41, %s12243_s3  ;;  %7819 = vrot.lane.b32.xlu0 %v7763_v38, %s12243_s3  ;;  %v7842_v16 = vsel %vm1393_vm8, %v7838_v53, %v7810_v63 }
0x2d85   :  { %7823 = vrot.lane.b32.xlu0 %v7765_v32, %s12243_s3 }
0x2def   :  { %v7822_v40 = vpop.permute.xlu0 %7821 }
0x2df0   :  { %v7844_v2 = vsel %vm1398_vm9, %v7840_v36, %v7822_v40 }
0x2df3   :  { %v7820_v28 = vpop.permute.xlu0 %7819  ;;  %v7826_v51 = vpop.permute.xlu1 %7825 }
0x2df4   :  { %v7843_v27 = vsel %vm1398_vm9, %v7839_v31, %v7820_v28  ;;  %v7846_v45 = vsel %vm1398_vm9, %v7842_v16, %v7826_v51 }
0x2df5   :  { %10940 = vmatprep.mubr.msk.f32.mxu1 %vm1409_vm10, %v7843_v27  ;;  %10966 = vmatprep.mubr.msk.f32.mxu0 %vm1409_vm10, %v7843_v27 }
0x2df6   :  { %10941 = vmatmul.mubr.msk.f32.vlgmr.msra.gmra.mrb[120].mxu1 %vm1409_vm10, %v7844_v2  ;;  %10967 = vmatmul.mubr.msk.f32.vlgmr.msra.gmra.mrb[118].mxu0 %vm1409_vm10, %v7844_v2 }
0x2df7   :  { %v7824_v34 = vpop.permute.xlu0 %7823 }
0x2df8   :  { %v7845_v37 = vsel %vm1398_vm9, %v7841_v57, %v7824_v34 }
0x2df9   :  { %10943 = vmatprep.mubr.msk.f32.mxu1 %vm1409_vm10, %v7845_v37  ;;  %10969 = vmatprep.mubr.msk.f32.mxu0 %vm1409_vm10, %v7845_v37 }
0x2dfa   :  { %10944 = vmatmul.mubr.msk.f32.gmra.mrb[122].mxu1 %vm1409_vm10, %v7846_v45  ;;  %10970 = vmatmul.mubr.msk.f32.gmra.mrb[120].mxu0 %vm1409_vm10, %v7846_v45 }
0x2dfb   :  { %10980 = vmatprep.mubr.msk.f32.mxu1 %vm785_vm3, %v12687_v56  ;;  %10994 = vmatprep.mubr.msk.f32.mxu0 %vm785_vm3, %v12687_v56 }
0x2ec9   :  { %v10942_v13 = vpop.f32.mrb[120].mxu1  ;;  %v10968_v8 = vpop.f32.mrb[118].mxu0 }
0x2eca   :  { %v7937_v58 = vadd.f32 %v10942_v13, %v9220_v4  ;;  %v8052_v23 = vadd.f32 %v10968_v8, %v9229_v55  ;;  %v7931_v29 = vpop.f32.mrb[121].mxu1  ;;  %v8046_v0 = vpop.f32.mrb[119].mxu0 }
0x2ecb   :  { %v7932_v1 = vadd.f32 %v9220_v4, %v7931_v29  ;;  %v8047_v6 = vadd.f32 %v9229_v55, %v8046_v0 }
0x2ecc   :  { %v9226_v12 = vmul.f32 -1.442695, %v7937_v58  ;;  %v9235_v35 = vmul.f32 -1.442695, %v8052_v23 }
0x2ecd   :  { %v9225_v38 = vmul.f32 -1.442695, %v7932_v1  ;;  %v9234_v41 = vmul.f32 -1.442695, %v8047_v6  ;;  %v10945_v9 = vpop.f32.mrb[122].mxu1  ;;  %v10971_v32 = vpop.f32.mrb[120].mxu0 }
0x2ece   :  { %12135 = vpow2.f32 %v9226_v12  ;;  %v7947_v18 = vadd.f32 %v10945_v9, %v9220_v4  ;;  %v8062_v54 = vadd.f32 %v10971_v32, %v9229_v55  ;;  %v7941_v56 = vpop.f32.mrb[123].mxu1  ;;  %v8056_v52 = vpop.f32.mrb[121].mxu0 }
0x2ecf   :  { %12137 = vpow2.f32 %v9235_v35  ;;  %v7942_v33 = vadd.f32 %v9220_v4, %v7941_v56  ;;  %v8057_v62 = vadd.f32 %v9229_v55, %v8056_v52 }
0x2ed0   :  { %12139 = vpow2.f32 %v9225_v38  ;;  %v9228_v17 = vmul.f32 -1.442695, %v7947_v18  ;;  %v9237_v20 = vmul.f32 -1.442695, %v8062_v54 }
0x2ed1   :  { %12141 = vpow2.f32 %v9234_v41  ;;  %v9227_v47 = vmul.f32 -1.442695, %v7942_v33  ;;  %v9236_v42 = vmul.f32 -1.442695, %v8057_v62 }
0x2ed2   :  { %12143 = vpow2.f32 %v9228_v17 }
0x2ed3   :  { %12145 = vpow2.f32 %v9237_v20 }
0x2ed4   :  { %12147 = vpow2.f32 %v9227_v47  ;;  %v1329_v47 = vld [vmem:[%s14566_s15 + $0x18] sm:$0xff] }
0x2ed5   :  { %12149 = vpow2.f32 %v9236_v42 }
0x2ed8   :  { %v12136_v44 = vpop.eup %12135 }
0x2ed9   :  { %v12138_v15 = vpop.eup %12137  ;;  %v7963_v40 = vadd.f32 1.0, %v12136_v44  ;;  %v1333_v44 = vld [vmem:[%s14566_s15 + $0x38] sm:$0xff] }
0x2eda   :  { %v12140_v48 = vpop.eup %12139  ;;  %v8078_v21 = vadd.f32 1.0, %v12138_v15 }
0x2edb   :  { %v12142_v50 = vpop.eup %12141  ;;  %12151 = vrcp.f32 %v7963_v40  ;;  %v7962_v63 = vadd.f32 1.0, %v12140_v48 }
0x2edc   :  { %v12144_v7 = vpop.eup %12143  ;;  %12153 = vrcp.f32 %v8078_v21  ;;  %v8077_v31 = vadd.f32 1.0, %v12142_v50  ;;  %v1334_v50 = vld [vmem:[%s14566_s15 + $0x40] sm:$0xff] }
0x2edd   :  { %v12146_v28 = vpop.eup %12145  ;;  %12155 = vrcp.f32 %v7962_v63  ;;  %v7965_v36 = vadd.f32 1.0, %v12144_v7  ;;  %v1335_v63 = vld [vmem:[%s14566_s15 + $0x48] sm:$0xff] }
0x2ede   :  { %v12148_v27 = vpop.eup %12147  ;;  %12157 = vrcp.f32 %v8077_v31  ;;  %v8080_v24 = vadd.f32 1.0, %v12146_v28  ;;  %v11860_v31 = vpack.c.bf16 %v1335_v63, %v1334_v50  ;;  %v6099_v50 = vld [vmem:[%s14567_s18] sm:$0xff] }
0x2edf   :  { %v12150_v2 = vpop.eup %12149  ;;  %12159 = vrcp.f32 %v7965_v36  ;;  %v7964_v3 = vadd.f32 1.0, %v12148_v27  ;;  %v9254_v63 = vld [vmem:[%s14568_s0] ss:$0 sm:$0xff] }
0x2ee0   :  { %12161 = vrcp.f32 %v8080_v24  ;;  %v8079_v39 = vadd.f32 1.0, %v12150_v2 }
0x2ee1   :  { %12163 = vrcp.f32 %v7964_v3 }
0x2ee2   :  { %12165 = vrcp.f32 %v8079_v39 }
0x2ee5   :  { %v12152_v51 = vpop.eup %12151 }
0x2ee6   :  { %v14340_v53 = vpop.eup %12153  ;;  %v8090_v57 = vmul.f32 %v12152_v51, %v13905_v30 }
0x2ee7   :  { %v12156_v34 = vpop.eup %12155  ;;  %v14345_v16 = vmul.f32 %v14340_v53, %v13905_v30 }
0x2ee8   :  { %v14347_v37 = vpop.eup %12157  ;;  %8099 = vrot.lane.b32.xlu1 %v8090_v57, %s12248_s1  ;;  %v8089_v45 = vmul.f32 %v12156_v34, %v13909_v46 }
0x2ee9   :  { %v12160_v4 = vpop.eup %12159  ;;  %v14353_v55 = vmul.f32 %v14347_v37, %v13909_v46 }
0x2eea   :  { %v14355_v13 = vpop.eup %12161  ;;  %8097 = vrot.lane.b32.xlu0 %v8089_v45, %s12248_s1  ;;  %v8092_v8 = vmul.f32 %v12160_v4, %v13911_v14 }
0x2eeb   :  { %v12164_v58 = vpop.eup %12163  ;;  %v14361_v30 = vmul.f32 %v14355_v13, %v13911_v14 }
0x2eec   :  { %v14363_v23 = vpop.eup %12165  ;;  %8103 = vrot.lane.b32.xlu1 %v8092_v8, %s12248_s1  ;;  %v8091_v29 = vmul.f32 %v12164_v58, %v13913_v49 }
0x2eed   :  { %v14369_v46 = vmul.f32 %v14363_v23, %v13913_v49 }
0x2eee   :  { %8101 = vrot.lane.b32.xlu0 %v8091_v29, %s12248_s1 }
0x2f5a   :  { %v8100_v0 = vpop.permute.xlu1 %8099 }
0x2f5b   :  { %v14374_v1 = vsel %vm169_vm0, %v14204_v11, %v8100_v0 }
0x2f5c   :  { %v8098_v6 = vpop.permute.xlu0 %8097 }
0x2f5d   :  { %v14378_v14 = vsel %vm169_vm0, %v14206_v19, %v8098_v6 }
0x2f5e   :  { %v11812_v12 = vpack.c.bf16 %v14374_v1, %v14378_v14  ;;  %v8104_v35 = vpop.permute.xlu1 %8103 }
0x2f5f   :  { %v14384_v49 = vsel %vm169_vm0, %v14218_v10, %v8104_v35 }
0x2f60   :  { %11813 = vmatprep.subr.bf16.mxu1 %v11812_v12  ;;  %v8102_v38 = vpop.permute.xlu0 %8101 }
0x2f61   :  { %v14388_v41 = vsel %vm169_vm0, %v14222_v5, %v8102_v38  ;;  %11815 = vmatpush3.bf16.msra.mxu1 %v11812_v12 }
0x2f62   :  { %v11816_v11 = vpack.c.bf16 %v14384_v49, %v14388_v41 }
0x2f64   :  { %11817 = vmatprep.subr.bf16.mxu1 %v11816_v11 }
0x2f65   :  { %11819 = vmatpush3.bf16.msra.mxu1 %v11816_v11 }
0x2f66   :  { %11829 = vmatprep.subr.bf16.mxu1 %v11812_v12 }
0x2f68   :  { %10981 = vmatmul.mubr.msk.f32.vlgmr.msra.gmra.mrb[124].mxu1 %vm785_vm3, %v12868_v22 }
0x2f69   :  { %10983 = vmatprep.mubr.msk.f32.mxu1 %vm785_vm3, %v12871_v25  ;;  %11831 = vmatpush3.bf16.msra.mxu1 %v11812_v12 }
0x2f6a   :  { %11833 = vmatprep.subr.bf16.mxu1 %v11816_v11 }
0x2f6c   :  { %10984 = vmatmul.mubr.msk.f32.gmra.mrb[126].mxu1 %vm785_vm3, %v12878_v26 }
0x2f6d   :  { %11835 = vmatpush3.bf16.msra.mxu1 %v11816_v11  ;;  %11008 = vmatprep.mubr.msk.f32.mxu1 %vm785_vm3, %v12773_v61 }
0x2f70   :  { %11009 = vmatmul.mubr.msk.f32.vlgmr.msra.gmra.mrb[128].mxu1 %vm785_vm3, %v12907_v43 }
0x2f71   :  { %11011 = vmatprep.mubr.msk.f32.mxu1 %vm785_vm3, %v12910_v59 }
0x2f74   :  { %11012 = vmatmul.mubr.msk.f32.gmra.mrb[130].mxu1 %vm785_vm3, %v12919_v60 }
0x303b   :  { %v10982_v19 = vpop.f32.mrb[124].mxu1 }
0x303c   :  { %8475 = vrot.lane.b32.xlu1 %v10982_v19, %s12245_s12  ;;  %v8179_v10 = vpop.f32.mrb[125].mxu1 }
0x303d   :  { %v11820_v5 = vpack.c.bf16 %v10982_v19, %v8179_v10  ;;  %8473 = vrot.lane.b32.xlu0 %v8179_v10, %s12245_s12 }
0x303f   :  { %v10985_v9 = vpop.f32.mrb[126].mxu1  ;;  %11821 = vmatprep.subr.bf16.mxu0 %v11820_v5 }
0x3040   :  { %11823 = vmatpush3.bf16.msra.mxu0 %v11820_v5  ;;  %8479 = vrot.lane.b32.xlu1 %v10985_v9, %s12245_s12  ;;  %v8189_v32 = vpop.f32.mrb[127].mxu1 }
0x3041   :  { %v11824_v18 = vpack.c.bf16 %v10985_v9, %v8189_v32 }
0x3043   :  { %11825 = vmatprep.subr.bf16.mxu0 %v11824_v18  ;;  %v11010_v54 = vpop.f32.mrb[128].mxu1 }
0x3044   :  { %8477 = vrot.lane.b32.xlu1 %v8189_v32, %s12245_s12  ;;  %11827 = vmatpush3.bf16.msra.mxu0 %v11824_v18  ;;  %v8357_v56 = vpop.f32.mrb[129].mxu1 }
0x3045   :  { %v11836_v52 = vpack.c.bf16 %v11010_v54, %v8357_v56  ;;  %8505 = vrot.lane.b32.xlu0 %v8357_v56, %s12246_s20 }
0x3047   :  { %10995 = vmatmul.mubr.msk.f32.vlgmr.msra.gmra.mrb[122].mxu0 %vm785_vm3, %v12868_v22  ;;  %v11013_v33 = vpop.f32.mrb[130].mxu1  ;;  %11837 = vmatprep.subr.bf16.mxu0 %v11836_v52  ;;  %v1326_v22 = vld [vmem:[%s14566_s15] sm:$0xff] }
0x3048   :  { %8507 = vrot.lane.b32.xlu1 %v11010_v54, %s12246_s20  ;;  %10997 = vmatprep.mubr.msk.f32.mxu0 %vm785_vm3, %v12871_v25  ;;  %v8367_v62 = vpop.f32.mrb[131].mxu1  ;;  %v1327_v25 = vld [vmem:[%s14566_s15 + $0x8] sm:$0xff] }
0x3049   :  { %v11840_v17 = vpack.c.bf16 %v11013_v33, %v8367_v62  ;;  %11839 = vmatpush3.bf16.msra.mxu0 %v11836_v52  ;;  %8509 = vrot.lane.b32.xlu0 %v8367_v62, %s12246_s20  ;;  %v11844_v20 = vpack.c.bf16 %v1327_v25, %v1326_v22 }
0x304b   :  { %10998 = vmatmul.mubr.msk.f32.gmra.mrb[124].mxu0 %vm785_vm3, %v12878_v26  ;;  %11841 = vmatprep.subr.bf16.mxu0 %v11840_v17  ;;  %v1328_v26 = vld [vmem:[%s14566_s15 + $0x10] sm:$0xff] }
0x304c   :  { %8511 = vrot.lane.b32.xlu1 %v11013_v33, %s12246_s20  ;;  %11022 = vmatprep.mubr.msk.f32.mxu0 %vm785_vm3, %v12773_v61  ;;  %v11848_v42 = vpack.c.bf16 %v1329_v47, %v1328_v26  ;;  %v1330_v61 = vld [vmem:[%s14566_s15 + $0x20] sm:$0xff] }
0x304d   :  { %11843 = vmatpush3.bf16.msra.mxu0 %v11840_v17  ;;  %11845 = vmatprep.subr.bf16.mxu1 %v11844_v20 }
0x304e   :  { %11847 = vmatpush3.bf16.msra.mxu1 %v11844_v20  ;;  %11054 = vmatprep.subr.mxu0 %v6099_v50 }
0x304f   :  { %11849 = vmatprep.subr.bf16.mxu1 %v11848_v42 }
0x3050   :  { %11023 = vmatmul.mubr.msk.f32.vlgmr.msra.gmra.mrb[126].mxu0 %vm785_vm3, %v12907_v43  ;;  %v1331_v43 = vld [vmem:[%s14566_s15 + $0x28] sm:$0xff] }
0x3051   :  { %11025 = vmatprep.mubr.msk.f32.mxu0 %vm785_vm3, %v12910_v59  ;;  %v11852_v59 = vpack.c.bf16 %v1331_v43, %v1330_v61  ;;  %11055 = vmatpush3.msra.mxu0 %v6099_v50 }
0x3052   :  { %11851 = vmatpush3.bf16.msra.mxu1 %v11848_v42 }
0x3053   :  { %11853 = vmatprep.subr.bf16.mxu1 %v11852_v59 }
0x3054   :  { %11026 = vmatmul.mubr.msk.f32.gmra.mrb[128].mxu0 %vm785_vm3, %v12919_v60  ;;  %v1332_v60 = vld [vmem:[%s14566_s15 + $0x30] sm:$0xff] }
0x3055   :  { %v11856_v15 = vpack.c.bf16 %v1333_v44, %v1332_v60 }
0x3056   :  { %11855 = vmatpush3.bf16.msra.mxu1 %v11852_v59 }
0x3057   :  { %11857 = vmatprep.subr.bf16.mxu1 %v11856_v15 }
0x305a   :  { %11859 = vmatpush3.bf16.msra.mxu1 %v11856_v15 }
0x305b   :  { %11861 = vmatprep.subr.bf16.mxu1 %v11860_v31 }
0x305e   :  { %11863 = vmatpush3.bf16.msra.mxu1 %v11860_v31 }
0x30ae   :  { %v8476_v11 = vpop.permute.xlu1 %8475 }
0x30af   :  { %v8474_v10 = vpop.permute.xlu0 %8473  ;;  %v8534_v22 = vsel %vm498_vm2, %v14374_v1, %v8476_v11 }
0x30b0   :  { %v8533_v62 = vsel %vm498_vm2, %v14378_v14, %v8474_v10 }
0x30b2   :  { %v8480_v19 = vpop.permute.xlu1 %8479 }
0x30b3   :  { %v8536_v43 = vsel %vm498_vm2, %v14384_v49, %v8480_v19 }
0x30b6   :  { %v8478_v5 = vpop.permute.xlu1 %8477 }
0x30b7   :  { %v8506_v9 = vpop.permute.xlu0 %8505  ;;  %v8535_v47 = vsel %vm498_vm2, %v14388_v41, %v8478_v5 }
0x30ba   :  { %v8508_v32 = vpop.permute.xlu1 %8507 }
0x30bb   :  { %v8510_v18 = vpop.permute.xlu0 %8509 }
0x30be   :  { %v8512_v56 = vpop.permute.xlu1 %8511 }
0x311a   :  { %v10996_v40 = vpop.f32.mrb[122].mxu0 }
0x311b   :  { %v8284_v48 = vmul.f32 2.0, %v10996_v40  ;;  %v8264_v21 = vpop.f32.mrb[123].mxu0 }
0x311c   :  { %v8283_v7 = vmul.f32 2.0, %v8264_v21 }
0x311d   :  { %v8288_v28 = vsub.f32 %v8284_v48, %v14374_v1 }
0x311e   :  { %v8287_v36 = vsub.f32 %v8283_v7, %v14378_v14  ;;  %v10999_v27 = vpop.f32.mrb[124].mxu0 }
0x311f   :  { %v8286_v24 = vmul.f32 2.0, %v10999_v27  ;;  %8491 = vrot.lane.b32.xlu1 %v8288_v28, %s12242_s25  ;;  %v8274_v2 = vpop.f32.mrb[125].mxu0 }
0x3120   :  { %v8285_v3 = vmul.f32 2.0, %v8274_v2  ;;  %8489 = vrot.lane.b32.xlu0 %v8287_v36, %s12242_s25 }
0x3121   :  { %v8290_v39 = vsub.f32 %v8286_v24, %v14384_v49 }
0x3122   :  { %v8289_v51 = vsub.f32 %v8285_v3, %v14388_v41 }
0x3123   :  { %v11024_v57 = vpop.f32.mrb[126].mxu0  ;;  %8495 = vrot.lane.b32.xlu1 %v8290_v39, %s12242_s25  ;;  %v8661_v39 = vsub.f32 1.0, %v14340_v53 }
0x3124   :  { %v8462_v34 = vmul.f32 2.0, %v11024_v57  ;;  %v8442_v45 = vpop.f32.mrb[127].mxu0  ;;  %8493 = vrot.lane.b32.xlu0 %v8289_v51, %s12242_s25  ;;  %v8660_v57 = vsub.f32 1.0, %v14347_v37 }
0x3125   :  { %v8461_v8 = vmul.f32 2.0, %v8442_v45 }
0x3126   :  { %v8466_v4 = vsub.f32 %v8462_v34, %v14374_v1 }
0x3127   :  { %v11027_v58 = vpop.f32.mrb[128].mxu0  ;;  %v8465_v6 = vsub.f32 %v8461_v8, %v14378_v14 }
0x3128   :  { %v8464_v29 = vmul.f32 2.0, %v11027_v58  ;;  %v8452_v0 = vpop.f32.mrb[129].mxu0  ;;  %8523 = vrot.lane.b32.xlu0 %v8466_v4, %s12243_s3  ;;  %v8663_v58 = vsub.f32 1.0, %v14355_v13 }
0x3129   :  { %v8463_v35 = vmul.f32 2.0, %v8452_v0 }
0x312a   :  { %v8468_v12 = vsub.f32 %v8464_v29, %v14384_v49 }
0x312b   :  { %v8467_v38 = vsub.f32 %v8463_v35, %v14388_v41 }
0x312c   :  { %8527 = vrot.lane.b32.xlu1 %v8468_v12, %s12243_s3  ;;  %8521 = vrot.lane.b32.xlu0 %v8465_v6, %s12243_s3  ;;  %v8662_v6 = vsub.f32 1.0, %v14363_v23 }
0x3130   :  { %8525 = vrot.lane.b32.xlu0 %v8467_v38, %s12243_s3 }
0x3191   :  { %v8492_v33 = vpop.permute.xlu1 %8491 }
0x3192   :  { %v8490_v54 = vpop.permute.xlu0 %8489  ;;  %v8538_v26 = vsel %vm785_vm3, %v8534_v22, %v8492_v33 }
0x3193   :  { %v8537_v25 = vsel %vm785_vm3, %v8533_v62, %v8490_v54  ;;  %v8542_v59 = vsel %vm1393_vm8, %v8538_v26, %v8508_v32 }
0x3194   :  { %v8541_v42 = vsel %vm1393_vm8, %v8537_v25, %v8506_v9 }
0x3195   :  { %v8496_v20 = vpop.permute.xlu1 %8495 }
0x3196   :  { %v8494_v52 = vpop.permute.xlu0 %8493  ;;  %v8540_v60 = vsel %vm785_vm3, %v8536_v43, %v8496_v20 }
0x3197   :  { %v8539_v14 = vsel %vm785_vm3, %v8535_v47, %v8494_v52  ;;  %v8544_v40 = vsel %vm1393_vm8, %v8540_v60, %v8512_v56 }
0x3198   :  { %v8543_v15 = vsel %vm1393_vm8, %v8539_v14, %v8510_v18 }
0x319a   :  { %v8524_v17 = vpop.permute.xlu0 %8523 }
0x319b   :  { %v8546_v44 = vsel %vm1398_vm9, %v8542_v59, %v8524_v17 }
0x319e   :  { %v8522_v61 = vpop.permute.xlu0 %8521  ;;  %v8528_v41 = vpop.permute.xlu1 %8527 }
0x319f   :  { %v8545_v1 = vsel %vm1398_vm9, %v8541_v42, %v8522_v61  ;;  %v8548_v21 = vsel %vm1398_vm9, %v8544_v40, %v8528_v41 }
0x31a0   :  { %11048 = vmatprep.mubr.msk.f32.mxu1 %vm1409_vm10, %v8545_v1 }
0x31a1   :  { %11049 = vmatmul.mubr.msk.f32.vlgmr.msra.gmra.mrb[132].mxu1 %vm1409_vm10, %v8546_v44 }
0x31a2   :  { %v8526_v49 = vpop.permute.xlu0 %8525 }
0x31a3   :  { %v8547_v48 = vsel %vm1398_vm9, %v8543_v15, %v8526_v49 }
0x31a4   :  { %11051 = vmatprep.mubr.msk.f32.mxu1 %vm1409_vm10, %v8547_v48 }
0x31a5   :  { %11052 = vmatmul.mubr.msk.f32.gmra.mrb[134].mxu1 %vm1409_vm10, %v8548_v21 }
0x3274   :  { %v11050_v7 = vpop.f32.mrb[132].mxu1 }
0x3275   :  { %v8639_v31 = vadd.f32 %v11050_v7, %v9254_v63  ;;  %v8633_v28 = vpop.f32.mrb[133].mxu1 }
0x3276   :  { %v8634_v36 = vadd.f32 %v9254_v63, %v8633_v28 }
0x3277   :  { %12167 = vtanh.f32 %v8639_v31 }
0x3278   :  { %12169 = vtanh.f32 %v8634_v36  ;;  %v11053_v27 = vpop.f32.mrb[134].mxu1 }
0x3279   :  { %v8649_v24 = vadd.f32 %v11053_v27, %v9254_v63  ;;  %v8643_v2 = vpop.f32.mrb[135].mxu1 }
0x327a   :  { %v8644_v3 = vadd.f32 %v9254_v63, %v8643_v2 }
0x327b   :  { %12171 = vtanh.f32 %v8649_v24 }
0x327c   :  { %12173 = vtanh.f32 %v8644_v3 }
0x3281   :  { %v12168_v51 = vpop.eup %12167 }
0x3282   :  { %v12170_v34 = vpop.eup %12169  ;;  %v8665_v45 = vmul.f32 %v12168_v51, %v8661_v39 }
0x3283   :  { %v8664_v4 = vmul.f32 %v12170_v34, %v8660_v57 }
0x3284   :  { %v8669_v8 = vadd.f32 %v8665_v45, %v14345_v16 }
0x3285   :  { %v12172_v29 = vpop.eup %12171  ;;  %v8668_v0 = vadd.f32 %v8664_v4, %v14353_v55 }
0x3286   :  { %v12174_v12 = vpop.eup %12173  ;;  %v8667_v35 = vmul.f32 %v12172_v29, %v8663_v58 }
0x3287   :  { %11056 = vmatprep.mubr.msk.f32.mxu0 %vm169_vm0, %v8668_v0  ;;  %v8666_v53 = vmul.f32 %v12174_v12, %v8662_v6 }
0x3288   :  { %11057 = vmatmul.mubr.msk.f32.vlgmr.msra.gmra.mrb[130].mxu0 %vm169_vm0, %v8669_v8  ;;  %v8671_v37 = vadd.f32 %v8667_v35, %v14361_v30 }
0x3289   :  { %v8670_v38 = vadd.f32 %v8666_v53, %v14369_v46 }
0x328b   :  { %11059 = vmatprep.mubr.msk.f32.mxu0 %vm169_vm0, %v8670_v38 }
0x328c   :  { %11060 = vmatmul.mubr.msk.f32.gmra.mrb[132].mxu0 %vm169_vm0, %v8671_v37 }
0x328d   :  { %12189 = shalt.err (!%p12186_p4)
}
0x328e   :  { %s12190_s21 = scalar_lea.hbm %s12452_s6, 256 }
0x328f   :  { %p12191_p5 = scmp.ne.s32.totalorder %s12452_s6, %s12190_s21  ;;  %p12194_p6 = scmp.lt.u32.totalorder %s12190_s21, %s12452_s6 }
0x3291   :  { %p12196_p7 = pnand %p12194_p6, %p12191_p5 }
0x3293   :  { %12199 = shalt.err (!%p12196_p7)
}
0x3294   :  { %s12250_s25 = smov 128   ;;  %v9259_v16 = vld [vmem:[#allocation2] ss:$0 sm:$0xff] }
0x3295   :  { %8792 = dma.vmem_to_hbm [thread:$0]  %s8787_s13, 256, %s12452_s6, [#allocation4], %s12250_s25, %s12250_s25, %s12248_s1  }
0x335b   :  { %v11058_v55 = vpop.f32.mrb[130].mxu0 }
0x335c   :  { %v8762_v13 = vadd.f32 %v11058_v55, %v9259_v16  ;;  %v8756_v30 = vpop.f32.mrb[131].mxu0 }
0x335d   :  { %v8757_v23 = vadd.f32 %v9259_v16, %v8756_v30 }
0x335e   :  { %8776 = vst.msk [vmem:[%s12447_s5 + $0x8] sm:$0xff] %vm1025_vm6, %v8762_v13 }
0x335f   :  { %8775 = vst.msk [vmem:[%s12447_s5] sm:$0xff] %vm1025_vm6, %v8757_v23  ;;  %v11061_v46 = vpop.f32.mrb[132].mxu0 }
0x3360   :  { %v8772_v11 = vadd.f32 %v11061_v46, %v9259_v16  ;;  %v8766_v19 = vpop.f32.mrb[133].mxu0 }
0x3361   :  { %v8767_v10 = vadd.f32 %v9259_v16, %v8766_v19 }
0x3362   :  { %8778 = vst.msk [vmem:[%s12447_s5 + $0x18] sm:$0xff] %vm1025_vm6, %v8772_v11 }
0x3363   :  { %8777 = vst.msk [vmem:[%s12447_s5 + $0x10] sm:$0xff] %vm1025_vm6, %v8767_v10 }
0x3364   :  { %12200 = dma.done.wait [#allocation4], 256  }
0x3365   :  { %12201 = vsyncadd [#allocation4], 4294967040 }
0x3366   :  { %8798 = vsyncpa [#allocation4], 1 }

</bundles_post_ra>
